<compile_context>
chip_gen: v6e
topology: v6e:2x2x1
jax: 0.10.0
libtpu: 0.0.40
codegen_flags: <defaults>
</compile_context>

<pallas_src>
import functools

import jax
import jax.numpy as jnp
from jax import lax
from jax.experimental import pallas as pl
from jax.experimental.pallas import tpu as pltpu

LANE = 128
SUBLANE = 8


def _round_up(n, m):
    return (n + m - 1) // m * m


# ----------------------------- in-kernel math ------------------------------
def _gelu_tanh(x):
    # tanh-approximate GELU: |error| vs exact erf-GELU <~ 3e-4, well inside
    # the 5e-3 comparison tolerance. tanh runs on the (otherwise idle) EUP.
    c = 0.7978845608028654  # sqrt(2/pi)
    return 0.5 * x * (1.0 + jnp.tanh(c * (x + 0.044715 * (x * x * x))))


def _kan_layer_body(x, w_ref, gt_ref, invd_ref, ninv2_ref, lnw_ref, lnb_ref,
                    pw_ref, basis_ref, *, grid_size, spline_order, fin_pad,
                    n_out_real):
    """One KANLayer on a (TILE_B, fin_pad) activation held in registers/VMEM.

    w_ref     : ((K+1)*fin_pad, fout_pad) spline slabs 0..K-1 + GELU-base slab K
    gt_ref    : (G, fin_pad)              knots per feature
    invd_ref  : (P, fin_pad)              1/(g[j+k]-g[j])  (==-guarded)
    ninv2_ref : (P, fin_pad)              -1/(g[j+k+1]-g[j+1])
    lnw/lnb   : (1, fout_pad)             LayerNorm affine (0 in padded cols)
    pw_ref    : (1,) SMEM                 PReLU slope
    basis_ref : (TILE_B, >= (K+1)*fin_pad) VMEM scratch for the deep-matmul LHS
    """
    G = grid_size + 2 * spline_order + 1          # number of knots
    K = grid_size + spline_order                  # number of spline bases

    g = gt_ref[...]
    invd = invd_ref[...]
    ninv2 = ninv2_ref[...]

    # ---- GELU base slab goes straight into slab K of the matmul LHS ----
    basis_ref[:, K * fin_pad:(K + 1) * fin_pad] = _gelu_tanh(x)

    # ---- dx_j = x - knot_j, computed once and reused everywhere ----
    dx = [x - g[j:j + 1, :] for j in range(G)]

    # ---- order-0 indicator bases from G shared sign tests (incremental) ----
    ge_prev = (dx[0] >= 0.0).astype(jnp.float32)
    bases = []
    for j in range(1, G):
        ge_cur = (dx[j] >= 0.0).astype(jnp.float32)
        bases.append(ge_prev - ge_cur)             # == [g_j <= x < g_{j+1}]
        ge_prev = ge_cur

    # ---- Cox-de Boor recursion: multiplies only (reciprocals precomputed,
    #      right-term denominator pre-negated host-side) ----
    idx = 0
    for k in range(1, spline_order + 1):
        new_bases = []
        for j in range(G - 1 - k):
            t1 = dx[j] * invd[idx:idx + 1, :] * bases[j]
            t2 = dx[j + k + 1] * ninv2[idx:idx + 1, :] * bases[j + 1]
            new_bases.append(t1 + t2)
            idx += 1
        bases = new_bases                          # len == G - 1 - k

    # ---- store final-level bases at their 128-aligned slab offsets ----
    for j in range(K):
        basis_ref[:, j * fin_pad:(j + 1) * fin_pad] = bases[j]

    # ---- one deep matmul: (TILE_B, (K+1)*Fin_pad) x ((K+1)*Fin_pad, Fout) ----
    y = jnp.dot(basis_ref[:, :(K + 1) * fin_pad], w_ref[...],
                preferred_element_type=jnp.float32)

    # ---- LayerNorm over the *real* Fout features (padded cols of y are 0) ----
    inv_n = 1.0 / float(n_out_real)
    mean = jnp.sum(y, axis=-1, keepdims=True) * inv_n
    var = jnp.sum(y * y, axis=-1, keepdims=True) * inv_n - mean * mean
    yn = (y - mean) * lax.rsqrt(var + 1e-5)
    yn = yn * lnw_ref[...] + lnb_ref[...]          # padded cols -> exactly 0

    # ---- PReLU (single slope from the SMEM scalar path) ----
    a = pw_ref[0]
    return jnp.where(yn >= 0.0, yn, a * yn)


def kan_net_kernel(*refs, n_layers, metas, grid_size, spline_order):
    """Fused KAN network: all layers in one kernel, activations kept in VMEM."""
    x_ref = refs[0]
    o_ref = refs[1 + 7 * n_layers]
    basis_ref = refs[2 + 7 * n_layers]

    x = x_ref[...]
    for l in range(n_layers):
        w, gt, invd, ninv2, lnw, lnb, pw = refs[1 + 7 * l: 1 + 7 * (l + 1)]
        x = _kan_layer_body(x, w, gt, invd, ninv2, lnw, lnb, pw, basis_ref,
                            grid_size=grid_size, spline_order=spline_order,
                            fin_pad=metas[l]["fin_pad"],
                            n_out_real=metas[l]["fout_real"])
    o_ref[...] = x.astype(o_ref.dtype)


# ------------------------------- wrappers ----------------------------------
def _full_spec(shape):
    zeros = (0,) * len(shape)
    return pl.BlockSpec(shape, lambda i, _z=zeros: _z)


def kan_network(x_pad, packed, *, grid_size, spline_order, tile_b,
                vmem_limit_bytes):
    b_pad, fin_pad0 = x_pad.shape
    fout_padL = packed[-1]["fout_pad"]
    K = grid_size + spline_order
    max_fin_pad = max(kp["fin_pad"] for kp in packed)
    n_layers = len(packed)

    metas = tuple(dict(fin_pad=kp["fin_pad"], fout_real=kp["fout_real"])
                  for kp in packed)
    kernel = functools.partial(kan_net_kernel, n_layers=n_layers, metas=metas,
                               grid_size=grid_size, spline_order=spline_order)

    in_specs = [pl.BlockSpec((tile_b, fin_pad0), lambda i: (i, 0))]
    operands = [x_pad]
    for kp in packed:
        for name in ("w", "grid_t", "inv_delta", "neg_inv_den2", "lnw", "lnb"):
            arr = kp[name]
            in_specs.append(_full_spec(arr.shape))
            operands.append(arr)
        in_specs.append(pl.BlockSpec(memory_space=pltpu.MemorySpace.SMEM))
        operands.append(kp["pw"])

    return pl.pallas_call(
        kernel,
        out_shape=jax.ShapeDtypeStruct((b_pad, fout_padL), jnp.float32),
        grid=(b_pad // tile_b,),
        in_specs=in_specs,
        out_specs=pl.BlockSpec((tile_b, fout_padL), lambda i: (i, 0)),
        scratch_shapes=[pltpu.VMEM((tile_b, (K + 1) * max_fin_pad), jnp.float32)],
        compiler_params=pltpu.CompilerParams(
            dimension_semantics=("parallel",),
            vmem_limit_bytes=vmem_limit_bytes),
    )(*operands)


def _default_vmem_budget():
    """Chip-aware VMEM budget/limit; conservative v7x (64 MiB/TC) fallback."""
    cap = 64 << 20
    try:
        cap = int(pltpu.get_tpu_info().vmem_capacity_bytes)
    except Exception:
        pass
    budget = min(cap // 2, 64 << 20)        # v5e/v6e: 64 MiB, v7x: 32 MiB
    limit = min((cap * 3) // 4, 96 << 20)   # v5e/v6e: 96 MiB, v7x: 48 MiB
    return budget, limit


def _pick_tile_b(B, packed, grid_size, spline_order, budget_bytes):
    """Largest batch tile whose fused-layer working set fits the VMEM budget,
    capped so there are >=2 grid steps when the batch allows it (v7x cores)."""
    G = grid_size + 2 * spline_order + 1
    K = grid_size + spline_order
    b8 = _round_up(max(B, 1), SUBLANE)

    resident = 0
    per_row = 0
    for kp in packed:
        resident += 2 * 4 * (kp["w"].size + kp["grid_t"].size
                             + kp["inv_delta"].size + kp["neg_inv_den2"].size
                             + kp["lnw"].size + kp["lnb"].size)
        live = (kp["fin_pad"] * (G + (G - 1) + 2)     # dx + bases + x + gelu
                + (K + 1) * kp["fin_pad"]             # basis scratch
                + 4 * kp["fout_pad"])                 # y / LN temps / next act
        per_row = max(per_row, 4 * live)
    io_row = 2 * 4 * (packed[0]["fin_pad"] + packed[-1]["fout_pad"])  # dbl-buf

    tile = SUBLANE
    for tb in (1024, 512, 256, 128, 64, 32, 16, 8):
        if resident + tb * (per_row + io_row) <= budget_bytes:
            tile = tb
            break
    tile = min(tile, b8)
    if b8 >= 2 * SUBLANE and tile > b8 // 2:
        tile = max(SUBLANE, (b8 // 2) // SUBLANE * SUBLANE)
    return tile


def kan_forward(packed_params, x, *, grid_size, spline_order,
                vmem_budget_bytes=None, vmem_limit_bytes=None):
    # TODO(synk): nn.Dropout (p=0.0 default) and the L1 training-decay wrapper
    # are forward-pass no-ops and are intentionally not implemented.
    B, fin = x.shape
    for a, b in zip(packed_params[:-1], packed_params[1:]):
        assert a["fout_pad"] == b["fin_pad"]

    if vmem_budget_bytes is None or vmem_limit_bytes is None:
        budget, limit = _default_vmem_budget()
        vmem_budget_bytes = vmem_budget_bytes or budget
        vmem_limit_bytes = vmem_limit_bytes or limit

    tile_b = _pick_tile_b(B, packed_params, grid_size, spline_order,
                          vmem_budget_bytes)
    b_pad = _round_up(B, tile_b)
    fin_pad0 = packed_params[0]["fin_pad"]

    # Zero-pad once; padded feature columns stay exactly zero through every
    # layer (zero weight rows + zero LN affine in padded columns).
    x_pad = jnp.zeros((b_pad, fin_pad0), jnp.float32).at[:B, :fin].set(x)

    y_pad = kan_network(x_pad, packed_params, grid_size=grid_size,
                        spline_order=spline_order, tile_b=tile_b,
                        vmem_limit_bytes=vmem_limit_bytes)
    return y_pad[:B, :packed_params[-1]["fout_real"]]


# ------------------------ host-side parameter packing ----------------------
def pack_layer_params(p, *, grid_size, spline_order):
    fout, fin = p["bw"].shape
    K = grid_size + spline_order
    G = grid_size + 2 * spline_order + 1
    fin_pad = _round_up(fin, LANE)
    fout_pad = _round_up(fout, LANE)

    # Fused weight ((K+1)*Fin_pad, Fout_pad): spline slabs 0..K-1 (basis-major,
    # pre-transposed) + GELU-base slab K; zero rows/cols in all padding.
    w = jnp.zeros((K + 1, fin_pad, fout_pad), jnp.float32)
    w = w.at[:K, :fin, :fout].set(jnp.transpose(p["sw"], (2, 1, 0)))  # (K,Fin,Fout)
    w = w.at[K, :fin, :fout].set(p["bw"].T)
    w = w.reshape((K + 1) * fin_pad, fout_pad)

    # knots (Fin, G) -> (G, Fin_pad); padded feature columns replicate col 0.
    gt = p["grid"].T.astype(jnp.float32)
    if fin_pad > fin:
        gt = jnp.concatenate(
            [gt, jnp.broadcast_to(gt[:, :1], (G, fin_pad - fin))], axis=1)

    # Precomputed Cox-de Boor reciprocals, one row per (k, j) pair in kernel
    # walk order. Left-term delta guarded (mirrors the PyTorch reference);
    # right-term reciprocal negated so the kernel uses (x - g) for both terms.
    invd_rows, ninv2_rows = [], []
    for k in range(1, spline_order + 1):
        for j in range(G - 1 - k):
            left, right = gt[j], gt[j + k]
            delta = jnp.where(right == left, jnp.ones_like(right), right - left)
            invd_rows.append(1.0 / delta)
            ninv2_rows.append(-1.0 / (gt[j + k + 1] - gt[j + 1]))
    inv_delta = jnp.stack(invd_rows, axis=0)            # (P, Fin_pad)
    neg_inv_den2 = jnp.stack(ninv2_rows, axis=0)        # (P, Fin_pad)

    lnw = jnp.zeros((1, fout_pad), jnp.float32).at[:, :fout].set(p["lnw"])
    lnb = jnp.zeros((1, fout_pad), jnp.float32).at[:, :fout].set(p["lnb"])
    pw = jnp.reshape(p["pw"], (1,)).astype(jnp.float32)

    return dict(w=w, grid_t=gt, inv_delta=inv_delta, neg_inv_den2=neg_inv_den2,
                lnw=lnw, lnb=lnb, pw=pw,
                fin_real=fin, fout_real=fout, fin_pad=fin_pad, fout_pad=fout_pad)


def init_kan_params(key, layers_hidden, *, grid_size, spline_order, grid_range):
    G = grid_size + 2 * spline_order + 1
    K = grid_size + spline_order
    h = (grid_range[1] - grid_range[0]) / grid_size
    knots = jnp.linspace(grid_range[0] - h * spline_order,
                         grid_range[1] + h * spline_order, G, dtype=jnp.float32)
    params = []
    for fin, fout in zip(layers_hidden[:-1], layers_hidden[1:]):
        key, k1, k2 = jax.random.split(key, 3)
        bb = (3.0 / fin) ** 0.5                          # kaiming_uniform, linear
        bw = jax.random.uniform(k1, (fout, fin), jnp.float32, -bb, bb)
        sb = (3.0 / (fin * K)) ** 0.5
        sw = jax.random.uniform(k2, (fout, fin, K), jnp.float32, -sb, sb)
        grid = jnp.broadcast_to(knots[None, :], (fin, G))    # (Fin, G)
        params.append(dict(
            bw=bw, sw=sw, grid=grid,
            lnw=jnp.ones((1, fout), jnp.float32),
            lnb=jnp.zeros((1, fout), jnp.float32),
            pw=jnp.full((1, 1), 0.25, jnp.float32),
        ))
    return params


# ------------------------- pure-JAX reference ------------------------------
def kan_forward_ref(params, x, *, grid_size, spline_order):
    for p in params:
        grid = p["grid"]                                           # (Fin, G)
        base = jax.nn.gelu(x, approximate=False) @ p["bw"].T
        xu = x[:, :, None]
        bases = ((xu >= grid[None, :, :-1]) & (xu < grid[None, :, 1:])).astype(x.dtype)
        for k in range(1, spline_order + 1):
            left = grid[:, :-(k + 1)]
            right = grid[:, k:-1]
            delta = jnp.where(right == left, jnp.ones_like(right), right - left)
            bases = ((xu - left[None]) / delta[None] * bases[:, :, :-1]
                     + (grid[None, :, k + 1:] - xu)
                     / (grid[None, :, k + 1:] - grid[None, :, 1:-k]) * bases[:, :, 1:])
        B = x.shape[0]
        spline = bases.reshape(B, -1) @ p["sw"].reshape(p["sw"].shape[0], -1).T
        y = base + spline
        mean = y.mean(-1, keepdims=True)
        var = ((y - mean) ** 2).mean(-1, keepdims=True)
        yn = (y - mean) / jnp.sqrt(var + 1e-5)
        yn = yn * p["lnw"] + p["lnb"]
        x = jnp.where(yn >= 0, yn, p["pw"][0, 0] * yn)
    return x


# --------------------------------- main -------------------------------------
if __name__ == "__main__":
    grid_size, spline_order = 5, 3
    grid_range = (-1.0, 1.0)
    layers_hidden = [32, 64, 16]
    B = 8

    key = jax.random.PRNGKey(0)
    kparam, kx = jax.random.split(key)
    params = init_kan_params(kparam, layers_hidden, grid_size=grid_size,
                             spline_order=spline_order, grid_range=grid_range)
    packed = [pack_layer_params(p, grid_size=grid_size, spline_order=spline_order)
              for p in params]
    x = jax.random.normal(kx, (B, layers_hidden[0]), jnp.float32)

    y = kan_forward(packed, x, grid_size=grid_size, spline_order=spline_order)
    y = jax.block_until_ready(y)

    y_ref = kan_forward_ref(params, x, grid_size=grid_size,
                            spline_order=spline_order)

    assert y.shape == (B, layers_hidden[-1]), y.shape
    assert jnp.allclose(y, y_ref, atol=5e-3, rtol=5e-3), (
        float(jnp.max(jnp.abs(y - y_ref))))
    print("KERNEL_OK")
</pallas_src>

<mosaic_0001>
module attributes {stable_mosaic.version = 11 : i64} {
  func.func @kan_net_kernel(%arg0: i32, %arg1: memref<8x128xf32, #tpu.memory_space<vmem>>, %arg2: memref<1152x128xf32, #tpu.memory_space<vmem>>, %arg3: memref<12x128xf32, #tpu.memory_space<vmem>>, %arg4: memref<27x128xf32, #tpu.memory_space<vmem>>, %arg5: memref<27x128xf32, #tpu.memory_space<vmem>>, %arg6: memref<1x128xf32, #tpu.memory_space<vmem>>, %arg7: memref<1x128xf32, #tpu.memory_space<vmem>>, %arg8: memref<1xf32, #tpu.memory_space<smem>>, %arg9: memref<1152x128xf32, #tpu.memory_space<vmem>>, %arg10: memref<12x128xf32, #tpu.memory_space<vmem>>, %arg11: memref<27x128xf32, #tpu.memory_space<vmem>>, %arg12: memref<27x128xf32, #tpu.memory_space<vmem>>, %arg13: memref<1x128xf32, #tpu.memory_space<vmem>>, %arg14: memref<1x128xf32, #tpu.memory_space<vmem>>, %arg15: memref<1xf32, #tpu.memory_space<smem>>, %arg16: memref<8x128xf32, #tpu.memory_space<vmem>>, %arg17: memref<8x1152xf32, #tpu.memory_space<vmem>>) attributes {dimension_semantics = [#tpu.dimension_semantics<parallel>], iteration_bounds = array<i64: 1>, scalar_prefetch = 0 : i64, scratch_operands = 1 : i64, tpu.core_type = #tpu.core_type<tc>, window_params = [{transform_indices = @transform_0, window_bounds = array<i64: 8, 128>}, {pipeline_mode = #tpu.pipeline_mode<synchronous>, transform_indices = @transform_1, window_bounds = array<i64: 1152, 128>}, {pipeline_mode = #tpu.pipeline_mode<synchronous>, transform_indices = @transform_2, window_bounds = array<i64: 12, 128>}, {pipeline_mode = #tpu.pipeline_mode<synchronous>, transform_indices = @transform_3, window_bounds = array<i64: 27, 128>}, {pipeline_mode = #tpu.pipeline_mode<synchronous>, transform_indices = @transform_4, window_bounds = array<i64: 27, 128>}, {pipeline_mode = #tpu.pipeline_mode<synchronous>, transform_indices = @transform_5, window_bounds = array<i64: 1, 128>}, {pipeline_mode = #tpu.pipeline_mode<synchronous>, transform_indices = @transform_6, window_bounds = array<i64: 1, 128>}, {transform_indices = @transform_7, window_bounds = array<i64: 1>}, {pipeline_mode = #tpu.pipeline_mode<synchronous>, transform_indices = @transform_8, window_bounds = array<i64: 1152, 128>}, {pipeline_mode = #tpu.pipeline_mode<synchronous>, transform_indices = @transform_9, window_bounds = array<i64: 12, 128>}, {pipeline_mode = #tpu.pipeline_mode<synchronous>, transform_indices = @transform_10, window_bounds = array<i64: 27, 128>}, {pipeline_mode = #tpu.pipeline_mode<synchronous>, transform_indices = @transform_11, window_bounds = array<i64: 27, 128>}, {pipeline_mode = #tpu.pipeline_mode<synchronous>, transform_indices = @transform_12, window_bounds = array<i64: 1, 128>}, {pipeline_mode = #tpu.pipeline_mode<synchronous>, transform_indices = @transform_13, window_bounds = array<i64: 1, 128>}, {transform_indices = @transform_14, window_bounds = array<i64: 1>}, {transform_indices = @transform_15, window_bounds = array<i64: 8, 128>}]} {
    %c0 = arith.constant 0 : index
    %c0_0 = arith.constant 0 : index
    %0 = vector.load %arg1[%c0, %c0_0] : memref<8x128xf32, #tpu.memory_space<vmem>>, vector<8x128xf32>
    %c0_1 = arith.constant 0 : index
    %c0_2 = arith.constant 0 : index
    %1 = vector.load %arg3[%c0_1, %c0_2] : memref<12x128xf32, #tpu.memory_space<vmem>>, vector<12x128xf32>
    %c0_3 = arith.constant 0 : index
    %c0_4 = arith.constant 0 : index
    %2 = vector.load %arg4[%c0_3, %c0_4] : memref<27x128xf32, #tpu.memory_space<vmem>>, vector<27x128xf32>
    %c0_5 = arith.constant 0 : index
    %c0_6 = arith.constant 0 : index
    %3 = vector.load %arg5[%c0_5, %c0_6] : memref<27x128xf32, #tpu.memory_space<vmem>>, vector<27x128xf32>
    %cst = arith.constant 5.000000e-01 : f32
    %4 = vector.broadcast %cst : f32 to vector<8x128xf32>
    %5 = arith.mulf %4, %0 : vector<8x128xf32>
    %6 = arith.mulf %0, %0 : vector<8x128xf32>
    %7 = arith.mulf %6, %0 : vector<8x128xf32>
    %cst_7 = arith.constant 4.471500e-02 : f32
    %8 = vector.broadcast %cst_7 : f32 to vector<8x128xf32>
    %9 = arith.mulf %8, %7 : vector<8x128xf32>
    %10 = arith.addf %0, %9 : vector<8x128xf32>
    %cst_8 = arith.constant 0.797884583 : f32
    %11 = vector.broadcast %cst_8 : f32 to vector<8x128xf32>
    %12 = arith.mulf %11, %10 : vector<8x128xf32>
    %13 = math.tanh %12 : vector<8x128xf32>
    %cst_9 = arith.constant 1.000000e+00 : f32
    %14 = vector.broadcast %cst_9 : f32 to vector<8x128xf32>
    %15 = arith.addf %14, %13 : vector<8x128xf32>
    %16 = arith.mulf %5, %15 : vector<8x128xf32>
    %c0_10 = arith.constant 0 : index
    %c1024 = arith.constant 1024 : index
    %17 = vector.load %arg17[%c0_10, %c1024] : memref<8x1152xf32, #tpu.memory_space<vmem>>, vector<8x128xf32>
    tpu.vector_store %arg17[%c0_10, %c1024], %16 {strides = array<i32>} : memref<8x1152xf32, #tpu.memory_space<vmem>>, vector<8x128xf32>,
    %18 = vector.extract_strided_slice %1 {offsets = [0, 0], sizes = [1, 128], strides = [1, 1]} : vector<12x128xf32> to vector<1x128xf32>
    %19 = vector.broadcast %18 : vector<1x128xf32> to vector<8x128xf32>
    %20 = arith.subf %0, %19 : vector<8x128xf32>
    %21 = vector.extract_strided_slice %1 {offsets = [1, 0], sizes = [1, 128], strides = [1, 1]} : vector<12x128xf32> to vector<1x128xf32>
    %22 = vector.broadcast %21 : vector<1x128xf32> to vector<8x128xf32>
    %23 = arith.subf %0, %22 : vector<8x128xf32>
    %24 = vector.extract_strided_slice %1 {offsets = [2, 0], sizes = [1, 128], strides = [1, 1]} : vector<12x128xf32> to vector<1x128xf32>
    %25 = vector.broadcast %24 : vector<1x128xf32> to vector<8x128xf32>
    %26 = arith.subf %0, %25 : vector<8x128xf32>
    %27 = vector.extract_strided_slice %1 {offsets = [3, 0], sizes = [1, 128], strides = [1, 1]} : vector<12x128xf32> to vector<1x128xf32>
    %28 = vector.broadcast %27 : vector<1x128xf32> to vector<8x128xf32>
    %29 = arith.subf %0, %28 : vector<8x128xf32>
    %30 = vector.extract_strided_slice %1 {offsets = [4, 0], sizes = [1, 128], strides = [1, 1]} : vector<12x128xf32> to vector<1x128xf32>
    %31 = vector.broadcast %30 : vector<1x128xf32> to vector<8x128xf32>
    %32 = arith.subf %0, %31 : vector<8x128xf32>
    %33 = vector.extract_strided_slice %1 {offsets = [5, 0], sizes = [1, 128], strides = [1, 1]} : vector<12x128xf32> to vector<1x128xf32>
    %34 = vector.broadcast %33 : vector<1x128xf32> to vector<8x128xf32>
    %35 = arith.subf %0, %34 : vector<8x128xf32>
    %36 = vector.extract_strided_slice %1 {offsets = [6, 0], sizes = [1, 128], strides = [1, 1]} : vector<12x128xf32> to vector<1x128xf32>
    %37 = vector.broadcast %36 : vector<1x128xf32> to vector<8x128xf32>
    %38 = arith.subf %0, %37 : vector<8x128xf32>
    %39 = vector.extract_strided_slice %1 {offsets = [7, 0], sizes = [1, 128], strides = [1, 1]} : vector<12x128xf32> to vector<1x128xf32>
    %40 = vector.broadcast %39 : vector<1x128xf32> to vector<8x128xf32>
    %41 = arith.subf %0, %40 : vector<8x128xf32>
    %42 = vector.extract_strided_slice %1 {offsets = [8, 0], sizes = [1, 128], strides = [1, 1]} : vector<12x128xf32> to vector<1x128xf32>
    %43 = vector.broadcast %42 : vector<1x128xf32> to vector<8x128xf32>
    %44 = arith.subf %0, %43 : vector<8x128xf32>
    %45 = vector.extract_strided_slice %1 {offsets = [9, 0], sizes = [1, 128], strides = [1, 1]} : vector<12x128xf32> to vector<1x128xf32>
    %46 = vector.broadcast %45 : vector<1x128xf32> to vector<8x128xf32>
    %47 = arith.subf %0, %46 : vector<8x128xf32>
    %48 = vector.extract_strided_slice %1 {offsets = [10, 0], sizes = [1, 128], strides = [1, 1]} : vector<12x128xf32> to vector<1x128xf32>
    %49 = vector.broadcast %48 : vector<1x128xf32> to vector<8x128xf32>
    %50 = arith.subf %0, %49 : vector<8x128xf32>
    %51 = vector.extract_strided_slice %1 {offsets = [11, 0], sizes = [1, 128], strides = [1, 1]} : vector<12x128xf32> to vector<1x128xf32>
    %52 = vector.broadcast %51 : vector<1x128xf32> to vector<8x128xf32>
    %53 = arith.subf %0, %52 : vector<8x128xf32>
    %cst_11 = arith.constant 0.000000e+00 : f32
    %54 = vector.broadcast %cst_11 : f32 to vector<8x128xf32>
    %55 = arith.cmpf oge, %20, %54 : vector<8x128xf32>
    %56 = arith.extui %55 : vector<8x128xi1> to vector<8x128xi32>
    %57 = arith.sitofp %56 : vector<8x128xi32> to vector<8x128xf32>
    %cst_12 = arith.constant 0.000000e+00 : f32
    %58 = vector.broadcast %cst_12 : f32 to vector<8x128xf32>
    %59 = arith.cmpf oge, %23, %58 : vector<8x128xf32>
    %60 = arith.extui %59 : vector<8x128xi1> to vector<8x128xi32>
    %61 = arith.sitofp %60 : vector<8x128xi32> to vector<8x128xf32>
    %62 = arith.subf %57, %61 : vector<8x128xf32>
    %cst_13 = arith.constant 0.000000e+00 : f32
    %63 = vector.broadcast %cst_13 : f32 to vector<8x128xf32>
    %64 = arith.cmpf oge, %26, %63 : vector<8x128xf32>
    %65 = arith.extui %64 : vector<8x128xi1> to vector<8x128xi32>
    %66 = arith.sitofp %65 : vector<8x128xi32> to vector<8x128xf32>
    %67 = arith.subf %61, %66 : vector<8x128xf32>
    %cst_14 = arith.constant 0.000000e+00 : f32
    %68 = vector.broadcast %cst_14 : f32 to vector<8x128xf32>
    %69 = arith.cmpf oge, %29, %68 : vector<8x128xf32>
    %70 = arith.extui %69 : vector<8x128xi1> to vector<8x128xi32>
    %71 = arith.sitofp %70 : vector<8x128xi32> to vector<8x128xf32>
    %72 = arith.subf %66, %71 : vector<8x128xf32>
    %cst_15 = arith.constant 0.000000e+00 : f32
    %73 = vector.broadcast %cst_15 : f32 to vector<8x128xf32>
    %74 = arith.cmpf oge, %32, %73 : vector<8x128xf32>
    %75 = arith.extui %74 : vector<8x128xi1> to vector<8x128xi32>
    %76 = arith.sitofp %75 : vector<8x128xi32> to vector<8x128xf32>
    %77 = arith.subf %71, %76 : vector<8x128xf32>
    %cst_16 = arith.constant 0.000000e+00 : f32
    %78 = vector.broadcast %cst_16 : f32 to vector<8x128xf32>
    %79 = arith.cmpf oge, %35, %78 : vector<8x128xf32>
    %80 = arith.extui %79 : vector<8x128xi1> to vector<8x128xi32>
    %81 = arith.sitofp %80 : vector<8x128xi32> to vector<8x128xf32>
    %82 = arith.subf %76, %81 : vector<8x128xf32>
    %cst_17 = arith.constant 0.000000e+00 : f32
    %83 = vector.broadcast %cst_17 : f32 to vector<8x128xf32>
    %84 = arith.cmpf oge, %38, %83 : vector<8x128xf32>
    %85 = arith.extui %84 : vector<8x128xi1> to vector<8x128xi32>
    %86 = arith.sitofp %85 : vector<8x128xi32> to vector<8x128xf32>
    %87 = arith.subf %81, %86 : vector<8x128xf32>
    %cst_18 = arith.constant 0.000000e+00 : f32
    %88 = vector.broadcast %cst_18 : f32 to vector<8x128xf32>
    %89 = arith.cmpf oge, %41, %88 : vector<8x128xf32>
    %90 = arith.extui %89 : vector<8x128xi1> to vector<8x128xi32>
    %91 = arith.sitofp %90 : vector<8x128xi32> to vector<8x128xf32>
    %92 = arith.subf %86, %91 : vector<8x128xf32>
    %cst_19 = arith.constant 0.000000e+00 : f32
    %93 = vector.broadcast %cst_19 : f32 to vector<8x128xf32>
    %94 = arith.cmpf oge, %44, %93 : vector<8x128xf32>
    %95 = arith.extui %94 : vector<8x128xi1> to vector<8x128xi32>
    %96 = arith.sitofp %95 : vector<8x128xi32> to vector<8x128xf32>
    %97 = arith.subf %91, %96 : vector<8x128xf32>
    %cst_20 = arith.constant 0.000000e+00 : f32
    %98 = vector.broadcast %cst_20 : f32 to vector<8x128xf32>
    %99 = arith.cmpf oge, %47, %98 : vector<8x128xf32>
    %100 = arith.extui %99 : vector<8x128xi1> to vector<8x128xi32>
    %101 = arith.sitofp %100 : vector<8x128xi32> to vector<8x128xf32>
    %102 = arith.subf %96, %101 : vector<8x128xf32>
    %cst_21 = arith.constant 0.000000e+00 : f32
    %103 = vector.broadcast %cst_21 : f32 to vector<8x128xf32>
    %104 = arith.cmpf oge, %50, %103 : vector<8x128xf32>
    %105 = arith.extui %104 : vector<8x128xi1> to vector<8x128xi32>
    %106 = arith.sitofp %105 : vector<8x128xi32> to vector<8x128xf32>
    %107 = arith.subf %101, %106 : vector<8x128xf32>
    %cst_22 = arith.constant 0.000000e+00 : f32
    %108 = vector.broadcast %cst_22 : f32 to vector<8x128xf32>
    %109 = arith.cmpf oge, %53, %108 : vector<8x128xf32>
    %110 = arith.extui %109 : vector<8x128xi1> to vector<8x128xi32>
    %111 = arith.sitofp %110 : vector<8x128xi32> to vector<8x128xf32>
    %112 = arith.subf %106, %111 : vector<8x128xf32>
    %113 = vector.extract_strided_slice %2 {offsets = [0, 0], sizes = [1, 128], strides = [1, 1]} : vector<27x128xf32> to vector<1x128xf32>
    %114 = vector.broadcast %113 : vector<1x128xf32> to vector<8x128xf32>
    %115 = arith.mulf %20, %114 : vector<8x128xf32>
    %116 = arith.mulf %115, %62 : vector<8x128xf32>
    %117 = vector.extract_strided_slice %3 {offsets = [0, 0], sizes = [1, 128], strides = [1, 1]} : vector<27x128xf32> to vector<1x128xf32>
    %118 = vector.broadcast %117 : vector<1x128xf32> to vector<8x128xf32>
    %119 = arith.mulf %26, %118 : vector<8x128xf32>
    %120 = arith.mulf %119, %67 : vector<8x128xf32>
    %121 = arith.addf %116, %120 : vector<8x128xf32>
    %122 = vector.extract_strided_slice %2 {offsets = [1, 0], sizes = [1, 128], strides = [1, 1]} : vector<27x128xf32> to vector<1x128xf32>
    %123 = vector.broadcast %122 : vector<1x128xf32> to vector<8x128xf32>
    %124 = arith.mulf %23, %123 : vector<8x128xf32>
    %125 = arith.mulf %124, %67 : vector<8x128xf32>
    %126 = vector.extract_strided_slice %3 {offsets = [1, 0], sizes = [1, 128], strides = [1, 1]} : vector<27x128xf32> to vector<1x128xf32>
    %127 = vector.broadcast %126 : vector<1x128xf32> to vector<8x128xf32>
    %128 = arith.mulf %29, %127 : vector<8x128xf32>
    %129 = arith.mulf %128, %72 : vector<8x128xf32>
    %130 = arith.addf %125, %129 : vector<8x128xf32>
    %131 = vector.extract_strided_slice %2 {offsets = [2, 0], sizes = [1, 128], strides = [1, 1]} : vector<27x128xf32> to vector<1x128xf32>
    %132 = vector.broadcast %131 : vector<1x128xf32> to vector<8x128xf32>
    %133 = arith.mulf %26, %132 : vector<8x128xf32>
    %134 = arith.mulf %133, %72 : vector<8x128xf32>
    %135 = vector.extract_strided_slice %3 {offsets = [2, 0], sizes = [1, 128], strides = [1, 1]} : vector<27x128xf32> to vector<1x128xf32>
    %136 = vector.broadcast %135 : vector<1x128xf32> to vector<8x128xf32>
    %137 = arith.mulf %32, %136 : vector<8x128xf32>
    %138 = arith.mulf %137, %77 : vector<8x128xf32>
    %139 = arith.addf %134, %138 : vector<8x128xf32>
    %140 = vector.extract_strided_slice %2 {offsets = [3, 0], sizes = [1, 128], strides = [1, 1]} : vector<27x128xf32> to vector<1x128xf32>
    %141 = vector.broadcast %140 : vector<1x128xf32> to vector<8x128xf32>
    %142 = arith.mulf %29, %141 : vector<8x128xf32>
    %143 = arith.mulf %142, %77 : vector<8x128xf32>
    %144 = vector.extract_strided_slice %3 {offsets = [3, 0], sizes = [1, 128], strides = [1, 1]} : vector<27x128xf32> to vector<1x128xf32>
    %145 = vector.broadcast %144 : vector<1x128xf32> to vector<8x128xf32>
    %146 = arith.mulf %35, %145 : vector<8x128xf32>
    %147 = arith.mulf %146, %82 : vector<8x128xf32>
    %148 = arith.addf %143, %147 : vector<8x128xf32>
    %149 = vector.extract_strided_slice %2 {offsets = [4, 0], sizes = [1, 128], strides = [1, 1]} : vector<27x128xf32> to vector<1x128xf32>
    %150 = vector.broadcast %149 : vector<1x128xf32> to vector<8x128xf32>
    %151 = arith.mulf %32, %150 : vector<8x128xf32>
    %152 = arith.mulf %151, %82 : vector<8x128xf32>
    %153 = vector.extract_strided_slice %3 {offsets = [4, 0], sizes = [1, 128], strides = [1, 1]} : vector<27x128xf32> to vector<1x128xf32>
    %154 = vector.broadcast %153 : vector<1x128xf32> to vector<8x128xf32>
    %155 = arith.mulf %38, %154 : vector<8x128xf32>
    %156 = arith.mulf %155, %87 : vector<8x128xf32>
    %157 = arith.addf %152, %156 : vector<8x128xf32>
    %158 = vector.extract_strided_slice %2 {offsets = [5, 0], sizes = [1, 128], strides = [1, 1]} : vector<27x128xf32> to vector<1x128xf32>
    %159 = vector.broadcast %158 : vector<1x128xf32> to vector<8x128xf32>
    %160 = arith.mulf %35, %159 : vector<8x128xf32>
    %161 = arith.mulf %160, %87 : vector<8x128xf32>
    %162 = vector.extract_strided_slice %3 {offsets = [5, 0], sizes = [1, 128], strides = [1, 1]} : vector<27x128xf32> to vector<1x128xf32>
    %163 = vector.broadcast %162 : vector<1x128xf32> to vector<8x128xf32>
    %164 = arith.mulf %41, %163 : vector<8x128xf32>
    %165 = arith.mulf %164, %92 : vector<8x128xf32>
    %166 = arith.addf %161, %165 : vector<8x128xf32>
    %167 = vector.extract_strided_slice %2 {offsets = [6, 0], sizes = [1, 128], strides = [1, 1]} : vector<27x128xf32> to vector<1x128xf32>
    %168 = vector.broadcast %167 : vector<1x128xf32> to vector<8x128xf32>
    %169 = arith.mulf %38, %168 : vector<8x128xf32>
    %170 = arith.mulf %169, %92 : vector<8x128xf32>
    %171 = vector.extract_strided_slice %3 {offsets = [6, 0], sizes = [1, 128], strides = [1, 1]} : vector<27x128xf32> to vector<1x128xf32>
    %172 = vector.broadcast %171 : vector<1x128xf32> to vector<8x128xf32>
    %173 = arith.mulf %44, %172 : vector<8x128xf32>
    %174 = arith.mulf %173, %97 : vector<8x128xf32>
    %175 = arith.addf %170, %174 : vector<8x128xf32>
    %176 = vector.extract_strided_slice %2 {offsets = [7, 0], sizes = [1, 128], strides = [1, 1]} : vector<27x128xf32> to vector<1x128xf32>
    %177 = vector.broadcast %176 : vector<1x128xf32> to vector<8x128xf32>
    %178 = arith.mulf %41, %177 : vector<8x128xf32>
    %179 = arith.mulf %178, %97 : vector<8x128xf32>
    %180 = vector.extract_strided_slice %3 {offsets = [7, 0], sizes = [1, 128], strides = [1, 1]} : vector<27x128xf32> to vector<1x128xf32>
    %181 = vector.broadcast %180 : vector<1x128xf32> to vector<8x128xf32>
    %182 = arith.mulf %47, %181 : vector<8x128xf32>
    %183 = arith.mulf %182, %102 : vector<8x128xf32>
    %184 = arith.addf %179, %183 : vector<8x128xf32>
    %185 = vector.extract_strided_slice %2 {offsets = [8, 0], sizes = [1, 128], strides = [1, 1]} : vector<27x128xf32> to vector<1x128xf32>
    %186 = vector.broadcast %185 : vector<1x128xf32> to vector<8x128xf32>
    %187 = arith.mulf %44, %186 : vector<8x128xf32>
    %188 = arith.mulf %187, %102 : vector<8x128xf32>
    %189 = vector.extract_strided_slice %3 {offsets = [8, 0], sizes = [1, 128], strides = [1, 1]} : vector<27x128xf32> to vector<1x128xf32>
    %190 = vector.broadcast %189 : vector<1x128xf32> to vector<8x128xf32>
    %191 = arith.mulf %50, %190 : vector<8x128xf32>
    %192 = arith.mulf %191, %107 : vector<8x128xf32>
    %193 = arith.addf %188, %192 : vector<8x128xf32>
    %194 = vector.extract_strided_slice %2 {offsets = [9, 0], sizes = [1, 128], strides = [1, 1]} : vector<27x128xf32> to vector<1x128xf32>
    %195 = vector.broadcast %194 : vector<1x128xf32> to vector<8x128xf32>
    %196 = arith.mulf %47, %195 : vector<8x128xf32>
    %197 = arith.mulf %196, %107 : vector<8x128xf32>
    %198 = vector.extract_strided_slice %3 {offsets = [9, 0], sizes = [1, 128], strides = [1, 1]} : vector<27x128xf32> to vector<1x128xf32>
    %199 = vector.broadcast %198 : vector<1x128xf32> to vector<8x128xf32>
    %200 = arith.mulf %53, %199 : vector<8x128xf32>
    %201 = arith.mulf %200, %112 : vector<8x128xf32>
    %202 = arith.addf %197, %201 : vector<8x128xf32>
    %203 = vector.extract_strided_slice %2 {offsets = [10, 0], sizes = [1, 128], strides = [1, 1]} : vector<27x128xf32> to vector<1x128xf32>
    %204 = vector.broadcast %203 : vector<1x128xf32> to vector<8x128xf32>
    %205 = arith.mulf %20, %204 : vector<8x128xf32>
    %206 = arith.mulf %205, %121 : vector<8x128xf32>
    %207 = vector.extract_strided_slice %3 {offsets = [10, 0], sizes = [1, 128], strides = [1, 1]} : vector<27x128xf32> to vector<1x128xf32>
    %208 = vector.broadcast %207 : vector<1x128xf32> to vector<8x128xf32>
    %209 = arith.mulf %29, %208 : vector<8x128xf32>
    %210 = arith.mulf %209, %130 : vector<8x128xf32>
    %211 = arith.addf %206, %210 : vector<8x128xf32>
    %212 = vector.extract_strided_slice %2 {offsets = [11, 0], sizes = [1, 128], strides = [1, 1]} : vector<27x128xf32> to vector<1x128xf32>
    %213 = vector.broadcast %212 : vector<1x128xf32> to vector<8x128xf32>
    %214 = arith.mulf %23, %213 : vector<8x128xf32>
    %215 = arith.mulf %214, %130 : vector<8x128xf32>
    %216 = vector.extract_strided_slice %3 {offsets = [11, 0], sizes = [1, 128], strides = [1, 1]} : vector<27x128xf32> to vector<1x128xf32>
    %217 = vector.broadcast %216 : vector<1x128xf32> to vector<8x128xf32>
    %218 = arith.mulf %32, %217 : vector<8x128xf32>
    %219 = arith.mulf %218, %139 : vector<8x128xf32>
    %220 = arith.addf %215, %219 : vector<8x128xf32>
    %221 = vector.extract_strided_slice %2 {offsets = [12, 0], sizes = [1, 128], strides = [1, 1]} : vector<27x128xf32> to vector<1x128xf32>
    %222 = vector.broadcast %221 : vector<1x128xf32> to vector<8x128xf32>
    %223 = arith.mulf %26, %222 : vector<8x128xf32>
    %224 = arith.mulf %223, %139 : vector<8x128xf32>
    %225 = vector.extract_strided_slice %3 {offsets = [12, 0], sizes = [1, 128], strides = [1, 1]} : vector<27x128xf32> to vector<1x128xf32>
    %226 = vector.broadcast %225 : vector<1x128xf32> to vector<8x128xf32>
    %227 = arith.mulf %35, %226 : vector<8x128xf32>
    %228 = arith.mulf %227, %148 : vector<8x128xf32>
    %229 = arith.addf %224, %228 : vector<8x128xf32>
    %230 = vector.extract_strided_slice %2 {offsets = [13, 0], sizes = [1, 128], strides = [1, 1]} : vector<27x128xf32> to vector<1x128xf32>
    %231 = vector.broadcast %230 : vector<1x128xf32> to vector<8x128xf32>
    %232 = arith.mulf %29, %231 : vector<8x128xf32>
    %233 = arith.mulf %232, %148 : vector<8x128xf32>
    %234 = vector.extract_strided_slice %3 {offsets = [13, 0], sizes = [1, 128], strides = [1, 1]} : vector<27x128xf32> to vector<1x128xf32>
    %235 = vector.broadcast %234 : vector<1x128xf32> to vector<8x128xf32>
    %236 = arith.mulf %38, %235 : vector<8x128xf32>
    %237 = arith.mulf %236, %157 : vector<8x128xf32>
    %238 = arith.addf %233, %237 : vector<8x128xf32>
    %239 = vector.extract_strided_slice %2 {offsets = [14, 0], sizes = [1, 128], strides = [1, 1]} : vector<27x128xf32> to vector<1x128xf32>
    %240 = vector.broadcast %239 : vector<1x128xf32> to vector<8x128xf32>
    %241 = arith.mulf %32, %240 : vector<8x128xf32>
    %242 = arith.mulf %241, %157 : vector<8x128xf32>
    %243 = vector.extract_strided_slice %3 {offsets = [14, 0], sizes = [1, 128], strides = [1, 1]} : vector<27x128xf32> to vector<1x128xf32>
    %244 = vector.broadcast %243 : vector<1x128xf32> to vector<8x128xf32>
    %245 = arith.mulf %41, %244 : vector<8x128xf32>
    %246 = arith.mulf %245, %166 : vector<8x128xf32>
    %247 = arith.addf %242, %246 : vector<8x128xf32>
    %248 = vector.extract_strided_slice %2 {offsets = [15, 0], sizes = [1, 128], strides = [1, 1]} : vector<27x128xf32> to vector<1x128xf32>
    %249 = vector.broadcast %248 : vector<1x128xf32> to vector<8x128xf32>
    %250 = arith.mulf %35, %249 : vector<8x128xf32>
    %251 = arith.mulf %250, %166 : vector<8x128xf32>
    %252 = vector.extract_strided_slice %3 {offsets = [15, 0], sizes = [1, 128], strides = [1, 1]} : vector<27x128xf32> to vector<1x128xf32>
    %253 = vector.broadcast %252 : vector<1x128xf32> to vector<8x128xf32>
    %254 = arith.mulf %44, %253 : vector<8x128xf32>
    %255 = arith.mulf %254, %175 : vector<8x128xf32>
    %256 = arith.addf %251, %255 : vector<8x128xf32>
    %257 = vector.extract_strided_slice %2 {offsets = [16, 0], sizes = [1, 128], strides = [1, 1]} : vector<27x128xf32> to vector<1x128xf32>
    %258 = vector.broadcast %257 : vector<1x128xf32> to vector<8x128xf32>
    %259 = arith.mulf %38, %258 : vector<8x128xf32>
    %260 = arith.mulf %259, %175 : vector<8x128xf32>
    %261 = vector.extract_strided_slice %3 {offsets = [16, 0], sizes = [1, 128], strides = [1, 1]} : vector<27x128xf32> to vector<1x128xf32>
    %262 = vector.broadcast %261 : vector<1x128xf32> to vector<8x128xf32>
    %263 = arith.mulf %47, %262 : vector<8x128xf32>
    %264 = arith.mulf %263, %184 : vector<8x128xf32>
    %265 = arith.addf %260, %264 : vector<8x128xf32>
    %266 = vector.extract_strided_slice %2 {offsets = [17, 0], sizes = [1, 128], strides = [1, 1]} : vector<27x128xf32> to vector<1x128xf32>
    %267 = vector.broadcast %266 : vector<1x128xf32> to vector<8x128xf32>
    %268 = arith.mulf %41, %267 : vector<8x128xf32>
    %269 = arith.mulf %268, %184 : vector<8x128xf32>
    %270 = vector.extract_strided_slice %3 {offsets = [17, 0], sizes = [1, 128], strides = [1, 1]} : vector<27x128xf32> to vector<1x128xf32>
    %271 = vector.broadcast %270 : vector<1x128xf32> to vector<8x128xf32>
    %272 = arith.mulf %50, %271 : vector<8x128xf32>
    %273 = arith.mulf %272, %193 : vector<8x128xf32>
    %274 = arith.addf %269, %273 : vector<8x128xf32>
    %275 = vector.extract_strided_slice %2 {offsets = [18, 0], sizes = [1, 128], strides = [1, 1]} : vector<27x128xf32> to vector<1x128xf32>
    %276 = vector.broadcast %275 : vector<1x128xf32> to vector<8x128xf32>
    %277 = arith.mulf %44, %276 : vector<8x128xf32>
    %278 = arith.mulf %277, %193 : vector<8x128xf32>
    %279 = vector.extract_strided_slice %3 {offsets = [18, 0], sizes = [1, 128], strides = [1, 1]} : vector<27x128xf32> to vector<1x128xf32>
    %280 = vector.broadcast %279 : vector<1x128xf32> to vector<8x128xf32>
    %281 = arith.mulf %53, %280 : vector<8x128xf32>
    %282 = arith.mulf %281, %202 : vector<8x128xf32>
    %283 = arith.addf %278, %282 : vector<8x128xf32>
    %284 = vector.extract_strided_slice %2 {offsets = [19, 0], sizes = [1, 128], strides = [1, 1]} : vector<27x128xf32> to vector<1x128xf32>
    %285 = vector.broadcast %284 : vector<1x128xf32> to vector<8x128xf32>
    %286 = arith.mulf %20, %285 : vector<8x128xf32>
    %287 = arith.mulf %286, %211 : vector<8x128xf32>
    %288 = vector.extract_strided_slice %3 {offsets = [19, 0], sizes = [1, 128], strides = [1, 1]} : vector<27x128xf32> to vector<1x128xf32>
    %289 = vector.broadcast %288 : vector<1x128xf32> to vector<8x128xf32>
    %290 = arith.mulf %32, %289 : vector<8x128xf32>
    %291 = arith.mulf %290, %220 : vector<8x128xf32>
    %292 = arith.addf %287, %291 : vector<8x128xf32>
    %293 = vector.extract_strided_slice %2 {offsets = [20, 0], sizes = [1, 128], strides = [1, 1]} : vector<27x128xf32> to vector<1x128xf32>
    %294 = vector.broadcast %293 : vector<1x128xf32> to vector<8x128xf32>
    %295 = arith.mulf %23, %294 : vector<8x128xf32>
    %296 = arith.mulf %295, %220 : vector<8x128xf32>
    %297 = vector.extract_strided_slice %3 {offsets = [20, 0], sizes = [1, 128], strides = [1, 1]} : vector<27x128xf32> to vector<1x128xf32>
    %298 = vector.broadcast %297 : vector<1x128xf32> to vector<8x128xf32>
    %299 = arith.mulf %35, %298 : vector<8x128xf32>
    %300 = arith.mulf %299, %229 : vector<8x128xf32>
    %301 = arith.addf %296, %300 : vector<8x128xf32>
    %302 = vector.extract_strided_slice %2 {offsets = [21, 0], sizes = [1, 128], strides = [1, 1]} : vector<27x128xf32> to vector<1x128xf32>
    %303 = vector.broadcast %302 : vector<1x128xf32> to vector<8x128xf32>
    %304 = arith.mulf %26, %303 : vector<8x128xf32>
    %305 = arith.mulf %304, %229 : vector<8x128xf32>
    %306 = vector.extract_strided_slice %3 {offsets = [21, 0], sizes = [1, 128], strides = [1, 1]} : vector<27x128xf32> to vector<1x128xf32>
    %307 = vector.broadcast %306 : vector<1x128xf32> to vector<8x128xf32>
    %308 = arith.mulf %38, %307 : vector<8x128xf32>
    %309 = arith.mulf %308, %238 : vector<8x128xf32>
    %310 = arith.addf %305, %309 : vector<8x128xf32>
    %311 = vector.extract_strided_slice %2 {offsets = [22, 0], sizes = [1, 128], strides = [1, 1]} : vector<27x128xf32> to vector<1x128xf32>
    %312 = vector.broadcast %311 : vector<1x128xf32> to vector<8x128xf32>
    %313 = arith.mulf %29, %312 : vector<8x128xf32>
    %314 = arith.mulf %313, %238 : vector<8x128xf32>
    %315 = vector.extract_strided_slice %3 {offsets = [22, 0], sizes = [1, 128], strides = [1, 1]} : vector<27x128xf32> to vector<1x128xf32>
    %316 = vector.broadcast %315 : vector<1x128xf32> to vector<8x128xf32>
    %317 = arith.mulf %41, %316 : vector<8x128xf32>
    %318 = arith.mulf %317, %247 : vector<8x128xf32>
    %319 = arith.addf %314, %318 : vector<8x128xf32>
    %320 = vector.extract_strided_slice %2 {offsets = [23, 0], sizes = [1, 128], strides = [1, 1]} : vector<27x128xf32> to vector<1x128xf32>
    %321 = vector.broadcast %320 : vector<1x128xf32> to vector<8x128xf32>
    %322 = arith.mulf %32, %321 : vector<8x128xf32>
    %323 = arith.mulf %322, %247 : vector<8x128xf32>
    %324 = vector.extract_strided_slice %3 {offsets = [23, 0], sizes = [1, 128], strides = [1, 1]} : vector<27x128xf32> to vector<1x128xf32>
    %325 = vector.broadcast %324 : vector<1x128xf32> to vector<8x128xf32>
    %326 = arith.mulf %44, %325 : vector<8x128xf32>
    %327 = arith.mulf %326, %256 : vector<8x128xf32>
    %328 = arith.addf %323, %327 : vector<8x128xf32>
    %329 = vector.extract_strided_slice %2 {offsets = [24, 0], sizes = [1, 128], strides = [1, 1]} : vector<27x128xf32> to vector<1x128xf32>
    %330 = vector.broadcast %329 : vector<1x128xf32> to vector<8x128xf32>
    %331 = arith.mulf %35, %330 : vector<8x128xf32>
    %332 = arith.mulf %331, %256 : vector<8x128xf32>
    %333 = vector.extract_strided_slice %3 {offsets = [24, 0], sizes = [1, 128], strides = [1, 1]} : vector<27x128xf32> to vector<1x128xf32>
    %334 = vector.broadcast %333 : vector<1x128xf32> to vector<8x128xf32>
    %335 = arith.mulf %47, %334 : vector<8x128xf32>
    %336 = arith.mulf %335, %265 : vector<8x128xf32>
    %337 = arith.addf %332, %336 : vector<8x128xf32>
    %338 = vector.extract_strided_slice %2 {offsets = [25, 0], sizes = [1, 128], strides = [1, 1]} : vector<27x128xf32> to vector<1x128xf32>
    %339 = vector.broadcast %338 : vector<1x128xf32> to vector<8x128xf32>
    %340 = arith.mulf %38, %339 : vector<8x128xf32>
    %341 = arith.mulf %340, %265 : vector<8x128xf32>
    %342 = vector.extract_strided_slice %3 {offsets = [25, 0], sizes = [1, 128], strides = [1, 1]} : vector<27x128xf32> to vector<1x128xf32>
    %343 = vector.broadcast %342 : vector<1x128xf32> to vector<8x128xf32>
    %344 = arith.mulf %50, %343 : vector<8x128xf32>
    %345 = arith.mulf %344, %274 : vector<8x128xf32>
    %346 = arith.addf %341, %345 : vector<8x128xf32>
    %347 = vector.extract_strided_slice %2 {offsets = [26, 0], sizes = [1, 128], strides = [1, 1]} : vector<27x128xf32> to vector<1x128xf32>
    %348 = vector.broadcast %347 : vector<1x128xf32> to vector<8x128xf32>
    %349 = arith.mulf %41, %348 : vector<8x128xf32>
    %350 = arith.mulf %349, %274 : vector<8x128xf32>
    %351 = vector.extract_strided_slice %3 {offsets = [26, 0], sizes = [1, 128], strides = [1, 1]} : vector<27x128xf32> to vector<1x128xf32>
    %352 = vector.broadcast %351 : vector<1x128xf32> to vector<8x128xf32>
    %353 = arith.mulf %53, %352 : vector<8x128xf32>
    %354 = arith.mulf %353, %283 : vector<8x128xf32>
    %355 = arith.addf %350, %354 : vector<8x128xf32>
    %c0_23 = arith.constant 0 : index
    %c0_24 = arith.constant 0 : index
    %356 = vector.load %arg17[%c0_23, %c0_24] : memref<8x1152xf32, #tpu.memory_space<vmem>>, vector<8x128xf32>
    tpu.vector_store %arg17[%c0_23, %c0_24], %292 {strides = array<i32>} : memref<8x1152xf32, #tpu.memory_space<vmem>>, vector<8x128xf32>,
    %c0_25 = arith.constant 0 : index
    %c128 = arith.constant 128 : index
    %357 = vector.load %arg17[%c0_25, %c128] : memref<8x1152xf32, #tpu.memory_space<vmem>>, vector<8x128xf32>
    tpu.vector_store %arg17[%c0_25, %c128], %301 {strides = array<i32>} : memref<8x1152xf32, #tpu.memory_space<vmem>>, vector<8x128xf32>,
    %c0_26 = arith.constant 0 : index
    %c256 = arith.constant 256 : index
    %358 = vector.load %arg17[%c0_26, %c256] : memref<8x1152xf32, #tpu.memory_space<vmem>>, vector<8x128xf32>
    tpu.vector_store %arg17[%c0_26, %c256], %310 {strides = array<i32>} : memref<8x1152xf32, #tpu.memory_space<vmem>>, vector<8x128xf32>,
    %c0_27 = arith.constant 0 : index
    %c384 = arith.constant 384 : index
    %359 = vector.load %arg17[%c0_27, %c384] : memref<8x1152xf32, #tpu.memory_space<vmem>>, vector<8x128xf32>
    tpu.vector_store %arg17[%c0_27, %c384], %319 {strides = array<i32>} : memref<8x1152xf32, #tpu.memory_space<vmem>>, vector<8x128xf32>,
    %c0_28 = arith.constant 0 : index
    %c512 = arith.constant 512 : index
    %360 = vector.load %arg17[%c0_28, %c512] : memref<8x1152xf32, #tpu.memory_space<vmem>>, vector<8x128xf32>
    tpu.vector_store %arg17[%c0_28, %c512], %328 {strides = array<i32>} : memref<8x1152xf32, #tpu.memory_space<vmem>>, vector<8x128xf32>,
    %c0_29 = arith.constant 0 : index
    %c640 = arith.constant 640 : index
    %361 = vector.load %arg17[%c0_29, %c640] : memref<8x1152xf32, #tpu.memory_space<vmem>>, vector<8x128xf32>
    tpu.vector_store %arg17[%c0_29, %c640], %337 {strides = array<i32>} : memref<8x1152xf32, #tpu.memory_space<vmem>>, vector<8x128xf32>,
    %c0_30 = arith.constant 0 : index
    %c768 = arith.constant 768 : index
    %362 = vector.load %arg17[%c0_30, %c768] : memref<8x1152xf32, #tpu.memory_space<vmem>>, vector<8x128xf32>
    tpu.vector_store %arg17[%c0_30, %c768], %346 {strides = array<i32>} : memref<8x1152xf32, #tpu.memory_space<vmem>>, vector<8x128xf32>,
    %c0_31 = arith.constant 0 : index
    %c896 = arith.constant 896 : index
    %363 = vector.load %arg17[%c0_31, %c896] : memref<8x1152xf32, #tpu.memory_space<vmem>>, vector<8x128xf32>
    tpu.vector_store %arg17[%c0_31, %c896], %355 {strides = array<i32>} : memref<8x1152xf32, #tpu.memory_space<vmem>>, vector<8x128xf32>,
    %c0_32 = arith.constant 0 : index
    %c0_33 = arith.constant 0 : index
    %364 = vector.load %arg17[%c0_32, %c0_33] : memref<8x1152xf32, #tpu.memory_space<vmem>>, vector<8x1152xf32>
    %c0_34 = arith.constant 0 : index
    %c0_35 = arith.constant 0 : index
    %365 = vector.load %arg2[%c0_34, %c0_35] : memref<1152x128xf32, #tpu.memory_space<vmem>>, vector<1152x128xf32>
    %cst_36 = arith.constant dense<0.000000e+00> : vector<8x128xf32>
    %366 = tpu.matmul %364, %365, %cst_36 {dimension_numbers = #tpu.dot_dimension_numbers<[1], [0], [0], [1], [0, 0, 1, 1], [], []>} : vector<8x1152xf32>, vector<1152x128xf32>, vector<8x128xf32> -> vector<8x128xf32>
    %cst_37 = arith.constant dense<0.000000e+00> : vector<8xf32>
    %367 = vector.multi_reduction <add>, %366, %cst_37 [1] : vector<8x128xf32> to vector<8xf32>
    %368 = vector.shape_cast %367 : vector<8xf32> to vector<8x1xf32>
    %cst_38 = arith.constant 1.562500e-02 : f32
    %369 = vector.broadcast %cst_38 : f32 to vector<8x1xf32>
    %370 = arith.mulf %368, %369 : vector<8x1xf32>
    %371 = arith.mulf %366, %366 : vector<8x128xf32>
    %cst_39 = arith.constant dense<0.000000e+00> : vector<8xf32>
    %372 = vector.multi_reduction <add>, %371, %cst_39 [1] : vector<8x128xf32> to vector<8xf32>
    %373 = vector.shape_cast %372 : vector<8xf32> to vector<8x1xf32>
    %cst_40 = arith.constant 1.562500e-02 : f32
    %374 = vector.broadcast %cst_40 : f32 to vector<8x1xf32>
    %375 = arith.mulf %373, %374 : vector<8x1xf32>
    %376 = arith.mulf %370, %370 : vector<8x1xf32>
    %377 = arith.subf %375, %376 : vector<8x1xf32>
    %378 = vector.broadcast %370 : vector<8x1xf32> to vector<8x128xf32>
    %379 = arith.subf %366, %378 : vector<8x128xf32>
    %cst_41 = arith.constant 9.99999974E-6 : f32
    %380 = vector.broadcast %cst_41 : f32 to vector<8x1xf32>
    %381 = arith.addf %377, %380 : vector<8x1xf32>
    %382 = math.rsqrt %381 : vector<8x1xf32>
    %383 = vector.broadcast %382 : vector<8x1xf32> to vector<8x128xf32>
    %384 = arith.mulf %379, %383 : vector<8x128xf32>
    %c0_42 = arith.constant 0 : index
    %c0_43 = arith.constant 0 : index
    %385 = vector.load %arg6[%c0_42, %c0_43] : memref<1x128xf32, #tpu.memory_space<vmem>>, vector<1x128xf32>
    %386 = vector.broadcast %385 : vector<1x128xf32> to vector<8x128xf32>
    %387 = arith.mulf %384, %386 : vector<8x128xf32>
    %c0_44 = arith.constant 0 : index
    %c0_45 = arith.constant 0 : index
    %388 = vector.load %arg7[%c0_44, %c0_45] : memref<1x128xf32, #tpu.memory_space<vmem>>, vector<1x128xf32>
    %389 = vector.broadcast %388 : vector<1x128xf32> to vector<8x128xf32>
    %390 = arith.addf %387, %389 : vector<8x128xf32>
    %c0_46 = arith.constant 0 : index
    %391 = memref.load %arg8[%c0_46] : memref<1xf32, #tpu.memory_space<smem>>
    %cst_47 = arith.constant 0.000000e+00 : f32
    %392 = vector.broadcast %cst_47 : f32 to vector<8x128xf32>
    %393 = arith.cmpf oge, %390, %392 : vector<8x128xf32>
    %394 = vector.broadcast %391 : f32 to vector<8x128xf32>
    %395 = arith.mulf %394, %390 : vector<8x128xf32>
    %396 = arith.select %393, %390, %395 : vector<8x128xi1>, vector<8x128xf32>
    %c0_48 = arith.constant 0 : index
    %c0_49 = arith.constant 0 : index
    %397 = vector.load %arg10[%c0_48, %c0_49] : memref<12x128xf32, #tpu.memory_space<vmem>>, vector<12x128xf32>
    %c0_50 = arith.constant 0 : index
    %c0_51 = arith.constant 0 : index
    %398 = vector.load %arg11[%c0_50, %c0_51] : memref<27x128xf32, #tpu.memory_space<vmem>>, vector<27x128xf32>
    %c0_52 = arith.constant 0 : index
    %c0_53 = arith.constant 0 : index
    %399 = vector.load %arg12[%c0_52, %c0_53] : memref<27x128xf32, #tpu.memory_space<vmem>>, vector<27x128xf32>
    %cst_54 = arith.constant 5.000000e-01 : f32
    %400 = vector.broadcast %cst_54 : f32 to vector<8x128xf32>
    %401 = arith.mulf %400, %396 : vector<8x128xf32>
    %402 = arith.mulf %396, %396 : vector<8x128xf32>
    %403 = arith.mulf %402, %396 : vector<8x128xf32>
    %cst_55 = arith.constant 4.471500e-02 : f32
    %404 = vector.broadcast %cst_55 : f32 to vector<8x128xf32>
    %405 = arith.mulf %404, %403 : vector<8x128xf32>
    %406 = arith.addf %396, %405 : vector<8x128xf32>
    %cst_56 = arith.constant 0.797884583 : f32
    %407 = vector.broadcast %cst_56 : f32 to vector<8x128xf32>
    %408 = arith.mulf %407, %406 : vector<8x128xf32>
    %409 = math.tanh %408 : vector<8x128xf32>
    %cst_57 = arith.constant 1.000000e+00 : f32
    %410 = vector.broadcast %cst_57 : f32 to vector<8x128xf32>
    %411 = arith.addf %410, %409 : vector<8x128xf32>
    %412 = arith.mulf %401, %411 : vector<8x128xf32>
    %c0_58 = arith.constant 0 : index
    %c1024_59 = arith.constant 1024 : index
    %413 = vector.load %arg17[%c0_58, %c1024_59] : memref<8x1152xf32, #tpu.memory_space<vmem>>, vector<8x128xf32>
    tpu.vector_store %arg17[%c0_58, %c1024_59], %412 {strides = array<i32>} : memref<8x1152xf32, #tpu.memory_space<vmem>>, vector<8x128xf32>,
    %414 = vector.extract_strided_slice %397 {offsets = [0, 0], sizes = [1, 128], strides = [1, 1]} : vector<12x128xf32> to vector<1x128xf32>
    %415 = vector.broadcast %414 : vector<1x128xf32> to vector<8x128xf32>
    %416 = arith.subf %396, %415 : vector<8x128xf32>
    %417 = vector.extract_strided_slice %397 {offsets = [1, 0], sizes = [1, 128], strides = [1, 1]} : vector<12x128xf32> to vector<1x128xf32>
    %418 = vector.broadcast %417 : vector<1x128xf32> to vector<8x128xf32>
    %419 = arith.subf %396, %418 : vector<8x128xf32>
    %420 = vector.extract_strided_slice %397 {offsets = [2, 0], sizes = [1, 128], strides = [1, 1]} : vector<12x128xf32> to vector<1x128xf32>
    %421 = vector.broadcast %420 : vector<1x128xf32> to vector<8x128xf32>
    %422 = arith.subf %396, %421 : vector<8x128xf32>
    %423 = vector.extract_strided_slice %397 {offsets = [3, 0], sizes = [1, 128], strides = [1, 1]} : vector<12x128xf32> to vector<1x128xf32>
    %424 = vector.broadcast %423 : vector<1x128xf32> to vector<8x128xf32>
    %425 = arith.subf %396, %424 : vector<8x128xf32>
    %426 = vector.extract_strided_slice %397 {offsets = [4, 0], sizes = [1, 128], strides = [1, 1]} : vector<12x128xf32> to vector<1x128xf32>
    %427 = vector.broadcast %426 : vector<1x128xf32> to vector<8x128xf32>
    %428 = arith.subf %396, %427 : vector<8x128xf32>
    %429 = vector.extract_strided_slice %397 {offsets = [5, 0], sizes = [1, 128], strides = [1, 1]} : vector<12x128xf32> to vector<1x128xf32>
    %430 = vector.broadcast %429 : vector<1x128xf32> to vector<8x128xf32>
    %431 = arith.subf %396, %430 : vector<8x128xf32>
    %432 = vector.extract_strided_slice %397 {offsets = [6, 0], sizes = [1, 128], strides = [1, 1]} : vector<12x128xf32> to vector<1x128xf32>
    %433 = vector.broadcast %432 : vector<1x128xf32> to vector<8x128xf32>
    %434 = arith.subf %396, %433 : vector<8x128xf32>
    %435 = vector.extract_strided_slice %397 {offsets = [7, 0], sizes = [1, 128], strides = [1, 1]} : vector<12x128xf32> to vector<1x128xf32>
    %436 = vector.broadcast %435 : vector<1x128xf32> to vector<8x128xf32>
    %437 = arith.subf %396, %436 : vector<8x128xf32>
    %438 = vector.extract_strided_slice %397 {offsets = [8, 0], sizes = [1, 128], strides = [1, 1]} : vector<12x128xf32> to vector<1x128xf32>
    %439 = vector.broadcast %438 : vector<1x128xf32> to vector<8x128xf32>
    %440 = arith.subf %396, %439 : vector<8x128xf32>
    %441 = vector.extract_strided_slice %397 {offsets = [9, 0], sizes = [1, 128], strides = [1, 1]} : vector<12x128xf32> to vector<1x128xf32>
    %442 = vector.broadcast %441 : vector<1x128xf32> to vector<8x128xf32>
    %443 = arith.subf %396, %442 : vector<8x128xf32>
    %444 = vector.extract_strided_slice %397 {offsets = [10, 0], sizes = [1, 128], strides = [1, 1]} : vector<12x128xf32> to vector<1x128xf32>
    %445 = vector.broadcast %444 : vector<1x128xf32> to vector<8x128xf32>
    %446 = arith.subf %396, %445 : vector<8x128xf32>
    %447 = vector.extract_strided_slice %397 {offsets = [11, 0], sizes = [1, 128], strides = [1, 1]} : vector<12x128xf32> to vector<1x128xf32>
    %448 = vector.broadcast %447 : vector<1x128xf32> to vector<8x128xf32>
    %449 = arith.subf %396, %448 : vector<8x128xf32>
    %cst_60 = arith.constant 0.000000e+00 : f32
    %450 = vector.broadcast %cst_60 : f32 to vector<8x128xf32>
    %451 = arith.cmpf oge, %416, %450 : vector<8x128xf32>
    %452 = arith.extui %451 : vector<8x128xi1> to vector<8x128xi32>
    %453 = arith.sitofp %452 : vector<8x128xi32> to vector<8x128xf32>
    %cst_61 = arith.constant 0.000000e+00 : f32
    %454 = vector.broadcast %cst_61 : f32 to vector<8x128xf32>
    %455 = arith.cmpf oge, %419, %454 : vector<8x128xf32>
    %456 = arith.extui %455 : vector<8x128xi1> to vector<8x128xi32>
    %457 = arith.sitofp %456 : vector<8x128xi32> to vector<8x128xf32>
    %458 = arith.subf %453, %457 : vector<8x128xf32>
    %cst_62 = arith.constant 0.000000e+00 : f32
    %459 = vector.broadcast %cst_62 : f32 to vector<8x128xf32>
    %460 = arith.cmpf oge, %422, %459 : vector<8x128xf32>
    %461 = arith.extui %460 : vector<8x128xi1> to vector<8x128xi32>
    %462 = arith.sitofp %461 : vector<8x128xi32> to vector<8x128xf32>
    %463 = arith.subf %457, %462 : vector<8x128xf32>
    %cst_63 = arith.constant 0.000000e+00 : f32
    %464 = vector.broadcast %cst_63 : f32 to vector<8x128xf32>
    %465 = arith.cmpf oge, %425, %464 : vector<8x128xf32>
    %466 = arith.extui %465 : vector<8x128xi1> to vector<8x128xi32>
    %467 = arith.sitofp %466 : vector<8x128xi32> to vector<8x128xf32>
    %468 = arith.subf %462, %467 : vector<8x128xf32>
    %cst_64 = arith.constant 0.000000e+00 : f32
    %469 = vector.broadcast %cst_64 : f32 to vector<8x128xf32>
    %470 = arith.cmpf oge, %428, %469 : vector<8x128xf32>
    %471 = arith.extui %470 : vector<8x128xi1> to vector<8x128xi32>
    %472 = arith.sitofp %471 : vector<8x128xi32> to vector<8x128xf32>
    %473 = arith.subf %467, %472 : vector<8x128xf32>
    %cst_65 = arith.constant 0.000000e+00 : f32
    %474 = vector.broadcast %cst_65 : f32 to vector<8x128xf32>
    %475 = arith.cmpf oge, %431, %474 : vector<8x128xf32>
    %476 = arith.extui %475 : vector<8x128xi1> to vector<8x128xi32>
    %477 = arith.sitofp %476 : vector<8x128xi32> to vector<8x128xf32>
    %478 = arith.subf %472, %477 : vector<8x128xf32>
    %cst_66 = arith.constant 0.000000e+00 : f32
    %479 = vector.broadcast %cst_66 : f32 to vector<8x128xf32>
    %480 = arith.cmpf oge, %434, %479 : vector<8x128xf32>
    %481 = arith.extui %480 : vector<8x128xi1> to vector<8x128xi32>
    %482 = arith.sitofp %481 : vector<8x128xi32> to vector<8x128xf32>
    %483 = arith.subf %477, %482 : vector<8x128xf32>
    %cst_67 = arith.constant 0.000000e+00 : f32
    %484 = vector.broadcast %cst_67 : f32 to vector<8x128xf32>
    %485 = arith.cmpf oge, %437, %484 : vector<8x128xf32>
    %486 = arith.extui %485 : vector<8x128xi1> to vector<8x128xi32>
    %487 = arith.sitofp %486 : vector<8x128xi32> to vector<8x128xf32>
    %488 = arith.subf %482, %487 : vector<8x128xf32>
    %cst_68 = arith.constant 0.000000e+00 : f32
    %489 = vector.broadcast %cst_68 : f32 to vector<8x128xf32>
    %490 = arith.cmpf oge, %440, %489 : vector<8x128xf32>
    %491 = arith.extui %490 : vector<8x128xi1> to vector<8x128xi32>
    %492 = arith.sitofp %491 : vector<8x128xi32> to vector<8x128xf32>
    %493 = arith.subf %487, %492 : vector<8x128xf32>
    %cst_69 = arith.constant 0.000000e+00 : f32
    %494 = vector.broadcast %cst_69 : f32 to vector<8x128xf32>
    %495 = arith.cmpf oge, %443, %494 : vector<8x128xf32>
    %496 = arith.extui %495 : vector<8x128xi1> to vector<8x128xi32>
    %497 = arith.sitofp %496 : vector<8x128xi32> to vector<8x128xf32>
    %498 = arith.subf %492, %497 : vector<8x128xf32>
    %cst_70 = arith.constant 0.000000e+00 : f32
    %499 = vector.broadcast %cst_70 : f32 to vector<8x128xf32>
    %500 = arith.cmpf oge, %446, %499 : vector<8x128xf32>
    %501 = arith.extui %500 : vector<8x128xi1> to vector<8x128xi32>
    %502 = arith.sitofp %501 : vector<8x128xi32> to vector<8x128xf32>
    %503 = arith.subf %497, %502 : vector<8x128xf32>
    %cst_71 = arith.constant 0.000000e+00 : f32
    %504 = vector.broadcast %cst_71 : f32 to vector<8x128xf32>
    %505 = arith.cmpf oge, %449, %504 : vector<8x128xf32>
    %506 = arith.extui %505 : vector<8x128xi1> to vector<8x128xi32>
    %507 = arith.sitofp %506 : vector<8x128xi32> to vector<8x128xf32>
    %508 = arith.subf %502, %507 : vector<8x128xf32>
    %509 = vector.extract_strided_slice %398 {offsets = [0, 0], sizes = [1, 128], strides = [1, 1]} : vector<27x128xf32> to vector<1x128xf32>
    %510 = vector.broadcast %509 : vector<1x128xf32> to vector<8x128xf32>
    %511 = arith.mulf %416, %510 : vector<8x128xf32>
    %512 = arith.mulf %511, %458 : vector<8x128xf32>
    %513 = vector.extract_strided_slice %399 {offsets = [0, 0], sizes = [1, 128], strides = [1, 1]} : vector<27x128xf32> to vector<1x128xf32>
    %514 = vector.broadcast %513 : vector<1x128xf32> to vector<8x128xf32>
    %515 = arith.mulf %422, %514 : vector<8x128xf32>
    %516 = arith.mulf %515, %463 : vector<8x128xf32>
    %517 = arith.addf %512, %516 : vector<8x128xf32>
    %518 = vector.extract_strided_slice %398 {offsets = [1, 0], sizes = [1, 128], strides = [1, 1]} : vector<27x128xf32> to vector<1x128xf32>
    %519 = vector.broadcast %518 : vector<1x128xf32> to vector<8x128xf32>
    %520 = arith.mulf %419, %519 : vector<8x128xf32>
    %521 = arith.mulf %520, %463 : vector<8x128xf32>
    %522 = vector.extract_strided_slice %399 {offsets = [1, 0], sizes = [1, 128], strides = [1, 1]} : vector<27x128xf32> to vector<1x128xf32>
    %523 = vector.broadcast %522 : vector<1x128xf32> to vector<8x128xf32>
    %524 = arith.mulf %425, %523 : vector<8x128xf32>
    %525 = arith.mulf %524, %468 : vector<8x128xf32>
    %526 = arith.addf %521, %525 : vector<8x128xf32>
    %527 = vector.extract_strided_slice %398 {offsets = [2, 0], sizes = [1, 128], strides = [1, 1]} : vector<27x128xf32> to vector<1x128xf32>
    %528 = vector.broadcast %527 : vector<1x128xf32> to vector<8x128xf32>
    %529 = arith.mulf %422, %528 : vector<8x128xf32>
    %530 = arith.mulf %529, %468 : vector<8x128xf32>
    %531 = vector.extract_strided_slice %399 {offsets = [2, 0], sizes = [1, 128], strides = [1, 1]} : vector<27x128xf32> to vector<1x128xf32>
    %532 = vector.broadcast %531 : vector<1x128xf32> to vector<8x128xf32>
    %533 = arith.mulf %428, %532 : vector<8x128xf32>
    %534 = arith.mulf %533, %473 : vector<8x128xf32>
    %535 = arith.addf %530, %534 : vector<8x128xf32>
    %536 = vector.extract_strided_slice %398 {offsets = [3, 0], sizes = [1, 128], strides = [1, 1]} : vector<27x128xf32> to vector<1x128xf32>
    %537 = vector.broadcast %536 : vector<1x128xf32> to vector<8x128xf32>
    %538 = arith.mulf %425, %537 : vector<8x128xf32>
    %539 = arith.mulf %538, %473 : vector<8x128xf32>
    %540 = vector.extract_strided_slice %399 {offsets = [3, 0], sizes = [1, 128], strides = [1, 1]} : vector<27x128xf32> to vector<1x128xf32>
    %541 = vector.broadcast %540 : vector<1x128xf32> to vector<8x128xf32>
    %542 = arith.mulf %431, %541 : vector<8x128xf32>
    %543 = arith.mulf %542, %478 : vector<8x128xf32>
    %544 = arith.addf %539, %543 : vector<8x128xf32>
    %545 = vector.extract_strided_slice %398 {offsets = [4, 0], sizes = [1, 128], strides = [1, 1]} : vector<27x128xf32> to vector<1x128xf32>
    %546 = vector.broadcast %545 : vector<1x128xf32> to vector<8x128xf32>
    %547 = arith.mulf %428, %546 : vector<8x128xf32>
    %548 = arith.mulf %547, %478 : vector<8x128xf32>
    %549 = vector.extract_strided_slice %399 {offsets = [4, 0], sizes = [1, 128], strides = [1, 1]} : vector<27x128xf32> to vector<1x128xf32>
    %550 = vector.broadcast %549 : vector<1x128xf32> to vector<8x128xf32>
    %551 = arith.mulf %434, %550 : vector<8x128xf32>
    %552 = arith.mulf %551, %483 : vector<8x128xf32>
    %553 = arith.addf %548, %552 : vector<8x128xf32>
    %554 = vector.extract_strided_slice %398 {offsets = [5, 0], sizes = [1, 128], strides = [1, 1]} : vector<27x128xf32> to vector<1x128xf32>
    %555 = vector.broadcast %554 : vector<1x128xf32> to vector<8x128xf32>
    %556 = arith.mulf %431, %555 : vector<8x128xf32>
    %557 = arith.mulf %556, %483 : vector<8x128xf32>
    %558 = vector.extract_strided_slice %399 {offsets = [5, 0], sizes = [1, 128], strides = [1, 1]} : vector<27x128xf32> to vector<1x128xf32>
    %559 = vector.broadcast %558 : vector<1x128xf32> to vector<8x128xf32>
    %560 = arith.mulf %437, %559 : vector<8x128xf32>
    %561 = arith.mulf %560, %488 : vector<8x128xf32>
    %562 = arith.addf %557, %561 : vector<8x128xf32>
    %563 = vector.extract_strided_slice %398 {offsets = [6, 0], sizes = [1, 128], strides = [1, 1]} : vector<27x128xf32> to vector<1x128xf32>
    %564 = vector.broadcast %563 : vector<1x128xf32> to vector<8x128xf32>
    %565 = arith.mulf %434, %564 : vector<8x128xf32>
    %566 = arith.mulf %565, %488 : vector<8x128xf32>
    %567 = vector.extract_strided_slice %399 {offsets = [6, 0], sizes = [1, 128], strides = [1, 1]} : vector<27x128xf32> to vector<1x128xf32>
    %568 = vector.broadcast %567 : vector<1x128xf32> to vector<8x128xf32>
    %569 = arith.mulf %440, %568 : vector<8x128xf32>
    %570 = arith.mulf %569, %493 : vector<8x128xf32>
    %571 = arith.addf %566, %570 : vector<8x128xf32>
    %572 = vector.extract_strided_slice %398 {offsets = [7, 0], sizes = [1, 128], strides = [1, 1]} : vector<27x128xf32> to vector<1x128xf32>
    %573 = vector.broadcast %572 : vector<1x128xf32> to vector<8x128xf32>
    %574 = arith.mulf %437, %573 : vector<8x128xf32>
    %575 = arith.mulf %574, %493 : vector<8x128xf32>
    %576 = vector.extract_strided_slice %399 {offsets = [7, 0], sizes = [1, 128], strides = [1, 1]} : vector<27x128xf32> to vector<1x128xf32>
    %577 = vector.broadcast %576 : vector<1x128xf32> to vector<8x128xf32>
    %578 = arith.mulf %443, %577 : vector<8x128xf32>
    %579 = arith.mulf %578, %498 : vector<8x128xf32>
    %580 = arith.addf %575, %579 : vector<8x128xf32>
    %581 = vector.extract_strided_slice %398 {offsets = [8, 0], sizes = [1, 128], strides = [1, 1]} : vector<27x128xf32> to vector<1x128xf32>
    %582 = vector.broadcast %581 : vector<1x128xf32> to vector<8x128xf32>
    %583 = arith.mulf %440, %582 : vector<8x128xf32>
    %584 = arith.mulf %583, %498 : vector<8x128xf32>
    %585 = vector.extract_strided_slice %399 {offsets = [8, 0], sizes = [1, 128], strides = [1, 1]} : vector<27x128xf32> to vector<1x128xf32>
    %586 = vector.broadcast %585 : vector<1x128xf32> to vector<8x128xf32>
    %587 = arith.mulf %446, %586 : vector<8x128xf32>
    %588 = arith.mulf %587, %503 : vector<8x128xf32>
    %589 = arith.addf %584, %588 : vector<8x128xf32>
    %590 = vector.extract_strided_slice %398 {offsets = [9, 0], sizes = [1, 128], strides = [1, 1]} : vector<27x128xf32> to vector<1x128xf32>
    %591 = vector.broadcast %590 : vector<1x128xf32> to vector<8x128xf32>
    %592 = arith.mulf %443, %591 : vector<8x128xf32>
    %593 = arith.mulf %592, %503 : vector<8x128xf32>
    %594 = vector.extract_strided_slice %399 {offsets = [9, 0], sizes = [1, 128], strides = [1, 1]} : vector<27x128xf32> to vector<1x128xf32>
    %595 = vector.broadcast %594 : vector<1x128xf32> to vector<8x128xf32>
    %596 = arith.mulf %449, %595 : vector<8x128xf32>
    %597 = arith.mulf %596, %508 : vector<8x128xf32>
    %598 = arith.addf %593, %597 : vector<8x128xf32>
    %599 = vector.extract_strided_slice %398 {offsets = [10, 0], sizes = [1, 128], strides = [1, 1]} : vector<27x128xf32> to vector<1x128xf32>
    %600 = vector.broadcast %599 : vector<1x128xf32> to vector<8x128xf32>
    %601 = arith.mulf %416, %600 : vector<8x128xf32>
    %602 = arith.mulf %601, %517 : vector<8x128xf32>
    %603 = vector.extract_strided_slice %399 {offsets = [10, 0], sizes = [1, 128], strides = [1, 1]} : vector<27x128xf32> to vector<1x128xf32>
    %604 = vector.broadcast %603 : vector<1x128xf32> to vector<8x128xf32>
    %605 = arith.mulf %425, %604 : vector<8x128xf32>
    %606 = arith.mulf %605, %526 : vector<8x128xf32>
    %607 = arith.addf %602, %606 : vector<8x128xf32>
    %608 = vector.extract_strided_slice %398 {offsets = [11, 0], sizes = [1, 128], strides = [1, 1]} : vector<27x128xf32> to vector<1x128xf32>
    %609 = vector.broadcast %608 : vector<1x128xf32> to vector<8x128xf32>
    %610 = arith.mulf %419, %609 : vector<8x128xf32>
    %611 = arith.mulf %610, %526 : vector<8x128xf32>
    %612 = vector.extract_strided_slice %399 {offsets = [11, 0], sizes = [1, 128], strides = [1, 1]} : vector<27x128xf32> to vector<1x128xf32>
    %613 = vector.broadcast %612 : vector<1x128xf32> to vector<8x128xf32>
    %614 = arith.mulf %428, %613 : vector<8x128xf32>
    %615 = arith.mulf %614, %535 : vector<8x128xf32>
    %616 = arith.addf %611, %615 : vector<8x128xf32>
    %617 = vector.extract_strided_slice %398 {offsets = [12, 0], sizes = [1, 128], strides = [1, 1]} : vector<27x128xf32> to vector<1x128xf32>
    %618 = vector.broadcast %617 : vector<1x128xf32> to vector<8x128xf32>
    %619 = arith.mulf %422, %618 : vector<8x128xf32>
    %620 = arith.mulf %619, %535 : vector<8x128xf32>
    %621 = vector.extract_strided_slice %399 {offsets = [12, 0], sizes = [1, 128], strides = [1, 1]} : vector<27x128xf32> to vector<1x128xf32>
    %622 = vector.broadcast %621 : vector<1x128xf32> to vector<8x128xf32>
    %623 = arith.mulf %431, %622 : vector<8x128xf32>
    %624 = arith.mulf %623, %544 : vector<8x128xf32>
    %625 = arith.addf %620, %624 : vector<8x128xf32>
    %626 = vector.extract_strided_slice %398 {offsets = [13, 0], sizes = [1, 128], strides = [1, 1]} : vector<27x128xf32> to vector<1x128xf32>
    %627 = vector.broadcast %626 : vector<1x128xf32> to vector<8x128xf32>
    %628 = arith.mulf %425, %627 : vector<8x128xf32>
    %629 = arith.mulf %628, %544 : vector<8x128xf32>
    %630 = vector.extract_strided_slice %399 {offsets = [13, 0], sizes = [1, 128], strides = [1, 1]} : vector<27x128xf32> to vector<1x128xf32>
    %631 = vector.broadcast %630 : vector<1x128xf32> to vector<8x128xf32>
    %632 = arith.mulf %434, %631 : vector<8x128xf32>
    %633 = arith.mulf %632, %553 : vector<8x128xf32>
    %634 = arith.addf %629, %633 : vector<8x128xf32>
    %635 = vector.extract_strided_slice %398 {offsets = [14, 0], sizes = [1, 128], strides = [1, 1]} : vector<27x128xf32> to vector<1x128xf32>
    %636 = vector.broadcast %635 : vector<1x128xf32> to vector<8x128xf32>
    %637 = arith.mulf %428, %636 : vector<8x128xf32>
    %638 = arith.mulf %637, %553 : vector<8x128xf32>
    %639 = vector.extract_strided_slice %399 {offsets = [14, 0], sizes = [1, 128], strides = [1, 1]} : vector<27x128xf32> to vector<1x128xf32>
    %640 = vector.broadcast %639 : vector<1x128xf32> to vector<8x128xf32>
    %641 = arith.mulf %437, %640 : vector<8x128xf32>
    %642 = arith.mulf %641, %562 : vector<8x128xf32>
    %643 = arith.addf %638, %642 : vector<8x128xf32>
    %644 = vector.extract_strided_slice %398 {offsets = [15, 0], sizes = [1, 128], strides = [1, 1]} : vector<27x128xf32> to vector<1x128xf32>
    %645 = vector.broadcast %644 : vector<1x128xf32> to vector<8x128xf32>
    %646 = arith.mulf %431, %645 : vector<8x128xf32>
    %647 = arith.mulf %646, %562 : vector<8x128xf32>
    %648 = vector.extract_strided_slice %399 {offsets = [15, 0], sizes = [1, 128], strides = [1, 1]} : vector<27x128xf32> to vector<1x128xf32>
    %649 = vector.broadcast %648 : vector<1x128xf32> to vector<8x128xf32>
    %650 = arith.mulf %440, %649 : vector<8x128xf32>
    %651 = arith.mulf %650, %571 : vector<8x128xf32>
    %652 = arith.addf %647, %651 : vector<8x128xf32>
    %653 = vector.extract_strided_slice %398 {offsets = [16, 0], sizes = [1, 128], strides = [1, 1]} : vector<27x128xf32> to vector<1x128xf32>
    %654 = vector.broadcast %653 : vector<1x128xf32> to vector<8x128xf32>
    %655 = arith.mulf %434, %654 : vector<8x128xf32>
    %656 = arith.mulf %655, %571 : vector<8x128xf32>
    %657 = vector.extract_strided_slice %399 {offsets = [16, 0], sizes = [1, 128], strides = [1, 1]} : vector<27x128xf32> to vector<1x128xf32>
    %658 = vector.broadcast %657 : vector<1x128xf32> to vector<8x128xf32>
    %659 = arith.mulf %443, %658 : vector<8x128xf32>
    %660 = arith.mulf %659, %580 : vector<8x128xf32>
    %661 = arith.addf %656, %660 : vector<8x128xf32>
    %662 = vector.extract_strided_slice %398 {offsets = [17, 0], sizes = [1, 128], strides = [1, 1]} : vector<27x128xf32> to vector<1x128xf32>
    %663 = vector.broadcast %662 : vector<1x128xf32> to vector<8x128xf32>
    %664 = arith.mulf %437, %663 : vector<8x128xf32>
    %665 = arith.mulf %664, %580 : vector<8x128xf32>
    %666 = vector.extract_strided_slice %399 {offsets = [17, 0], sizes = [1, 128], strides = [1, 1]} : vector<27x128xf32> to vector<1x128xf32>
    %667 = vector.broadcast %666 : vector<1x128xf32> to vector<8x128xf32>
    %668 = arith.mulf %446, %667 : vector<8x128xf32>
    %669 = arith.mulf %668, %589 : vector<8x128xf32>
    %670 = arith.addf %665, %669 : vector<8x128xf32>
    %671 = vector.extract_strided_slice %398 {offsets = [18, 0], sizes = [1, 128], strides = [1, 1]} : vector<27x128xf32> to vector<1x128xf32>
    %672 = vector.broadcast %671 : vector<1x128xf32> to vector<8x128xf32>
    %673 = arith.mulf %440, %672 : vector<8x128xf32>
    %674 = arith.mulf %673, %589 : vector<8x128xf32>
    %675 = vector.extract_strided_slice %399 {offsets = [18, 0], sizes = [1, 128], strides = [1, 1]} : vector<27x128xf32> to vector<1x128xf32>
    %676 = vector.broadcast %675 : vector<1x128xf32> to vector<8x128xf32>
    %677 = arith.mulf %449, %676 : vector<8x128xf32>
    %678 = arith.mulf %677, %598 : vector<8x128xf32>
    %679 = arith.addf %674, %678 : vector<8x128xf32>
    %680 = vector.extract_strided_slice %398 {offsets = [19, 0], sizes = [1, 128], strides = [1, 1]} : vector<27x128xf32> to vector<1x128xf32>
    %681 = vector.broadcast %680 : vector<1x128xf32> to vector<8x128xf32>
    %682 = arith.mulf %416, %681 : vector<8x128xf32>
    %683 = arith.mulf %682, %607 : vector<8x128xf32>
    %684 = vector.extract_strided_slice %399 {offsets = [19, 0], sizes = [1, 128], strides = [1, 1]} : vector<27x128xf32> to vector<1x128xf32>
    %685 = vector.broadcast %684 : vector<1x128xf32> to vector<8x128xf32>
    %686 = arith.mulf %428, %685 : vector<8x128xf32>
    %687 = arith.mulf %686, %616 : vector<8x128xf32>
    %688 = arith.addf %683, %687 : vector<8x128xf32>
    %689 = vector.extract_strided_slice %398 {offsets = [20, 0], sizes = [1, 128], strides = [1, 1]} : vector<27x128xf32> to vector<1x128xf32>
    %690 = vector.broadcast %689 : vector<1x128xf32> to vector<8x128xf32>
    %691 = arith.mulf %419, %690 : vector<8x128xf32>
    %692 = arith.mulf %691, %616 : vector<8x128xf32>
    %693 = vector.extract_strided_slice %399 {offsets = [20, 0], sizes = [1, 128], strides = [1, 1]} : vector<27x128xf32> to vector<1x128xf32>
    %694 = vector.broadcast %693 : vector<1x128xf32> to vector<8x128xf32>
    %695 = arith.mulf %431, %694 : vector<8x128xf32>
    %696 = arith.mulf %695, %625 : vector<8x128xf32>
    %697 = arith.addf %692, %696 : vector<8x128xf32>
    %698 = vector.extract_strided_slice %398 {offsets = [21, 0], sizes = [1, 128], strides = [1, 1]} : vector<27x128xf32> to vector<1x128xf32>
    %699 = vector.broadcast %698 : vector<1x128xf32> to vector<8x128xf32>
    %700 = arith.mulf %422, %699 : vector<8x128xf32>
    %701 = arith.mulf %700, %625 : vector<8x128xf32>
    %702 = vector.extract_strided_slice %399 {offsets = [21, 0], sizes = [1, 128], strides = [1, 1]} : vector<27x128xf32> to vector<1x128xf32>
    %703 = vector.broadcast %702 : vector<1x128xf32> to vector<8x128xf32>
    %704 = arith.mulf %434, %703 : vector<8x128xf32>
    %705 = arith.mulf %704, %634 : vector<8x128xf32>
    %706 = arith.addf %701, %705 : vector<8x128xf32>
    %707 = vector.extract_strided_slice %398 {offsets = [22, 0], sizes = [1, 128], strides = [1, 1]} : vector<27x128xf32> to vector<1x128xf32>
    %708 = vector.broadcast %707 : vector<1x128xf32> to vector<8x128xf32>
    %709 = arith.mulf %425, %708 : vector<8x128xf32>
    %710 = arith.mulf %709, %634 : vector<8x128xf32>
    %711 = vector.extract_strided_slice %399 {offsets = [22, 0], sizes = [1, 128], strides = [1, 1]} : vector<27x128xf32> to vector<1x128xf32>
    %712 = vector.broadcast %711 : vector<1x128xf32> to vector<8x128xf32>
    %713 = arith.mulf %437, %712 : vector<8x128xf32>
    %714 = arith.mulf %713, %643 : vector<8x128xf32>
    %715 = arith.addf %710, %714 : vector<8x128xf32>
    %716 = vector.extract_strided_slice %398 {offsets = [23, 0], sizes = [1, 128], strides = [1, 1]} : vector<27x128xf32> to vector<1x128xf32>
    %717 = vector.broadcast %716 : vector<1x128xf32> to vector<8x128xf32>
    %718 = arith.mulf %428, %717 : vector<8x128xf32>
    %719 = arith.mulf %718, %643 : vector<8x128xf32>
    %720 = vector.extract_strided_slice %399 {offsets = [23, 0], sizes = [1, 128], strides = [1, 1]} : vector<27x128xf32> to vector<1x128xf32>
    %721 = vector.broadcast %720 : vector<1x128xf32> to vector<8x128xf32>
    %722 = arith.mulf %440, %721 : vector<8x128xf32>
    %723 = arith.mulf %722, %652 : vector<8x128xf32>
    %724 = arith.addf %719, %723 : vector<8x128xf32>
    %725 = vector.extract_strided_slice %398 {offsets = [24, 0], sizes = [1, 128], strides = [1, 1]} : vector<27x128xf32> to vector<1x128xf32>
    %726 = vector.broadcast %725 : vector<1x128xf32> to vector<8x128xf32>
    %727 = arith.mulf %431, %726 : vector<8x128xf32>
    %728 = arith.mulf %727, %652 : vector<8x128xf32>
    %729 = vector.extract_strided_slice %399 {offsets = [24, 0], sizes = [1, 128], strides = [1, 1]} : vector<27x128xf32> to vector<1x128xf32>
    %730 = vector.broadcast %729 : vector<1x128xf32> to vector<8x128xf32>
    %731 = arith.mulf %443, %730 : vector<8x128xf32>
    %732 = arith.mulf %731, %661 : vector<8x128xf32>
    %733 = arith.addf %728, %732 : vector<8x128xf32>
    %734 = vector.extract_strided_slice %398 {offsets = [25, 0], sizes = [1, 128], strides = [1, 1]} : vector<27x128xf32> to vector<1x128xf32>
    %735 = vector.broadcast %734 : vector<1x128xf32> to vector<8x128xf32>
    %736 = arith.mulf %434, %735 : vector<8x128xf32>
    %737 = arith.mulf %736, %661 : vector<8x128xf32>
    %738 = vector.extract_strided_slice %399 {offsets = [25, 0], sizes = [1, 128], strides = [1, 1]} : vector<27x128xf32> to vector<1x128xf32>
    %739 = vector.broadcast %738 : vector<1x128xf32> to vector<8x128xf32>
    %740 = arith.mulf %446, %739 : vector<8x128xf32>
    %741 = arith.mulf %740, %670 : vector<8x128xf32>
    %742 = arith.addf %737, %741 : vector<8x128xf32>
    %743 = vector.extract_strided_slice %398 {offsets = [26, 0], sizes = [1, 128], strides = [1, 1]} : vector<27x128xf32> to vector<1x128xf32>
    %744 = vector.broadcast %743 : vector<1x128xf32> to vector<8x128xf32>
    %745 = arith.mulf %437, %744 : vector<8x128xf32>
    %746 = arith.mulf %745, %670 : vector<8x128xf32>
    %747 = vector.extract_strided_slice %399 {offsets = [26, 0], sizes = [1, 128], strides = [1, 1]} : vector<27x128xf32> to vector<1x128xf32>
    %748 = vector.broadcast %747 : vector<1x128xf32> to vector<8x128xf32>
    %749 = arith.mulf %449, %748 : vector<8x128xf32>
    %750 = arith.mulf %749, %679 : vector<8x128xf32>
    %751 = arith.addf %746, %750 : vector<8x128xf32>
    %c0_72 = arith.constant 0 : index
    %c0_73 = arith.constant 0 : index
    %752 = vector.load %arg17[%c0_72, %c0_73] : memref<8x1152xf32, #tpu.memory_space<vmem>>, vector<8x128xf32>
    tpu.vector_store %arg17[%c0_72, %c0_73], %688 {strides = array<i32>} : memref<8x1152xf32, #tpu.memory_space<vmem>>, vector<8x128xf32>,
    %c0_74 = arith.constant 0 : index
    %c128_75 = arith.constant 128 : index
    %753 = vector.load %arg17[%c0_74, %c128_75] : memref<8x1152xf32, #tpu.memory_space<vmem>>, vector<8x128xf32>
    tpu.vector_store %arg17[%c0_74, %c128_75], %697 {strides = array<i32>} : memref<8x1152xf32, #tpu.memory_space<vmem>>, vector<8x128xf32>,
    %c0_76 = arith.constant 0 : index
    %c256_77 = arith.constant 256 : index
    %754 = vector.load %arg17[%c0_76, %c256_77] : memref<8x1152xf32, #tpu.memory_space<vmem>>, vector<8x128xf32>
    tpu.vector_store %arg17[%c0_76, %c256_77], %706 {strides = array<i32>} : memref<8x1152xf32, #tpu.memory_space<vmem>>, vector<8x128xf32>,
    %c0_78 = arith.constant 0 : index
    %c384_79 = arith.constant 384 : index
    %755 = vector.load %arg17[%c0_78, %c384_79] : memref<8x1152xf32, #tpu.memory_space<vmem>>, vector<8x128xf32>
    tpu.vector_store %arg17[%c0_78, %c384_79], %715 {strides = array<i32>} : memref<8x1152xf32, #tpu.memory_space<vmem>>, vector<8x128xf32>,
    %c0_80 = arith.constant 0 : index
    %c512_81 = arith.constant 512 : index
    %756 = vector.load %arg17[%c0_80, %c512_81] : memref<8x1152xf32, #tpu.memory_space<vmem>>, vector<8x128xf32>
    tpu.vector_store %arg17[%c0_80, %c512_81], %724 {strides = array<i32>} : memref<8x1152xf32, #tpu.memory_space<vmem>>, vector<8x128xf32>,
    %c0_82 = arith.constant 0 : index
    %c640_83 = arith.constant 640 : index
    %757 = vector.load %arg17[%c0_82, %c640_83] : memref<8x1152xf32, #tpu.memory_space<vmem>>, vector<8x128xf32>
    tpu.vector_store %arg17[%c0_82, %c640_83], %733 {strides = array<i32>} : memref<8x1152xf32, #tpu.memory_space<vmem>>, vector<8x128xf32>,
    %c0_84 = arith.constant 0 : index
    %c768_85 = arith.constant 768 : index
    %758 = vector.load %arg17[%c0_84, %c768_85] : memref<8x1152xf32, #tpu.memory_space<vmem>>, vector<8x128xf32>
    tpu.vector_store %arg17[%c0_84, %c768_85], %742 {strides = array<i32>} : memref<8x1152xf32, #tpu.memory_space<vmem>>, vector<8x128xf32>,
    %c0_86 = arith.constant 0 : index
    %c896_87 = arith.constant 896 : index
    %759 = vector.load %arg17[%c0_86, %c896_87] : memref<8x1152xf32, #tpu.memory_space<vmem>>, vector<8x128xf32>
    tpu.vector_store %arg17[%c0_86, %c896_87], %751 {strides = array<i32>} : memref<8x1152xf32, #tpu.memory_space<vmem>>, vector<8x128xf32>,
    %c0_88 = arith.constant 0 : index
    %c0_89 = arith.constant 0 : index
    %760 = vector.load %arg17[%c0_88, %c0_89] : memref<8x1152xf32, #tpu.memory_space<vmem>>, vector<8x1152xf32>
    %c0_90 = arith.constant 0 : index
    %c0_91 = arith.constant 0 : index
    %761 = vector.load %arg9[%c0_90, %c0_91] : memref<1152x128xf32, #tpu.memory_space<vmem>>, vector<1152x128xf32>
    %cst_92 = arith.constant dense<0.000000e+00> : vector<8x128xf32>
    %762 = tpu.matmul %760, %761, %cst_92 {dimension_numbers = #tpu.dot_dimension_numbers<[1], [0], [0], [1], [0, 0, 1, 1], [], []>} : vector<8x1152xf32>, vector<1152x128xf32>, vector<8x128xf32> -> vector<8x128xf32>
    %cst_93 = arith.constant dense<0.000000e+00> : vector<8xf32>
    %763 = vector.multi_reduction <add>, %762, %cst_93 [1] : vector<8x128xf32> to vector<8xf32>
    %764 = vector.shape_cast %763 : vector<8xf32> to vector<8x1xf32>
    %cst_94 = arith.constant 6.250000e-02 : f32
    %765 = vector.broadcast %cst_94 : f32 to vector<8x1xf32>
    %766 = arith.mulf %764, %765 : vector<8x1xf32>
    %767 = arith.mulf %762, %762 : vector<8x128xf32>
    %cst_95 = arith.constant dense<0.000000e+00> : vector<8xf32>
    %768 = vector.multi_reduction <add>, %767, %cst_95 [1] : vector<8x128xf32> to vector<8xf32>
    %769 = vector.shape_cast %768 : vector<8xf32> to vector<8x1xf32>
    %cst_96 = arith.constant 6.250000e-02 : f32
    %770 = vector.broadcast %cst_96 : f32 to vector<8x1xf32>
    %771 = arith.mulf %769, %770 : vector<8x1xf32>
    %772 = arith.mulf %766, %766 : vector<8x1xf32>
    %773 = arith.subf %771, %772 : vector<8x1xf32>
    %774 = vector.broadcast %766 : vector<8x1xf32> to vector<8x128xf32>
    %775 = arith.subf %762, %774 : vector<8x128xf32>
    %cst_97 = arith.constant 9.99999974E-6 : f32
    %776 = vector.broadcast %cst_97 : f32 to vector<8x1xf32>
    %777 = arith.addf %773, %776 : vector<8x1xf32>
    %778 = math.rsqrt %777 : vector<8x1xf32>
    %779 = vector.broadcast %778 : vector<8x1xf32> to vector<8x128xf32>
    %780 = arith.mulf %775, %779 : vector<8x128xf32>
    %c0_98 = arith.constant 0 : index
    %c0_99 = arith.constant 0 : index
    %781 = vector.load %arg13[%c0_98, %c0_99] : memref<1x128xf32, #tpu.memory_space<vmem>>, vector<1x128xf32>
    %782 = vector.broadcast %781 : vector<1x128xf32> to vector<8x128xf32>
    %783 = arith.mulf %780, %782 : vector<8x128xf32>
    %c0_100 = arith.constant 0 : index
    %c0_101 = arith.constant 0 : index
    %784 = vector.load %arg14[%c0_100, %c0_101] : memref<1x128xf32, #tpu.memory_space<vmem>>, vector<1x128xf32>
    %785 = vector.broadcast %784 : vector<1x128xf32> to vector<8x128xf32>
    %786 = arith.addf %783, %785 : vector<8x128xf32>
    %c0_102 = arith.constant 0 : index
    %787 = memref.load %arg15[%c0_102] : memref<1xf32, #tpu.memory_space<smem>>
    %cst_103 = arith.constant 0.000000e+00 : f32
    %788 = vector.broadcast %cst_103 : f32 to vector<8x128xf32>
    %789 = arith.cmpf oge, %786, %788 : vector<8x128xf32>
    %790 = vector.broadcast %787 : f32 to vector<8x128xf32>
    %791 = arith.mulf %790, %786 : vector<8x128xf32>
    %792 = arith.select %789, %786, %791 : vector<8x128xi1>, vector<8x128xf32>
    %c0_104 = arith.constant 0 : index
    %c0_105 = arith.constant 0 : index
    %793 = vector.load %arg16[%c0_104, %c0_105] : memref<8x128xf32, #tpu.memory_space<vmem>>, vector<8x128xf32>
    tpu.vector_store %arg16[%c0_104, %c0_105], %792 {strides = array<i32>} : memref<8x128xf32, #tpu.memory_space<vmem>>, vector<8x128xf32>,
    return
  }
  func.func @transform_0(%arg0: i32) -> (i32, i32) {
    %c0_i32 = arith.constant 0 : i32
    %c0_i32_0 = arith.constant 0 : i32
    return %arg0, %c0_i32 : i32, i32
  }
  func.func @transform_1(%arg0: i32) -> (i32, i32) {
    %c0_i32 = arith.constant 0 : i32
    %c0_i32_0 = arith.constant 0 : i32
    %c0_i32_1 = arith.constant 0 : i32
    return %c0_i32, %c0_i32_0 : i32, i32
  }
  func.func @transform_2(%arg0: i32) -> (i32, i32) {
    %c0_i32 = arith.constant 0 : i32
    %c0_i32_0 = arith.constant 0 : i32
    %c0_i32_1 = arith.constant 0 : i32
    return %c0_i32, %c0_i32_0 : i32, i32
  }
  func.func @transform_3(%arg0: i32) -> (i32, i32) {
    %c0_i32 = arith.constant 0 : i32
    %c0_i32_0 = arith.constant 0 : i32
    %c0_i32_1 = arith.constant 0 : i32
    return %c0_i32, %c0_i32_0 : i32, i32
  }
  func.func @transform_4(%arg0: i32) -> (i32, i32) {
    %c0_i32 = arith.constant 0 : i32
    %c0_i32_0 = arith.constant 0 : i32
    %c0_i32_1 = arith.constant 0 : i32
    return %c0_i32, %c0_i32_0 : i32, i32
  }
  func.func @transform_5(%arg0: i32) -> (i32, i32) {
    %c0_i32 = arith.constant 0 : i32
    %c0_i32_0 = arith.constant 0 : i32
    %c0_i32_1 = arith.constant 0 : i32
    return %c0_i32, %c0_i32_0 : i32, i32
  }
  func.func @transform_6(%arg0: i32) -> (i32, i32) {
    %c0_i32 = arith.constant 0 : i32
    %c0_i32_0 = arith.constant 0 : i32
    %c0_i32_1 = arith.constant 0 : i32
    return %c0_i32, %c0_i32_0 : i32, i32
  }
  func.func @transform_7(%arg0: i32) -> i32 {
    %c0_i32 = arith.constant 0 : i32
    %c0_i32_0 = arith.constant 0 : i32
    return %c0_i32 : i32
  }
  func.func @transform_8(%arg0: i32) -> (i32, i32) {
    %c0_i32 = arith.constant 0 : i32
    %c0_i32_0 = arith.constant 0 : i32
    %c0_i32_1 = arith.constant 0 : i32
    return %c0_i32, %c0_i32_0 : i32, i32
  }
  func.func @transform_9(%arg0: i32) -> (i32, i32) {
    %c0_i32 = arith.constant 0 : i32
    %c0_i32_0 = arith.constant 0 : i32
    %c0_i32_1 = arith.constant 0 : i32
    return %c0_i32, %c0_i32_0 : i32, i32
  }
  func.func @transform_10(%arg0: i32) -> (i32, i32) {
    %c0_i32 = arith.constant 0 : i32
    %c0_i32_0 = arith.constant 0 : i32
    %c0_i32_1 = arith.constant 0 : i32
    return %c0_i32, %c0_i32_0 : i32, i32
  }
  func.func @transform_11(%arg0: i32) -> (i32, i32) {
    %c0_i32 = arith.constant 0 : i32
    %c0_i32_0 = arith.constant 0 : i32
    %c0_i32_1 = arith.constant 0 : i32
    return %c0_i32, %c0_i32_0 : i32, i32
  }
  func.func @transform_12(%arg0: i32) -> (i32, i32) {
    %c0_i32 = arith.constant 0 : i32
    %c0_i32_0 = arith.constant 0 : i32
    %c0_i32_1 = arith.constant 0 : i32
    return %c0_i32, %c0_i32_0 : i32, i32
  }
  func.func @transform_13(%arg0: i32) -> (i32, i32) {
    %c0_i32 = arith.constant 0 : i32
    %c0_i32_0 = arith.constant 0 : i32
    %c0_i32_1 = arith.constant 0 : i32
    return %c0_i32, %c0_i32_0 : i32, i32
  }
  func.func @transform_14(%arg0: i32) -> i32 {
    %c0_i32 = arith.constant 0 : i32
    %c0_i32_0 = arith.constant 0 : i32
    return %c0_i32 : i32
  }
  func.func @transform_15(%arg0: i32) -> (i32, i32) {
    %c0_i32 = arith.constant 0 : i32
    %c0_i32_0 = arith.constant 0 : i32
    return %arg0, %c0_i32 : i32, i32
  }
}

</mosaic_0001>

<bundles_post_ra>
// kernel: tpu_custom_call.1
= control target key start
LH: loop header
LB: loop body
LE: loop exit
PB: predicated region body
PF: predicated region fallthrough
CT: control target
= control target key end

     0   :  { %22 = vsyncpa [#allocation6], 0  ;;  %s3916_s0 = inlined_call_operand.hbm [shape: f32[8,128], index: 0, kind: input, shape index: {}]   ;;  %s3917_s1 = inlined_call_operand.hbm [shape: f32[1152,128], index: 1, kind: input, shape index: {}]   ;;  %s3918_s2 = inlined_call_operand.hbm [shape: f32[12,128], index: 2, kind: input, shape index: {}]   ;;  %s3919_s3 = inlined_call_operand.hbm [shape: f32[27,128], index: 3, kind: input, shape index: {}]   ;;  %s3920_s4 = inlined_call_operand.hbm [shape: f32[27,128], index: 4, kind: input, shape index: {}]   ;;  %s3921_s5 = inlined_call_operand.vmem [shape: f32[1,128], index: 5, kind: input, shape index: {}]   ;;  %s3922_s6 = inlined_call_operand.vmem [shape: f32[1,128], index: 6, kind: input, shape index: {}]   ;;  %s3923_s7 = inlined_call_operand.<no memory space> [shape: f32[1], index: 7, kind: input, shape index: {}]   ;;  %s3924_s8 = inlined_call_operand.hbm [shape: f32[1152,128], index: 8, kind: input, shape index: {}]   ;;  %s3925_s9 = inlined_call_operand.vmem [shape: f32[12,128], index: 9, kind: input, shape index: {}]   ;;  %s3926_s10 = inlined_call_operand.hbm [shape: f32[27,128], index: 10, kind: input, shape index: {}]   ;;  %s3927_s11 = inlined_call_operand.hbm [shape: f32[27,128], index: 11, kind: input, shape index: {}]   ;;  %s3928_s12 = inlined_call_operand.vmem [shape: f32[1,128], index: 12, kind: input, shape index: {}]   ;;  %s3929_s13 = inlined_call_operand.vmem [shape: f32[1,128], index: 13, kind: input, shape index: {}]   ;;  %s3930_s14 = inlined_call_operand.<no memory space> [shape: f32[1], index: 14, kind: input, shape index: {}]   ;;  %s3931_s15 = inlined_call_operand.hbm [shape: f32[8,128], index: 15, kind: output, shape index: {}]  }
   0x1   :  { %23 = vsyncpa [#allocation9], 0 }
   0x2   :  { %24 = vsyncpa [#allocation12], 0 }
   0x3   :  { %25 = vsyncpa [#allocation15], 0 }
   0x4   :  { %26 = vsyncpa [#allocation18], 0 }
   0x5   :  { %27 = vsyncpa [#allocation7], 0  ;;  %s2852_s18 = smov [#allocation8]  }
   0x6   :  { %s43_s19 = sshll.u32 %s2852_s18, 4  ;;  %s44_s19 = int_to_ptr.vmem [resolvable:$true] %s43_s19 }
   0x7   :  { %s2668_s20 = scalar_lea.vmem %s44_s19, 18432  ;;  %p2673_p1 = scmp.lt.s32.totalorder %s44_s19, %s44_s19 }
   0x8   :  { %p2669_p0 = scmp.ne.s32.totalorder %s44_s19, %s2668_s20  ;;  %p2674_p2 = scmp.lt.s32.totalorder %s2668_s20, %s2668_s20 }
   0xa   :  { %p2675_p3 = por %p2674_p2, %p2673_p1 }
   0xc   :  { %p2676_p4 = pnand %p2675_p3, %p2669_p0 }
   0xe   :  { %2679 = shalt.err (!%p2676_p4)
}
   0xf   :  { %s2853_s21 = smov 128   ;;  %s2854_s22 = smov 8  }
  0x10   :  { %49 = dma.hbm_to_vmem [thread:$0]  %s3917_s1, 18432, %s44_s19, [#allocation9], %s2853_s21, %s2853_s21, %s2854_s22  }
  0x11   :  { %s2855_s25 = smov [#allocation11]   ;;  %s2856_s27 = smov [#allocation14]  }
  0x12   :  { %s67_s26 = sshll.u32 %s2855_s25, 4  ;;  %s97_s28 = sshll.u32 %s2856_s27, 4  ;;  %s68_s26 = int_to_ptr.vmem [resolvable:$true] %s67_s26  ;;  %s98_s28 = int_to_ptr.vmem [resolvable:$true] %s97_s28 }
  0x13   :  { %s2688_s29 = scalar_lea.vmem %s68_s26, 512  ;;  %p2693_p6 = scmp.lt.s32.totalorder %s68_s26, %s68_s26 }
  0x14   :  { %p2689_p5 = scmp.ne.s32.totalorder %s68_s26, %s2688_s29  ;;  %p2694_p7 = scmp.lt.s32.totalorder %s2688_s29, %s2688_s29 }
  0x16   :  { %p2695_p8 = por %p2694_p7, %p2693_p6 }
  0x18   :  { %p2696_p9 = pnand %p2695_p8, %p2689_p5 }
  0x1a   :  { %2699 = shalt.err (!%p2696_p9)
}
  0x1b   :  { %73 = dma.hbm_to_vmem [thread:$0]  %s3919_s3, 512, %s68_s26, [#allocation12], %s2853_s21, %s2853_s21, %s2854_s22  }
  0x1c   :  { %s2708_s1 = scalar_lea.vmem %s98_s28, 18432  ;;  %p2713_p11 = scmp.lt.s32.totalorder %s98_s28, %s98_s28 }
  0x1d   :  { %p2709_p10 = scmp.ne.s32.totalorder %s98_s28, %s2708_s1  ;;  %p2714_p12 = scmp.lt.s32.totalorder %s2708_s1, %s2708_s1 }
  0x1f   :  { %p2715_p13 = por %p2714_p12, %p2713_p11 }
  0x21   :  { %p2716_p0 = pnand %p2715_p13, %p2709_p10 }
  0x23   :  { %2719 = shalt.err (!%p2716_p0)
}
  0x24   :  { %103 = dma.hbm_to_vmem [thread:$0]  %s3924_s8, 18432, %s98_s28, [#allocation15], %s2853_s21, %s2853_s21, %s2854_s22  }
  0x25   :  { %s2857_s19 = smov [#allocation5]   ;;  %s2858_s23 = smov [#allocation10]  }
  0x26   :  { %s34_s20 = sshll.u32 %s2857_s19, 4  ;;  %s55_s3 = sshll.u32 %s2858_s23, 4  ;;  %s35_s20 = int_to_ptr.vmem [resolvable:$true] %s34_s20  ;;  %s56_s3 = int_to_ptr.vmem [resolvable:$true] %s55_s3 }
  0x27   :  { %s2728_s24 = scalar_lea.vmem %s35_s20, 128  ;;  %p2733_p2 = scmp.lt.s32.totalorder %s35_s20, %s35_s20 }
  0x28   :  { %p2729_p1 = scmp.ne.s32.totalorder %s35_s20, %s2728_s24  ;;  %p2734_p3 = scmp.lt.s32.totalorder %s2728_s24, %s2728_s24 }
  0x2a   :  { %p2735_p4 = por %p2734_p3, %p2733_p2 }
  0x2c   :  { %p2736_p5 = pnand %p2735_p4, %p2729_p1 }
  0x2e   :  { %2739 = shalt.err (!%p2736_p5)
}
  0x2f   :  { %37 = dma.hbm_to_vmem [thread:$0]  %s3916_s0, 128, %s35_s20, [#allocation6]  }
  0x30   :  { %s2748_s27 = scalar_lea.vmem %s56_s3, 256  ;;  %p2753_p7 = scmp.lt.s32.totalorder %s56_s3, %s56_s3 }
  0x31   :  { %p2749_p6 = scmp.ne.s32.totalorder %s56_s3, %s2748_s27  ;;  %p2754_p8 = scmp.lt.s32.totalorder %s2748_s27, %s2748_s27 }
  0x33   :  { %p2755_p9 = por %p2754_p8, %p2753_p7 }
  0x35   :  { %p2756_p10 = pnand %p2755_p9, %p2749_p6 }
  0x37   :  { %2759 = shalt.err (!%p2756_p10)
}
  0x38   :  { %61 = dma.hbm_to_vmem [thread:$0]  %s3918_s2, 256, %s56_s3, [#allocation9], %s2853_s21, %s2853_s21, %s2854_s22  }
  0x39   :  { %s2859_s29 = smov [#allocation13]   ;;  %s2860_s16 = smov [#allocation16]  }
  0x3a   :  { %s79_s30 = sshll.u32 %s2859_s29, 4  ;;  %s111_s0 = sshll.u32 %s2860_s16, 4  ;;  %s80_s30 = int_to_ptr.vmem [resolvable:$true] %s79_s30  ;;  %s112_s0 = int_to_ptr.vmem [resolvable:$true] %s111_s0 }
  0x3b   :  { %s2768_s1 = scalar_lea.vmem %s80_s30, 512  ;;  %p2773_p12 = scmp.lt.s32.totalorder %s80_s30, %s80_s30 }
  0x3c   :  { %p2769_p11 = scmp.ne.s32.totalorder %s80_s30, %s2768_s1  ;;  %p2774_p13 = scmp.lt.s32.totalorder %s2768_s1, %s2768_s1 }
  0x3e   :  { %p2775_p0 = por %p2774_p13, %p2773_p12 }
  0x40   :  { %p2776_p1 = pnand %p2775_p0, %p2769_p11 }
  0x42   :  { %2779 = shalt.err (!%p2776_p1)
}
  0x43   :  { %85 = dma.hbm_to_vmem [thread:$0]  %s3920_s4, 512, %s80_s30, [#allocation12], %s2853_s21, %s2853_s21, %s2854_s22  }
  0x44   :  { %s2788_s2 = scalar_lea.vmem %s112_s0, 512  ;;  %p2793_p3 = scmp.lt.s32.totalorder %s112_s0, %s112_s0 }
  0x45   :  { %p2789_p2 = scmp.ne.s32.totalorder %s112_s0, %s2788_s2  ;;  %p2794_p4 = scmp.lt.s32.totalorder %s2788_s2, %s2788_s2 }
  0x47   :  { %p2795_p5 = por %p2794_p4, %p2793_p3 }
  0x49   :  { %p2796_p6 = pnand %p2795_p5, %p2789_p2 }
  0x4b   :  { %2799 = shalt.err (!%p2796_p6)
}
  0x4c   :  { %117 = dma.hbm_to_vmem [thread:$0]  %s3926_s10, 512, %s112_s0, [#allocation15], %s2853_s21, %s2853_s21, %s2854_s22  }
  0x4d   :  { %s2861_s23 = smov [#allocation17]  }
  0x4e   :  { %s123_s3 = sshll.u32 %s2861_s23, 4  ;;  %s124_s3 = int_to_ptr.vmem [resolvable:$true] %s123_s3 }
  0x4f   :  { %s2808_s24 = scalar_lea.vmem %s124_s3, 512  ;;  %p2813_p8 = scmp.lt.s32.totalorder %s124_s3, %s124_s3 }
  0x50   :  { %p2809_p7 = scmp.ne.s32.totalorder %s124_s3, %s2808_s24  ;;  %p2814_p9 = scmp.lt.s32.totalorder %s2808_s24, %s2808_s24 }
  0x52   :  { %p2815_p10 = por %p2814_p9, %p2813_p8 }
  0x54   :  { %p2816_p11 = pnand %p2815_p10, %p2809_p7 }
  0x56   :  { %2819 = shalt.err (!%p2816_p11)
}
  0x57   :  { %129 = dma.hbm_to_vmem [thread:$0]  %s3927_s11, 512, %s124_s3, [#allocation18], %s2853_s21, %s2853_s21, %s2854_s22  }
  0x58   :  { %2840 = dma.done.wait [#allocation6], 128  }
  0x59   :  { %2841 = vsyncadd [#allocation6], 4294967168 }
  0x5a   :  { %2842 = dma.done.wait [#allocation9], 18688  }
  0x5b   :  { %2843 = vsyncadd [#allocation9], 4294948608 }
  0x5c   :  { %2844 = dma.done.wait [#allocation12], 1024  }
  0x5d   :  { %2845 = vsyncadd [#allocation12], 4294966272 }
  0x5e   :  { %2846 = dma.done.wait [#allocation15], 18944  }
  0x5f   :  { %2847 = vsyncadd [#allocation15], 4294948352 }
  0x60   :  { %2848 = dma.done.wait [#allocation18], 512  }
  0x61   :  { %2849 = vsyncadd [#allocation18], 4294966784  ;;  %v687_v0 = vld [vmem:[#allocation8 + $0xf8] sm:$0xff]  ;;  %v686_v4 = vld [vmem:[#allocation8 + $0xf0] sm:$0xff]  ;;  %v181_v26 = vlaneseq  ;;  %vm2863_vm12 = vmmov 0   ;;  %s2864_s18 = smov [#allocation19]  }
  0x62   :  { %v719_v1 = vld [vmem:[#allocation8 + $0x1f8] sm:$0xff]  ;;  %2255 = vmatprep.subr.mxu0 %v687_v0  ;;  %v718_v5 = vld [vmem:[#allocation8 + $0x1f0] sm:$0xff]  ;;  %v685_v8 = vld [vmem:[#allocation8 + $0xe8] sm:$0xff]  ;;  %s2214_s2 = sshll.u32 %s2864_s18, 4  ;;  %s2215_s2 = int_to_ptr.vmem [resolvable:$true] %s2214_s2 }
  0x63   :  { %v671_v2 = vld [vmem:[#allocation8 + $0x78] sm:$0xff]  ;;  %2290 = vmatprep.subr.mxu1 %v719_v1  ;;  %v670_v6 = vld [vmem:[#allocation8 + $0x70] sm:$0xff]  ;;  %v717_v9 = vld [vmem:[#allocation8 + $0x1e8] sm:$0xff]  ;;  %v2990_v35 = vshrl.u32 %v181_v26, 7  ;;  %s2820_s19 = scalar_lea.vmem %s2215_s2, 128  ;;  %p2825_p13 = scmp.lt.s32.totalorder %s2215_s2, %s2215_s2 }
  0x64   :  { %v703_v3 = vld [vmem:[#allocation8 + $0x178] sm:$0xff]  ;;  %2256 = vmatpush3.msra.mxu0 %v671_v2  ;;  %v702_v7 = vld [vmem:[#allocation8 + $0x170] sm:$0xff]  ;;  %v669_v10 = vld [vmem:[#allocation8 + $0x68] sm:$0xff]  ;;  %p2821_p12 = scmp.ne.s32.totalorder %s2215_s2, %s2820_s19  ;;  %p2826_p0 = scmp.lt.s32.totalorder %s2820_s19, %s2820_s19 }
  0x65   :  { %2291 = vmatpush3.msra.mxu1 %v703_v3  ;;  %2257 = vmatprep.subr.mxu0 %v686_v4  ;;  %v701_v11 = vld [vmem:[#allocation8 + $0x168] sm:$0xff]  ;;  %v684_v12 = vld [vmem:[#allocation8 + $0xe0] sm:$0xff]  ;;  %v683_v16 = vld [vmem:[#allocation8 + $0xd8] sm:$0xff]  ;;  %v2993_v44 = vsub.s32 1, %v2990_v35  ;;  %v2996_v45 = vsub.s32 2, %v2990_v35  ;;  %v2999_v48 = vsub.s32 3, %v2990_v35 }
  0x66   :  { %2292 = vmatprep.subr.mxu1 %v718_v5  ;;  %2258 = vmatpush3.msra.mxu0 %v670_v6  ;;  %v716_v13 = vld [vmem:[#allocation8 + $0x1e0] sm:$0xff]  ;;  %v715_v17 = vld [vmem:[#allocation8 + $0x1d8] sm:$0xff]  ;;  %v682_v20 = vld [vmem:[#allocation8 + $0xd0] sm:$0xff]  ;;  %v3002_v49 = vsub.s32 4, %v2990_v35  ;;  %v3005_v50 = vsub.s32 5, %v2990_v35  ;;  %v3008_v54 = vsub.s32 0, %v2990_v35  ;;  %p2827_p1 = por %p2826_p0, %p2825_p13 }
  0x67   :  { %2293 = vmatpush3.msra.mxu1 %v702_v7  ;;  %2259 = vmatprep.subr.mxu0 %v685_v8  ;;  %v668_v14 = vld [vmem:[#allocation8 + $0x60] sm:$0xff]  ;;  %v667_v18 = vld [vmem:[#allocation8 + $0x58] sm:$0xff]  ;;  %v714_v21 = vld [vmem:[#allocation8 + $0x1d0] sm:$0xff] }
  0x68   :  { %2294 = vmatprep.subr.mxu1 %v717_v9  ;;  %v700_v15 = vld [vmem:[#allocation8 + $0x160] sm:$0xff]  ;;  %2260 = vmatpush3.msra.mxu0 %v669_v10  ;;  %v699_v19 = vld [vmem:[#allocation8 + $0x158] sm:$0xff]  ;;  %v666_v22 = vld [vmem:[#allocation8 + $0x50] sm:$0xff]  ;;  %p2828_p2 = pnand %p2827_p1, %p2821_p12 }
  0x69   :  { %2295 = vmatpush3.msra.mxu1 %v701_v11  ;;  %2261 = vmatprep.subr.mxu0 %v684_v12  ;;  %v698_v23 = vld [vmem:[#allocation8 + $0x150] sm:$0xff]  ;;  %v681_v24 = vld [vmem:[#allocation8 + $0xc8] sm:$0xff]  ;;  %v680_v29 = vld [vmem:[#allocation8 + $0xc0] sm:$0xff] }
  0x6a   :  { %2296 = vmatprep.subr.mxu1 %v716_v13  ;;  %2262 = vmatpush3.msra.mxu0 %v668_v14  ;;  %v713_v25 = vld [vmem:[#allocation8 + $0x1c8] sm:$0xff]  ;;  %v712_v30 = vld [vmem:[#allocation8 + $0x1c0] sm:$0xff]  ;;  %v679_v33 = vld [vmem:[#allocation8 + $0xb8] sm:$0xff] }
  0x6b   :  { %2297 = vmatpush3.msra.mxu1 %v700_v15  ;;  %2263 = vmatprep.subr.mxu0 %v683_v16  ;;  %v665_v27 = vld [vmem:[#allocation8 + $0x48] sm:$0xff]  ;;  %v664_v31 = vld [vmem:[#allocation8 + $0x40] sm:$0xff]  ;;  %v711_v34 = vld [vmem:[#allocation8 + $0x1b8] sm:$0xff] }
  0x6c   :  { %2298 = vmatprep.subr.mxu1 %v715_v17  ;;  %2264 = vmatpush3.msra.mxu0 %v667_v18  ;;  %v697_v28 = vld [vmem:[#allocation8 + $0x148] sm:$0xff]  ;;  %v696_v32 = vld [vmem:[#allocation8 + $0x140] sm:$0xff]  ;;  %v663_v36 = vld [vmem:[#allocation8 + $0x38] sm:$0xff]  ;;  %v3048_v17 = vsub.s32 6, %v2990_v35 }
  0x6d   :  { %2299 = vmatpush3.msra.mxu1 %v699_v19  ;;  %2265 = vmatprep.subr.mxu0 %v682_v20  ;;  %v695_v37 = vld [vmem:[#allocation8 + $0x138] sm:$0xff]  ;;  %v678_v38 = vld [vmem:[#allocation8 + $0xb0] sm:$0xff]  ;;  %v677_v42 = vld [vmem:[#allocation8 + $0xa8] sm:$0xff] }
  0x6e   :  { %2300 = vmatprep.subr.mxu1 %v714_v21  ;;  %2266 = vmatpush3.msra.mxu0 %v666_v22  ;;  %v710_v39 = vld [vmem:[#allocation8 + $0x1b0] sm:$0xff]  ;;  %v709_v43 = vld [vmem:[#allocation8 + $0x1a8] sm:$0xff]  ;;  %v676_v51 = vld [vmem:[#allocation8 + $0xa0] sm:$0xff]  ;;  %v2862_v21 = vmov 0.0  }
  0x6f   :  { %2301 = vmatpush3.msra.mxu1 %v698_v23  ;;  %2267 = vmatprep.subr.mxu0 %v681_v24  ;;  %v662_v40 = vld [vmem:[#allocation8 + $0x30] sm:$0xff]  ;;  %v661_v46 = vld [vmem:[#allocation8 + $0x28] sm:$0xff]  ;;  %v708_v52 = vld [vmem:[#allocation8 + $0x1a0] sm:$0xff] }
  0x70   :  { %2302 = vmatprep.subr.mxu1 %v713_v25  ;;  %2268 = vmatpush3.msra.mxu0 %v665_v27  ;;  %v694_v41 = vld [vmem:[#allocation8 + $0x130] sm:$0xff]  ;;  %v693_v47 = vld [vmem:[#allocation8 + $0x128] sm:$0xff]  ;;  %v660_v53 = vld [vmem:[#allocation8 + $0x20] sm:$0xff] }
  0x71   :  { %2303 = vmatpush3.msra.mxu1 %v697_v28  ;;  %2269 = vmatprep.subr.mxu0 %v680_v29  ;;  %v692_v55 = vld [vmem:[#allocation8 + $0x120] sm:$0xff]  ;;  %v3010_v56 = vld [vmem:[#allocation5] sm:$0xff]  ;;  %v3018_v0 = vld [vmem:[#allocation11] sm:$0xff] }
  0x72   :  { %2304 = vmatprep.subr.mxu1 %v712_v30  ;;  %2270 = vmatpush3.msra.mxu0 %v664_v31  ;;  %v3012_v57 = vld [vmem:[#allocation10] sm:$0xff]  ;;  %v675_v58 = vld [vmem:[#allocation8 + $0x98] sm:$0xff]  ;;  %v674_v4 = vld [vmem:[#allocation8 + $0x90] sm:$0xff]  ;;  %v304_v16 = vrot.slane %v3018_v0, %v2993_v44 }
  0x73   :  { %2305 = vmatpush3.msra.mxu1 %v696_v32  ;;  %2271 = vmatprep.subr.mxu0 %v679_v33  ;;  %v707_v59 = vld [vmem:[#allocation8 + $0x198] sm:$0xff]  ;;  %v189_v60 = vrot.slane %v3012_v57, %v2993_v44  ;;  %v194_v61 = vrot.slane %v3012_v57, %v2996_v45  ;;  %v199_v1 = vrot.slane %v3012_v57, %v2999_v48  ;;  %v706_v5 = vld [vmem:[#allocation8 + $0x190] sm:$0xff]  ;;  %v673_v14 = vld [vmem:[#allocation8 + $0x88] sm:$0xff] }
  0x74   :  { %2306 = vmatprep.subr.mxu1 %v711_v34  ;;  %2272 = vmatpush3.msra.mxu0 %v663_v36  ;;  %v659_v62 = vld [vmem:[#allocation8 + $0x18] sm:$0xff]  ;;  %v204_v2 = vrot.slane %v3012_v57, %v3002_v49  ;;  %v209_v3 = vrot.slane %v3012_v57, %v3005_v50  ;;  %v184_v6 = vrot.slane %v3012_v57, %v3008_v54  ;;  %v658_v9 = vld [vmem:[#allocation8 + $0x10] sm:$0xff]  ;;  %v705_v15 = vld [vmem:[#allocation8 + $0x188] sm:$0xff] }
  0x75   :  { %2307 = vmatpush3.msra.mxu1 %v695_v37  ;;  %2273 = vmatprep.subr.mxu0 %v678_v38  ;;  %v691_v63 = vld [vmem:[#allocation8 + $0x118] sm:$0xff]  ;;  %v3029_v7 = vsub.f32 %v3010_v56, %v189_v60  ;;  %v3032_v8 = vsub.f32 %v3010_v56, %v194_v61  ;;  %v690_v10 = vld [vmem:[#allocation8 + $0x110] sm:$0xff]  ;;  %v3035_v11 = vsub.f32 %v3010_v56, %v199_v1  ;;  %v657_v18 = vld [vmem:[#allocation8 + $0x8] sm:$0xff] }
  0x76   :  { %2308 = vmatprep.subr.mxu1 %v710_v39  ;;  %2274 = vmatpush3.msra.mxu0 %v662_v40  ;;  %v3038_v12 = vsub.f32 %v3010_v56, %v204_v2  ;;  %v3041_v13 = vsub.f32 %v3010_v56, %v209_v3  ;;  %v689_v19 = vld [vmem:[#allocation8 + $0x108] sm:$0xff]  ;;  %v3050_v20 = vld [vmem:[#allocation13] sm:$0xff]  ;;  %v672_v24 = vld [vmem:[#allocation8 + $0x80] sm:$0xff]  ;;  %v3058_v26 = vsub.f32 %v3010_v56, %v184_v6 }
  0x77   :  { %2309 = vmatpush3.msra.mxu1 %v694_v41  ;;  %2275 = vmatprep.subr.mxu0 %v677_v42  ;;  %vm244_vm0 = vcmp.ge.f32.partialorder %v3029_v7, 0.0  ;;  %vm248_vm1 = vcmp.ge.f32.partialorder %v3032_v8, 0.0  ;;  %vm252_vm2 = vcmp.ge.f32.partialorder %v3035_v11, 0.0  ;;  %v704_v25 = vld [vmem:[#allocation8 + $0x180] sm:$0xff]  ;;  %v305_v32 = vmul.f32 %v304_v16, %v3029_v7  ;;  %v3068_v33 = vld [vmem:[#allocation11 + $0x8] sm:$0xff] }
  0x78   :  { %2310 = vmatprep.subr.mxu1 %v709_v43  ;;  %2276 = vmatpush3.msra.mxu0 %v661_v46  ;;  %v3053_v22 = vsel %vm244_vm0, 1.0, %v2862_v21  ;;  %v2229_v23 = vsel %vm248_vm1, 1.0, %v2862_v21  ;;  %v2230_v28 = vsel %vm252_vm2, 1.0, %v2862_v21  ;;  %vm256_vm3 = vcmp.ge.f32.partialorder %v3038_v12, 0.0  ;;  %v656_v29 = vld [vmem:[#allocation8] sm:$0xff]  ;;  %v3070_v34 = vld [vmem:[#allocation13 + $0x8] sm:$0xff] }
  0x79   :  { %2311 = vmatpush3.msra.mxu1 %v693_v47  ;;  %2277 = vmatprep.subr.mxu0 %v676_v51  ;;  %v3061_v27 = vsub.f32 %v3053_v22, %v2229_v23  ;;  %v255_v30 = vsub.f32 %v2229_v23, %v2230_v28  ;;  %v2231_v31 = vsel %vm256_vm3, 1.0, %v2862_v21  ;;  %vm260_vm4 = vcmp.ge.f32.partialorder %v3041_v13, 0.0  ;;  %v688_v40 = vld [vmem:[#allocation8 + $0x100] sm:$0xff]  ;;  %v751_v47 = vld [vmem:[#allocation8 + $0x2f8] sm:$0xff] }
  0x7a   :  { %2312 = vmatprep.subr.mxu1 %v708_v52  ;;  %2278 = vmatpush3.msra.mxu0 %v660_v53  ;;  %v259_v36 = vsub.f32 %v2230_v28, %v2231_v31  ;;  %v3073_v37 = vsel %vm260_vm4, 1.0, %v2862_v21  ;;  %v310_v38 = vrot.slane %v3050_v20, %v2993_v44  ;;  %v317_v39 = vrot.slane %v3018_v0, %v2996_v45 }
  0x7b   :  { %2313 = vmatpush3.msra.mxu1 %v692_v55  ;;  %2279 = vmatprep.subr.mxu0 %v675_v58  ;;  %v3080_v41 = vsub.f32 %v2231_v31, %v3073_v37  ;;  %v306_v42 = vmul.f32 %v305_v32, %v3061_v27  ;;  %v323_v43 = vrot.slane %v3050_v20, %v2996_v45  ;;  %v3086_v46 = vsub.s32 7, %v2990_v35  ;;  %v783_v58 = vld [vmem:[#allocation8 + $0x3f8] sm:$0xff] }
  0x7c   :  { %2314 = vmatprep.subr.mxu1 %v707_v59  ;;  %2280 = vmatpush3.msra.mxu0 %v659_v62  ;;  %v311_v51 = vmul.f32 %v310_v38, %v3035_v11  ;;  %v318_v52 = vmul.f32 %v317_v39, %v3032_v8  ;;  %v330_v53 = vrot.slane %v3018_v0, %v2999_v48  ;;  %vm241_vm5 = vcmp.ge.f32.partialorder %v3058_v26, 0.0  ;;  %v3102_v62 = vld [vmem:[#allocation11 + $0x10] sm:$0xff] }
  0x7d   :  { %2315 = vmatpush3.msra.mxu1 %v691_v63  ;;  %2281 = vmatprep.subr.mxu0 %v674_v4  ;;  %v336_v55 = vrot.slane %v3050_v20, %v2999_v48  ;;  %v324_v59 = vmul.f32 %v323_v43, %v3038_v12  ;;  %v434_v35 = vrot.slane %v3068_v33, %v2999_v48  ;;  %v3104_v63 = vld [vmem:[#allocation13 + $0x10] sm:$0xff] }
  0x7e   :  { %2316 = vmatprep.subr.mxu1 %v706_v5  ;;  %2282 = vmatpush3.msra.mxu0 %v658_v9  ;;  %v440_v60 = vrot.slane %v3070_v34, %v2999_v48  ;;  %v447_v61 = vrot.slane %v3068_v33, %v3002_v49  ;;  %v312_v1 = vmul.f32 %v311_v51, %v255_v30 }
  0x7f   :  { %2317 = vmatpush3.msra.mxu1 %v690_v10  ;;  %2283 = vmatprep.subr.mxu0 %v673_v14  ;;  %v319_v2 = vmul.f32 %v318_v52, %v255_v30  ;;  %v331_v3 = vmul.f32 %v330_v53, %v3035_v11  ;;  %v337_v4 = vmul.f32 %v336_v55, %v3041_v13 }
  0x80   :  { %2318 = vmatprep.subr.mxu1 %v705_v15  ;;  %2284 = vmatpush3.msra.mxu0 %v657_v18  ;;  %v325_v5 = vmul.f32 %v324_v59, %v259_v36  ;;  %v435_v6 = vmul.f32 %v434_v35, %v3029_v7  ;;  %v441_v9 = vmul.f32 %v440_v60, %v3038_v12 }
  0x81   :  { %2319 = vmatpush3.msra.mxu1 %v689_v19  ;;  %2285 = vmatprep.subr.mxu0 %v672_v24  ;;  %v448_v10 = vmul.f32 %v447_v61, %v3032_v8  ;;  %v3111_v14 = vadd.f32 %v312_v1, %v306_v42  ;;  %v332_v15 = vmul.f32 %v331_v3, %v259_v36  ;;  %v2227_v1 = vsel %vm241_vm5, 1.0, %v2862_v21 }
  0x82   :  { %2320 = vmatprep.subr.mxu1 %v704_v25  ;;  %2286 = vmatpush3.msra.mxu0 %v656_v29  ;;  %v338_v16 = vmul.f32 %v337_v4, %v3080_v41  ;;  %v453_v18 = vrot.slane %v3070_v34, %v3002_v49  ;;  %v326_v19 = vadd.f32 %v325_v5, %v319_v2  ;;  %v3120_v25 = vld [vmem:[#allocation10 + $0x8] sm:$0xf] }
  0x83   :  { %2321 = vmatpush3.msra.mxu1 %v688_v40  ;;  %2325 = vmatprep.subr.mxu0 %v751_v47  ;;  %v551_v23 = vrot.slane %v3102_v62, %v3002_v49  ;;  %v557_v24 = vrot.slane %v3104_v63, %v3002_v49  ;;  %v214_v28 = vrot.slane %v3012_v57, %v3048_v17 }
  0x84   :  { %2360 = vmatprep.subr.mxu1 %v783_v58  ;;  %v339_v29 = vadd.f32 %v338_v16, %v332_v15  ;;  %v436_v30 = vmul.f32 %v435_v6, %v3111_v14  ;;  %v454_v31 = vmul.f32 %v453_v18, %v3041_v13  ;;  %v219_v32 = vrot.slane %v3012_v57, %v3086_v46 }
  0x85   :  { %v442_v36 = vmul.f32 %v441_v9, %v326_v19  ;;  %v449_v38 = vmul.f32 %v448_v10, %v326_v19  ;;  %v552_v39 = vmul.f32 %v551_v23, %v3029_v7  ;;  %v558_v40 = vmul.f32 %v557_v24, %v3041_v13 }
  0x86   :  { %v455_v42 = vmul.f32 %v454_v31, %v339_v29  ;;  %v3131_v43 = vsub.f32 %v3010_v56, %v214_v28  ;;  %v3134_v47 = vsub.f32 %v3010_v56, %v219_v32  ;;  %v224_v51 = vrot.slane %v3120_v25, %v3008_v54 }
  0x87   :  { %v3138_v52 = vadd.f32 %v442_v36, %v436_v30  ;;  %v343_v57 = vrot.slane %v3018_v0, %v3002_v49  ;;  %v349_v7 = vrot.slane %v3050_v20, %v3002_v49  ;;  %v356_v53 = vrot.slane %v3018_v0, %v3005_v50 }
  0x88   :  { %v3146_v55 = vadd.f32 %v455_v42, %v449_v38  ;;  %v3149_v58 = vsub.f32 %v3010_v56, %v224_v51  ;;  %vm264_vm6 = vcmp.ge.f32.partialorder %v3131_v43, 0.0  ;;  %vm268_vm7 = vcmp.ge.f32.partialorder %v3134_v47, 0.0 }
  0x89   :  { %v553_v59 = vmul.f32 %v552_v39, %v3138_v52  ;;  %v2233_v35 = vsel %vm264_vm6, 1.0, %v2862_v21  ;;  %v2234_v60 = vsel %vm268_vm7, 1.0, %v2862_v21  ;;  %v344_v61 = vmul.f32 %v343_v57, %v3038_v12 }
  0x8a   :  { %v559_v2 = vmul.f32 %v558_v40, %v3146_v55  ;;  %v267_v3 = vsub.f32 %v3073_v37, %v2233_v35  ;;  %v3162_v4 = vsub.f32 %v2233_v35, %v2234_v60  ;;  %v350_v6 = vmul.f32 %v349_v7, %v3131_v43 }
  0x8b   :  { %v345_v5 = vmul.f32 %v344_v61, %v3080_v41  ;;  %v357_v9 = vmul.f32 %v356_v53, %v3041_v13  ;;  %vm272_vm8 = vcmp.ge.f32.partialorder %v3149_v58, 0.0  ;;  %v362_v15 = vrot.slane %v3050_v20, %v3005_v50 }
  0x8c   :  { %v560_v10 = vadd.f32 %v559_v2, %v553_v59  ;;  %v460_v16 = vrot.slane %v3068_v33, %v3005_v50  ;;  %v351_v18 = vmul.f32 %v350_v6, %v267_v3  ;;  %v466_v37 = vrot.slane %v3070_v34, %v3005_v50 }
  0x8d   :  { %v358_v19 = vmul.f32 %v357_v9, %v267_v3  ;;  %v473_v41 = vrot.slane %v3068_v33, %v3048_v17  ;;  %v363_v23 = vmul.f32 %v362_v15, %v3134_v47  ;;  %v479_v28 = vrot.slane %v3070_v34, %v3048_v17 }
  0x8e   :  { %864 = vmatprep.mubr.f32.mxu0 %v560_v10  ;;  %v461_v24 = vmul.f32 %v460_v16, %v3035_v11  ;;  %v577_v30 = vrot.slane %v3102_v62, %v3048_v17  ;;  %v2235_v31 = vsel %vm272_vm8, 1.0, %v2862_v21  ;;  %v352_v32 = vadd.f32 %v351_v18, %v345_v5 }
  0x8f   :  { %v467_v36 = vmul.f32 %v466_v37, %v3131_v43  ;;  %v474_v38 = vmul.f32 %v473_v41, %v3038_v12  ;;  %v364_v39 = vmul.f32 %v363_v23, %v3162_v4  ;;  %v480_v42 = vmul.f32 %v479_v28, %v3134_v47 }
  0x90   :  { %v462_v40 = vmul.f32 %v461_v24, %v339_v29  ;;  %v583_v51 = vrot.slane %v3104_v63, %v3048_v17  ;;  %v247_v57 = vsub.f32 %v2227_v1, %v3053_v22  ;;  %v578_v59 = vmul.f32 %v577_v30, %v3035_v11 }
  0x91   :  { %v468_v7 = vmul.f32 %v467_v36, %v352_v32  ;;  %v475_v53 = vmul.f32 %v474_v38, %v352_v32  ;;  %v3191_v35 = vadd.f32 %v364_v39, %v358_v19  ;;  %v291_v61 = vrot.slane %v3018_v0, %v3008_v54 }
  0x92   :  { %v297_v2 = vrot.slane %v3050_v20, %v3008_v54  ;;  %v421_v29 = vrot.slane %v3068_v33, %v2996_v45  ;;  %v275_v3 = vsub.f32 %v2234_v60, %v2235_v31  ;;  %v427_v22 = vrot.slane %v3070_v34, %v2996_v45 }
  0x93   :  { %v469_v5 = vadd.f32 %v468_v7, %v462_v40  ;;  %v538_v1 = vrot.slane %v3102_v62, %v2999_v48  ;;  %v481_v6 = vmul.f32 %v480_v42, %v3191_v35  ;;  %v584_v9 = vmul.f32 %v583_v51, %v3134_v47 }
  0x94   :  { %v292_v10 = vmul.f32 %v291_v61, %v3058_v26  ;;  %v298_v15 = vmul.f32 %v297_v2, %v3032_v8  ;;  %v422_v18 = vmul.f32 %v421_v29, %v3058_v26  ;;  %v428_v60 = vmul.f32 %v427_v22, %v3035_v11 }
  0x95   :  { %v579_v16 = vmul.f32 %v578_v59, %v469_v5  ;;  %v544_v19 = vrot.slane %v3104_v63, %v2999_v48  ;;  %v3211_v37 = vadd.f32 %v481_v6, %v475_v53  ;;  %v564_v24 = vrot.slane %v3102_v62, %v3005_v50 }
  0x96   :  { %v293_v41 = vmul.f32 %v292_v10, %v247_v57  ;;  %v299_v23 = vmul.f32 %v298_v15, %v3061_v27  ;;  %v539_v28 = vmul.f32 %v538_v1, %v3058_v26  ;;  %v570_v32 = vrot.slane %v3104_v63, %v3005_v50  ;;  %v767_v1 = vld [vmem:[#allocation8 + $0x378] sm:$0xff]  ;;  %v782_v10 = vld [vmem:[#allocation8 + $0x3f0] sm:$0xff]  ;;  %v3250_v15 = vld [vmem:[#allocation11 + $0x18] sm:$0x7] }
  0x97   :  { %v545_v30 = vmul.f32 %v544_v19, %v3038_v12  ;;  %v229_v11 = vrot.slane %v3120_v25, %v2993_v44  ;;  %v585_v36 = vmul.f32 %v584_v9, %v3211_v37  ;;  %v429_v39 = vmul.f32 %v428_v60, %v3111_v14 }
  0x98   :  { %v300_v38 = vadd.f32 %v299_v23, %v293_v41  ;;  %v565_v27 = vmul.f32 %v564_v24, %v3032_v8  ;;  %v571_v42 = vmul.f32 %v570_v32, %v3131_v43  ;;  %v369_v51 = vrot.slane %v3018_v0, %v3048_v17  ;;  %v735_v24 = vld [vmem:[#allocation8 + $0x278] sm:$0xff] }
  0x99   :  { %v546_v40 = vmul.f32 %v545_v30, %v3138_v52  ;;  %v3228_v26 = vsub.f32 %v3010_v56, %v229_v11  ;;  %v586_v57 = vadd.f32 %v585_v36, %v579_v16  ;;  %v375_v59 = vrot.slane %v3050_v20, %v3048_v17  ;;  %v750_v36 = vld [vmem:[#allocation8 + $0x2f0] sm:$0xff] }
  0x9a   :  { %v423_v7 = vmul.f32 %v422_v18, %v300_v38  ;;  %v566_v53 = vmul.f32 %v565_v27, %v3146_v55  ;;  %v572_v14 = vmul.f32 %v571_v42, %v469_v5  ;;  %v370_v8 = vmul.f32 %v369_v51, %v3131_v43  ;;  %v3263_v38 = vld [vmem:[#allocation13 + $0x18] sm:$0x7]  ;;  %v734_v42 = vld [vmem:[#allocation8 + $0x270] sm:$0xff]  ;;  %v780_v51 = vld [vmem:[#allocation8 + $0x3e0] sm:$0xff] }
  0x9b   :  { %vm276_vm9 = vcmp.ge.f32.partialorder %v3228_v26, 0.0  ;;  %v382_v52 = vrot.slane %v3018_v0, %v3086_v46  ;;  %934 = vmatprep.mubr.f32.mxu1 %v586_v57  ;;  %v376_v29 = vmul.f32 %v375_v59, %v3149_v58  ;;  %v388_v55 = vrot.slane %v3050_v20, %v3086_v46  ;;  %v766_v20 = vld [vmem:[#allocation8 + $0x370] sm:$0xff] }
  0x9c   :  { %v430_v61 = vadd.f32 %v429_v39, %v423_v7  ;;  %v3240_v2 = vsel %vm276_vm9, 1.0, %v2862_v21  ;;  %v573_v22 = vadd.f32 %v572_v14, %v566_v53  ;;  %v371_v6 = vmul.f32 %v370_v8, %v3162_v4  ;;  %v749_v14 = vld [vmem:[#allocation8 + $0x2e8] sm:$0xff]  ;;  %v764_v8 = vld [vmem:[#allocation8 + $0x360] sm:$0xff] }
  0x9d   :  { %v3246_v5 = vsub.f32 %v2235_v31, %v3240_v2  ;;  %v383_v9 = vmul.f32 %v382_v52, %v3134_v47  ;;  %v377_v16 = vmul.f32 %v376_v29, %v275_v3  ;;  %v389_v18 = vmul.f32 %v388_v55, %v3228_v26  ;;  %v779_v29 = vld [vmem:[#allocation8 + $0x3d8] sm:$0xff] }
  0x9e   :  { %v540_v0 = vmul.f32 %v539_v28, %v430_v61  ;;  %v486_v60 = vrot.slane %v3068_v33, %v3086_v46  ;;  %935 = vmatmul.mubr.f32.vlgmr.msra.gmra.mxu1 %v573_v22  ;;  %v492_v31 = vrot.slane %v3070_v34, %v3086_v46  ;;  %v499_v4 = vrot.slane %v3102_v62, %v3008_v54  ;;  %v781_v28 = vld [vmem:[#allocation8 + $0x3e8] sm:$0xff] }
  0x9f   :  { %v384_v19 = vmul.f32 %v383_v9, %v275_v3  ;;  %v505_v41 = vrot.slane %v3104_v63, %v3008_v54  ;;  %2361 = vmatpush3.msra.mxu1 %v767_v1  ;;  %v378_v30 = vadd.f32 %v377_v16, %v371_v6  ;;  %v390_v32 = vmul.f32 %v389_v18, %v3246_v5  ;;  %v765_v3 = vld [vmem:[#allocation8 + $0x368] sm:$0xff]  ;;  %v763_v1 = vld [vmem:[#allocation8 + $0x358] sm:$0xff]  ;;  %v778_v16 = vld [vmem:[#allocation8 + $0x3d0] sm:$0xff] }
  0xa0   :  { %v547_v23 = vadd.f32 %v546_v40, %v540_v0  ;;  %v487_v11 = vmul.f32 %v486_v60, %v3041_v13  ;;  %2362 = vmatprep.subr.mxu1 %v782_v10  ;;  %v493_v39 = vmul.f32 %v492_v31, %v3149_v58  ;;  %v500_v27 = vmul.f32 %v499_v4, %v3131_v43  ;;  %v733_v61 = vld [vmem:[#allocation8 + $0x268] sm:$0xff]  ;;  %v732_v10 = vld [vmem:[#allocation8 + $0x260] sm:$0xff]  ;;  %v762_v31 = vld [vmem:[#allocation8 + $0x350] sm:$0xff] }
  0xa1   :  { %v603_v40 = vrot.slane %v3250_v15, %v3008_v54  ;;  %2363 = vmatpush3.msra.mxu1 %v766_v20  ;;  %v3269_v57 = vadd.f32 %v390_v32, %v384_v19  ;;  %v506_v53 = vmul.f32 %v505_v41, %v3228_v26  ;;  %v590_v59 = vrot.slane %v3102_v62, %v3086_v46  ;;  %v731_v41 = vld [vmem:[#allocation8 + $0x258] sm:$0xff]  ;;  %v761_v32 = vld [vmem:[#allocation8 + $0x348] sm:$0xff] }
  0xa2   :  { %865 = vmatmul.mubr.f32.vlgmr.msra.gmra.mxu0 %v547_v23  ;;  %v488_v7 = vmul.f32 %v487_v11, %v3191_v35  ;;  %2364 = vmatprep.subr.mxu1 %v781_v28  ;;  %v494_v52 = vmul.f32 %v493_v39, %v378_v30  ;;  %v501_v55 = vmul.f32 %v500_v27, %v378_v30  ;;  %v748_v35 = vld [vmem:[#allocation8 + $0x2e0] sm:$0xff]  ;;  %v777_v23 = vld [vmem:[#allocation8 + $0x3c8] sm:$0xff]  ;;  %v746_v30 = vld [vmem:[#allocation8 + $0x2d0] sm:$0xff] }
  0xa3   :  { %2326 = vmatpush3.msra.mxu0 %v735_v24  ;;  %2365 = vmatpush3.msra.mxu1 %v765_v3  ;;  %v609_v22 = vrot.slane %v3263_v38, %v3008_v54  ;;  %v604_v6 = vmul.f32 %v603_v40, %v3041_v13  ;;  %v234_v9 = vrot.slane %v3120_v25, %v2996_v45  ;;  %v747_v13 = vld [vmem:[#allocation8 + $0x2d8] sm:$0xff]  ;;  %v730_v3 = vld [vmem:[#allocation8 + $0x250] sm:$0xff]  ;;  %v776_v39 = vld [vmem:[#allocation8 + $0x3c0] sm:$0xff] }
  0xa4   :  { %2327 = vmatprep.subr.mxu0 %v750_v36  ;;  %2366 = vmatprep.subr.mxu1 %v780_v51  ;;  %v239_v0 = vrot.slane %v3120_v25, %v2999_v48  ;;  %v3282_v18 = vadd.f32 %v494_v52, %v488_v7  ;;  %v507_v60 = vmul.f32 %v506_v53, %v3269_v57  ;;  %v745_v7 = vld [vmem:[#allocation8 + $0x2c8] sm:$0xff]  ;;  %v760_v53 = vld [vmem:[#allocation8 + $0x340] sm:$0xff]  ;;  %v775_v52 = vld [vmem:[#allocation8 + $0x3b8] sm:$0xff] }
  0xa5   :  { %2328 = vmatpush3.msra.mxu0 %v734_v42  ;;  %2367 = vmatpush3.msra.mxu1 %v764_v8  ;;  %v395_v20 = vrot.slane %v3068_v33, %v3008_v54  ;;  %v3288_v19 = vmul.f32 %v590_v59, %v3038_v12  ;;  %v3291_v25 = vsub.f32 %v3010_v56, %v234_v9  ;;  %v729_v8 = vld [vmem:[#allocation8 + $0x248] sm:$0xff] }
  0xa6   :  { %2329 = vmatprep.subr.mxu0 %v749_v14  ;;  %2368 = vmatprep.subr.mxu1 %v779_v29  ;;  %v3294_v4 = vsub.f32 %v3010_v56, %v239_v0  ;;  %v3297_v24 = vmul.f32 %v609_v22, %v3228_v26  ;;  %v596_v12 = vrot.slane %v3104_v63, %v3086_v46  ;;  %v744_v22 = vld [vmem:[#allocation8 + $0x2c0] sm:$0xff] }
  0xa7   :  { %2330 = vmatpush3.msra.mxu0 %v733_v61  ;;  %2369 = vmatpush3.msra.mxu1 %v763_v1  ;;  %v396_v28 = vmul.f32 %v395_v20, %v3149_v58  ;;  %vm280_vm10 = vcmp.ge.f32.partialorder %v3291_v25, 0.0  ;;  %v401_v11 = vrot.slane %v3070_v34, %v3008_v54  ;;  %v408_v36 = vrot.slane %v3068_v33, %v2993_v44 }
  0xa8   :  { %2331 = vmatprep.subr.mxu0 %v748_v35  ;;  %2370 = vmatprep.subr.mxu1 %v778_v16  ;;  %vm284_vm11 = vcmp.ge.f32.partialorder %v3294_v4, 0.0  ;;  %v3308_v27 = vadd.f32 %v507_v60, %v501_v55  ;;  %v3311_v40 = vmul.f32 %v604_v6, %v3282_v18  ;;  %v2237_v42 = vsel %vm280_vm10, 1.0, %v2862_v21  ;;  %v759_v35 = vld [vmem:[#allocation8 + $0x338] sm:$0xff]  ;;  %v728_v6 = vld [vmem:[#allocation8 + $0x240] sm:$0xff]  ;;  %v758_v16 = vld [vmem:[#allocation8 + $0x330] sm:$0xff] }
  0xa9   :  { %2332 = vmatpush3.msra.mxu0 %v732_v10  ;;  %2371 = vmatpush3.msra.mxu1 %v762_v31  ;;  %v2238_v51 = vsel %vm284_vm11, 1.0, %v2862_v21  ;;  %v283_v59 = vsub.f32 %v3240_v2, %v2237_v42  ;;  %v397_v14 = vmul.f32 %v396_v28, %v3246_v5  ;;  %v402_v61 = vmul.f32 %v401_v11, %v3291_v25  ;;  %v743_v10 = vld [vmem:[#allocation8 + $0x2b8] sm:$0xff]  ;;  %v773_v31 = vld [vmem:[#allocation8 + $0x3a8] sm:$0xff] }
  0xaa   :  { %2333 = vmatprep.subr.mxu0 %v747_v13  ;;  %2372 = vmatprep.subr.mxu1 %v777_v23  ;;  %v287_v33 = vsub.f32 %v2237_v42, %v2238_v51  ;;  %v409_v29 = vmul.f32 %v408_v36, %v3228_v26  ;;  %v414_v55 = vrot.slane %v3070_v34, %v2993_v44  ;;  %v774_v26 = vld [vmem:[#allocation8 + $0x3b0] sm:$0xff]  ;;  %v772_v42 = vld [vmem:[#allocation8 + $0x3a0] sm:$0xff] }
  0xab   :  { %2334 = vmatpush3.msra.mxu0 %v731_v41  ;;  %2373 = vmatpush3.msra.mxu1 %v761_v32  ;;  %v512_v2 = vrot.slane %v3102_v62, %v2993_v44  ;;  %v518_v5 = vrot.slane %v3104_v63, %v2993_v44  ;;  %v525_v1 = vrot.slane %v3102_v62, %v2996_v45  ;;  %v727_v62 = vld [vmem:[#allocation8 + $0x238] sm:$0xff]  ;;  %v757_v32 = vld [vmem:[#allocation8 + $0x328] sm:$0xff] }
  0xac   :  { %2335 = vmatprep.subr.mxu0 %v746_v30  ;;  %2374 = vmatprep.subr.mxu1 %v776_v39  ;;  %v403_v9 = vmul.f32 %v402_v61, %v283_v59  ;;  %v410_v0 = vmul.f32 %v409_v29, %v283_v59  ;;  %v415_v34 = vmul.f32 %v414_v55, %v3294_v4  ;;  %v742_v30 = vld [vmem:[#allocation8 + $0x2b0] sm:$0xff]  ;;  %v741_v59 = vld [vmem:[#allocation8 + $0x2a8] sm:$0xff]  ;;  %v771_v61 = vld [vmem:[#allocation8 + $0x398] sm:$0xff] }
  0xad   :  { %2336 = vmatpush3.msra.mxu0 %v730_v3  ;;  %2375 = vmatpush3.msra.mxu1 %v760_v53  ;;  %v513_v60 = vmul.f32 %v512_v2, %v3134_v47  ;;  %v519_v20 = vmul.f32 %v518_v5, %v3291_v25  ;;  %v526_v13 = vmul.f32 %v525_v1, %v3149_v58  ;;  %v726_v39 = vld [vmem:[#allocation8 + $0x230] sm:$0xff]  ;;  %v724_v1 = vld [vmem:[#allocation8 + $0x220] sm:$0xff] }
  0xae   :  { %2337 = vmatprep.subr.mxu0 %v745_v7  ;;  %2376 = vmatprep.subr.mxu1 %v775_v52  ;;  %v404_v41 = vadd.f32 %v403_v9, %v397_v14  ;;  %v416_v23 = vmul.f32 %v415_v34, %v287_v33  ;;  %v531_v28 = vrot.slane %v3104_v63, %v2996_v45  ;;  %v756_v33 = vld [vmem:[#allocation8 + $0x320] sm:$0xff]  ;;  %v725_v52 = vld [vmem:[#allocation8 + $0x228] sm:$0xff]  ;;  %v739_v9 = vld [vmem:[#allocation8 + $0x298] sm:$0xff] }
  0xaf   :  { %2338 = vmatpush3.msra.mxu0 %v729_v8  ;;  %2377 = vmatpush3.msra.mxu1 %v759_v35  ;;  %v514_v11 = vmul.f32 %v513_v60, %v3269_v57  ;;  %v629_v36 = vrot.slane %v3250_v15, %v2996_v45  ;;  %v635_v3 = vrot.slane %v3263_v38, %v2996_v45  ;;  %v755_v35 = vld [vmem:[#allocation8 + $0x318] sm:$0xff] }
  0xb0   :  { %2339 = vmatprep.subr.mxu0 %v744_v22  ;;  %2378 = vmatprep.subr.mxu1 %v774_v26  ;;  %v611_v51 = vmul.f32 %v3297_v24, %v3308_v27  ;;  %v417_v7 = vadd.f32 %v416_v23, %v410_v0  ;;  %v520_v53 = vmul.f32 %v519_v20, %v404_v41  ;;  %v740_v22 = vld [vmem:[#allocation8 + $0x2a0] sm:$0xff]  ;;  %v754_v0 = vld [vmem:[#allocation8 + $0x310] sm:$0xff]  ;;  %v721_v23 = vld [vmem:[#allocation8 + $0x208] sm:$0xff] }
  0xb1   :  { %2340 = vmatpush3.msra.mxu0 %v728_v6  ;;  %2379 = vmatpush3.msra.mxu1 %v758_v16  ;;  %v527_v57 = vmul.f32 %v526_v13, %v404_v41  ;;  %v532_v14 = vmul.f32 %v531_v28, %v3294_v4  ;;  %v630_v8 = vmul.f32 %v629_v36, %v3134_v47  ;;  %v770_v6 = vld [vmem:[#allocation8 + $0x390] sm:$0xff]  ;;  %v753_v13 = vld [vmem:[#allocation8 + $0x308] sm:$0xff]  ;;  %v768_v41 = vld [vmem:[#allocation8 + $0x380] sm:$0xff] }
  0xb2   :  { %2341 = vmatprep.subr.mxu0 %v743_v10  ;;  %2380 = vmatprep.subr.mxu1 %v773_v31  ;;  %v521_v29 = vadd.f32 %v520_v53, %v514_v11  ;;  %v616_v55 = vrot.slane %v3250_v15, %v2993_v44  ;;  %v622_v24 = vrot.slane %v3263_v38, %v2993_v44  ;;  %v738_v10 = vld [vmem:[#allocation8 + $0x290] sm:$0xff]  ;;  %v799_v11 = vld [vmem:[#allocation8 + $0x478] sm:$0xff] }
  0xb3   :  { %2342 = vmatpush3.msra.mxu0 %v727_v62  ;;  %2381 = vmatpush3.msra.mxu1 %v757_v32  ;;  %v597_v47 = vmul.f32 %v596_v12, %v3149_v58  ;;  %v533_v2 = vmul.f32 %v532_v14, %v417_v7  ;;  %v636_v5 = vmul.f32 %v635_v3, %v3294_v4  ;;  %v723_v58 = vld [vmem:[#allocation8 + $0x218] sm:$0xff]  ;;  %v769_v4 = vld [vmem:[#allocation8 + $0x388] sm:$0xff]  ;;  %v722_v20 = vld [vmem:[#allocation8 + $0x210] sm:$0xff] }
  0xb4   :  { %2343 = vmatprep.subr.mxu0 %v742_v30  ;;  %2382 = vmatprep.subr.mxu1 %v772_v42  ;;  %v617_v15 = vmul.f32 %v616_v55, %v3131_v43  ;;  %v623_v38 = vmul.f32 %v622_v24, %v3291_v25  ;;  %v172_v26 = vmul.f32 %v3010_v56, %v3010_v56  ;;  %v736_v30 = vld [vmem:[#allocation8 + $0x280] sm:$0xff]  ;;  %v798_v36 = vld [vmem:[#allocation8 + $0x470] sm:$0xff]  ;;  %v795_v7 = vld [vmem:[#allocation8 + $0x458] sm:$0xff]  ;;  %v171_v24 = vmul.f32 0.5, %v3010_v56 }
  0xb5   :  { %2344 = vmatpush3.msra.mxu0 %v726_v39  ;;  %2383 = vmatpush3.msra.mxu1 %v756_v33  ;;  %v534_v63 = vadd.f32 %v533_v2, %v527_v57  ;;  %v612_v12 = vadd.f32 %v611_v51, %v3311_v40  ;;  %v631_v34 = vmul.f32 %v630_v8, %v521_v29  ;;  %v737_v40 = vld [vmem:[#allocation8 + $0x288] sm:$0xff]  ;;  %v796_v42 = vld [vmem:[#allocation8 + $0x460] sm:$0xff]  ;;  %v794_v53 = vld [vmem:[#allocation8 + $0x450] sm:$0xff] }
  0xb6   :  { %2345 = vmatprep.subr.mxu0 %v741_v59  ;;  %2384 = vmatprep.subr.mxu1 %v771_v61  ;;  %v618_v25 = vmul.f32 %v617_v15, %v3308_v27  ;;  %v624_v16 = vmul.f32 %v623_v38, %v521_v29  ;;  %v592_v60 = vmul.f32 %v3288_v19, %v3211_v37  ;;  %v752_v27 = vld [vmem:[#allocation8 + $0x300] sm:$0xff]  ;;  %v797_v39 = vld [vmem:[#allocation8 + $0x468] sm:$0xff]  ;;  %v791_v57 = vld [vmem:[#allocation8 + $0x438] sm:$0xff] }
  0xb7   :  { %2346 = vmatpush3.msra.mxu0 %v725_v52  ;;  %2385 = vmatpush3.msra.mxu1 %v755_v35  ;;  %v637_v43 = vmul.f32 %v636_v5, %v534_v63  ;;  %v598_v62 = vmul.f32 %v597_v47, %v3282_v18  ;;  %v173_v31 = vmul.f32 %v172_v26, %v3010_v56  ;;  %v720_v19 = vld [vmem:[#allocation8 + $0x200] sm:$0xff]  ;;  %v793_v59 = vld [vmem:[#allocation8 + $0x448] sm:$0xff]  ;;  %v790_v14 = vld [vmem:[#allocation8 + $0x430] sm:$0xff] }
  0xb8   :  { %2347 = vmatprep.subr.mxu0 %v740_v22  ;;  %2386 = vmatprep.subr.mxu1 %v770_v6  ;;  %v625_v37 = vadd.f32 %v624_v16, %v618_v25  ;;  %v792_v33 = vld [vmem:[#allocation8 + $0x440] sm:$0xff]  ;;  %v789_v8 = vld [vmem:[#allocation8 + $0x428] sm:$0xff]  ;;  %v787_v29 = vld [vmem:[#allocation8 + $0x418] sm:$0xff] }
  0xb9   :  { %2348 = vmatpush3.msra.mxu0 %v724_v1  ;;  %2387 = vmatpush3.msra.mxu1 %v754_v0  ;;  %v638_v28 = vadd.f32 %v637_v43, %v631_v34  ;;  %v599_v32 = vadd.f32 %v598_v62, %v592_v60  ;;  %v174_v18 = vmul.f32 0.044715, %v173_v31  ;;  %v788_v52 = vld [vmem:[#allocation8 + $0x420] sm:$0xff]  ;;  %v786_v55 = vld [vmem:[#allocation8 + $0x410] sm:$0xff]  ;;  %v785_v35 = vld [vmem:[#allocation8 + $0x408] sm:$0xff] }
  0xba   :  { %2349 = vmatprep.subr.mxu0 %v739_v9  ;;  %2388 = vmatprep.subr.mxu1 %v769_v4  ;;  %v784_v47 = vld [vmem:[#allocation8 + $0x400] sm:$0xff]  ;;  %v1694_v62 = vld [vmem:[#allocation14 + $0x78] sm:$0xff] }
  0xbb   :  { %2350 = vmatpush3.msra.mxu0 %v723_v58  ;;  %1004 = vmatprep.mubr.f32.mxu0 %v612_v12  ;;  %v175_v3 = vadd.f32 %v174_v18, %v3010_v56  ;;  %v1726_v31 = vld [vmem:[#allocation14 + $0x178] sm:$0xff]  ;;  %v1739_v18 = vld [vmem:[#allocation14 + $0x1e0] sm:$0xff] }
  0xbc   :  { %2351 = vmatprep.subr.mxu0 %v738_v10  ;;  %2389 = vmatpush3.msra.mxu1 %v753_v13  ;;  %v1742_v13 = vld [vmem:[#allocation14 + $0x1f8] sm:$0xff] }
  0xbd   :  { %2352 = vmatpush3.msra.mxu0 %v722_v20  ;;  %2390 = vmatprep.subr.mxu1 %v768_v41  ;;  %v176_v51 = vmul.f32 0.7978846, %v175_v3  ;;  %v1710_v20 = vld [vmem:[#allocation14 + $0xf8] sm:$0xff]  ;;  %v1741_v41 = vld [vmem:[#allocation14 + $0x1f0] sm:$0xff] }
  0xbe   :  { %2353 = vmatprep.subr.mxu0 %v737_v40  ;;  %2391 = vmatpush3.msra.mxu1 %v752_v27  ;;  %v1709_v40 = vld [vmem:[#allocation14 + $0xf0] sm:$0xff]  ;;  %v1706_v3 = vld [vmem:[#allocation14 + $0xd8] sm:$0xff] }
  0xbf   :  { %2354 = vmatpush3.msra.mxu0 %v721_v23  ;;  %1074 = vmatprep.mubr.f32.mxu1 %v638_v28  ;;  %2652 = vtanh.f32 %v176_v51  ;;  %v1693_v23 = vld [vmem:[#allocation14 + $0x70] sm:$0xff]  ;;  %v1708_v28 = vld [vmem:[#allocation14 + $0xe8] sm:$0xff]  ;;  %v1722_v51 = vld [vmem:[#allocation14 + $0x158] sm:$0xff] }
  0xc0   :  { %2355 = vmatprep.subr.mxu0 %v736_v30  ;;  %1075 = vmatmul.mubr.f32.vlgmr.msra.gmra.mxu1 %v625_v37  ;;  %v1725_v27 = vld [vmem:[#allocation14 + $0x170] sm:$0xff]  ;;  %v1740_v30 = vld [vmem:[#allocation14 + $0x1e8] sm:$0xff] }
  0xc1   :  { %2356 = vmatpush3.msra.mxu0 %v720_v19  ;;  %2412 = vmatprep.subr.mxu1 %v1710_v20  ;;  %v1692_v37 = vld [vmem:[#allocation14 + $0x68] sm:$0xff]  ;;  %v1681_v20 = vld [vmem:[#allocation14 + $0x10] sm:$0xff] }
  0xc2   :  { %1005 = vmatmul.mubr.f32.vlgmr.msra.gmra.mxu0 %v599_v32  ;;  %2569 = vmatprep.subr.mxu0 %v2862_v21  ;;  %v1724_v19 = vld [vmem:[#allocation14 + $0x168] sm:$0xff]  ;;  %v1707_v32 = vld [vmem:[#allocation14 + $0xe0] sm:$0xff] }
  0xc3   :  { %2570 = vmatpush3.msra.mxu0 %v799_v11  ;;  %2601 = vmatprep.mubr.msk.f32.mxu0 %vm2863_vm12, %v2862_v21  ;;  %v1691_v11 = vld [vmem:[#allocation14 + $0x60] sm:$0xff] }
  0xc4   :  { %2571 = vmatprep.subr.mxu0 %v2862_v21  ;;  %2413 = vmatpush3.msra.mxu1 %v1694_v62  ;;  %v1696_v62 = vld [vmem:[#allocation14 + $0x88] sm:$0xff] }
  0xc5   :  { %2572 = vmatpush3.msra.mxu0 %v798_v36  ;;  %2414 = vmatprep.subr.mxu1 %v1709_v40  ;;  %v1723_v36 = vld [vmem:[#allocation14 + $0x160] sm:$0xff]  ;;  %v1680_v40 = vld [vmem:[#allocation14 + $0x8] sm:$0xff] }
  0xc6   :  { %2573 = vmatprep.subr.mxu0 %v2862_v21  ;;  %2415 = vmatpush3.msra.mxu1 %v1693_v23  ;;  %v1695_v23 = vld [vmem:[#allocation14 + $0x80] sm:$0xff] }
  0xc7   :  { %2574 = vmatpush3.msra.mxu0 %v797_v39  ;;  %2416 = vmatprep.subr.mxu1 %v1708_v28  ;;  %v1738_v39 = vld [vmem:[#allocation14 + $0x1d8] sm:$0xff]  ;;  %v1679_v28 = vld [vmem:[#allocation14] sm:$0xff] }
  0xc8   :  { %2575 = vmatprep.subr.mxu0 %v2862_v21  ;;  %2417 = vmatpush3.msra.mxu1 %v1692_v37  ;;  %v1774_v37 = vld [vmem:[#allocation14 + $0x2f8] sm:$0xff] }
  0xc9   :  { %2576 = vmatpush3.msra.mxu0 %v796_v42  ;;  %2418 = vmatprep.subr.mxu1 %v1707_v32  ;;  %v1690_v42 = vld [vmem:[#allocation14 + $0x58] sm:$0xff] }
  0xca   :  { %2577 = vmatprep.subr.mxu0 %v2862_v21  ;;  %2419 = vmatpush3.msra.mxu1 %v1691_v11 }
  0xcb   :  { %2578 = vmatpush3.msra.mxu0 %v795_v7  ;;  %2420 = vmatprep.subr.mxu1 %v1706_v3  ;;  %v1705_v7 = vld [vmem:[#allocation14 + $0xd0] sm:$0xff] }
  0xcc   :  { %2579 = vmatprep.subr.mxu0 %v2862_v21  ;;  %v2653_v61 = vpop.eup %2652  ;;  %2421 = vmatpush3.msra.mxu1 %v1690_v42 }
  0xcd   :  { %2580 = vmatpush3.msra.mxu0 %v794_v53  ;;  %v178_v22 = vadd.f32 1.0, %v2653_v61  ;;  %v1737_v53 = vld [vmem:[#allocation14 + $0x1d0] sm:$0xff]  ;;  %2422 = vmatprep.subr.mxu1 %v1705_v7  ;;  %v1703_v61 = vld [vmem:[#allocation14 + $0xc0] sm:$0xff] }
  0xce   :  { %2581 = vmatprep.subr.mxu0 %v2862_v21  ;;  %v3391_v7 = vld [vmem:[#allocation16] sm:$0xff] }
  0xcf   :  { %2582 = vmatpush3.msra.mxu0 %v793_v59  ;;  %v179_v2 = vmul.f32 %v178_v22, %v171_v24  ;;  %v1689_v59 = vld [vmem:[#allocation14 + $0x50] sm:$0xff]  ;;  %v1719_v24 = vld [vmem:[#allocation14 + $0x140] sm:$0xff]  ;;  %v1702_v22 = vld [vmem:[#allocation14 + $0xb8] sm:$0xff] }
  0xd0   :  { %2583 = vmatprep.subr.mxu0 %v2862_v21  ;;  %2423 = vmatpush3.msra.mxu1 %v1689_v59  ;;  %v3396_v59 = vld [vmem:[#allocation16 + $0x8] sm:$0xff] }
  0xd1   :  { %2584 = vmatpush3.msra.mxu0 %v792_v33  ;;  %v1721_v33 = vld [vmem:[#allocation14 + $0x150] sm:$0xff] }
  0xd2   :  { %2585 = vmatprep.subr.mxu0 %v2862_v21 }
  0xd3   :  { %2586 = vmatpush3.msra.mxu0 %v791_v57  ;;  %v1704_v57 = vld [vmem:[#allocation14 + $0xc8] sm:$0xff] }
  0xd4   :  { %2587 = vmatprep.subr.mxu0 %v2862_v21  ;;  %2424 = vmatprep.subr.mxu1 %v1704_v57 }
  0xd5   :  { %2588 = vmatpush3.msra.mxu0 %v790_v14  ;;  %v1736_v14 = vld [vmem:[#allocation14 + $0x1c8] sm:$0xff] }
  0xd6   :  { %2589 = vmatprep.subr.mxu0 %v2862_v21 }
  0xd7   :  { %2590 = vmatpush3.msra.mxu0 %v789_v8  ;;  %v1688_v8 = vld [vmem:[#allocation14 + $0x48] sm:$0xff] }
  0xd8   :  { %2591 = vmatprep.subr.mxu0 %v2862_v21  ;;  %2425 = vmatpush3.msra.mxu1 %v1688_v8 }
  0xd9   :  { %2592 = vmatpush3.msra.mxu0 %v788_v52  ;;  %v1720_v52 = vld [vmem:[#allocation14 + $0x148] sm:$0xff]  ;;  %2426 = vmatprep.subr.mxu1 %v1703_v61 }
  0xda   :  { %2593 = vmatprep.subr.mxu0 %v2862_v21  ;;  %v3408_v61 = vld [vmem:[#allocation17 + $0x8] sm:$0xff] }
  0xdb   :  { %2594 = vmatpush3.msra.mxu0 %v787_v29  ;;  %v1735_v29 = vld [vmem:[#allocation14 + $0x1c0] sm:$0xff] }
  0xdc   :  { %2595 = vmatprep.subr.mxu0 %v2862_v21 }
  0xdd   :  { %2596 = vmatpush3.msra.mxu0 %v786_v55  ;;  %v1687_v55 = vld [vmem:[#allocation14 + $0x40] sm:$0xff] }
  0xde   :  { %2597 = vmatprep.subr.mxu0 %v2862_v21  ;;  %2427 = vmatpush3.msra.mxu1 %v1687_v55 }
  0xdf   :  { %2598 = vmatpush3.msra.mxu0 %v785_v35  ;;  %v1734_v35 = vld [vmem:[#allocation14 + $0x1b8] sm:$0xff]  ;;  %2428 = vmatprep.subr.mxu1 %v1702_v22 }
  0xe0   :  { %2599 = vmatprep.subr.mxu0 %v2862_v21 }
  0xe1   :  { %2600 = vmatpush3.msra.mxu0 %v784_v47  ;;  %v1686_v47 = vld [vmem:[#allocation14 + $0x38] sm:$0xff] }
  0xe2   :  { %2602 = vmatmul.mubr.f32.vlgmr.msra.gmra.mxu0 %v179_v2  ;;  %2447 = vmatprep.subr.mxu0 %v1742_v13  ;;  %v1718_v2 = vld [vmem:[#allocation14 + $0x138] sm:$0xff]  ;;  %v1713_v13 = vld [vmem:[#allocation14 + $0x110] sm:$0xff] }
  0xe3   :  { %2448 = vmatpush3.msra.mxu0 %v1726_v31  ;;  %2429 = vmatpush3.msra.mxu1 %v1686_v47  ;;  %v1728_v31 = vld [vmem:[#allocation14 + $0x188] sm:$0xff]  ;;  %v1327_v47 = vrot.slane %v3391_v7, %v2993_v44 }
  0xe4   :  { %2449 = vmatprep.subr.mxu0 %v1741_v41  ;;  %v1712_v41 = vld [vmem:[#allocation14 + $0x108] sm:$0xff] }
  0xe5   :  { %2450 = vmatpush3.msra.mxu0 %v1725_v27  ;;  %v1727_v27 = vld [vmem:[#allocation14 + $0x180] sm:$0xff] }
  0xe6   :  { %2451 = vmatprep.subr.mxu0 %v1740_v30  ;;  %v1711_v30 = vld [vmem:[#allocation14 + $0x100] sm:$0xff] }
  0xe7   :  { %2452 = vmatpush3.msra.mxu0 %v1724_v19  ;;  %v1806_v19 = vld [vmem:[#allocation14 + $0x3f8] sm:$0xff] }
  0xe8   :  { %2453 = vmatprep.subr.mxu0 %v1739_v18 }
  0xe9   :  { %2454 = vmatpush3.msra.mxu0 %v1723_v36 }
  0xea   :  { %2455 = vmatprep.subr.mxu0 %v1738_v39 }
  0xeb   :  { %2456 = vmatpush3.msra.mxu0 %v1722_v51  ;;  %v3389_v51 = vld [vmem:[%s3925_s9] sm:$0xff] }
  0xec   :  { %2457 = vmatprep.subr.mxu0 %v1737_v53  ;;  %v1181_v53 = vstv %s3923_s7  ;;  %v1207_v57 = vrot.slane %v3389_v51, %v3008_v54  ;;  %v1217_v8 = vrot.slane %v3389_v51, %v2996_v45  ;;  %v1227_v55 = vrot.slane %v3389_v51, %v3002_v49 }
  0xed   :  { %2458 = vmatpush3.msra.mxu0 %v1721_v33  ;;  %v3398_v33 = vld [vmem:[#allocation17] sm:$0xff]  ;;  %v1237_v22 = vrot.slane %v3389_v51, %v3048_v17 }
  0xee   :  { %2459 = vmatprep.subr.mxu0 %v1736_v14  ;;  %v1212_v14 = vrot.slane %v3389_v51, %v2993_v44 }
  0xef   :  { %2460 = vmatpush3.msra.mxu0 %v1720_v52  ;;  %v3406_v52 = vld [vmem:[#allocation16 + $0x10] sm:$0xff] }
  0xf0   :  { %2461 = vmatprep.subr.mxu0 %v1735_v29  ;;  %v1222_v29 = vrot.slane %v3389_v51, %v2999_v48 }
  0xf1   :  { %2462 = vmatpush3.msra.mxu0 %v1719_v24  ;;  %v1232_v24 = vrot.slane %v3389_v51, %v3005_v50 }
  0xf2   :  { %2463 = vmatprep.subr.mxu0 %v1734_v35  ;;  %v3418_v35 = vld [vmem:[#allocation17 + $0x10] sm:$0xff] }
  0xf3   :  { %2464 = vmatpush3.msra.mxu0 %v1718_v2  ;;  %v1340_v2 = vrot.slane %v3391_v7, %v2996_v45 }
 0x15e   :  { %v2322_v1 = vpop.f32.mrf.mxu1 }
 0x160   :  { %v2323_v56 = vpop.f32.mrf.mxu1 }
 0x161   :  { %v2324_v0 = vadd.f32 %v2323_v56, %v2322_v1  ;;  %v1733_v1 = vld [vmem:[#allocation14 + $0x1b0] sm:$0xff]  ;;  %v1700_v56 = vld [vmem:[#allocation14 + $0xa8] sm:$0xff] }
 0x162   :  { %v2287_v5 = vpop.f32.mrf.mxu0  ;;  %2465 = vmatprep.subr.mxu0 %v1733_v1  ;;  %v1242_v1 = vrot.slane %v3389_v51, %v3086_v46 }
 0x164   :  { %v2288_v6 = vpop.f32.mrf.mxu0 }
 0x165   :  { %v2289_v9 = vadd.f32 %v2288_v6, %v2287_v5  ;;  %v1701_v5 = vld [vmem:[#allocation14 + $0xb0] sm:$0xff] }
 0x166   :  { %v1685_v6 = vld [vmem:[#allocation14 + $0x30] sm:$0xff]  ;;  %2430 = vmatprep.subr.mxu1 %v1701_v5  ;;  %v1353_v5 = vrot.slane %v3391_v7, %v2999_v48 }
 0x167   :  { %v937_v4 = vadd.f32 %v2324_v0, %v2289_v9  ;;  %v1716_v9 = vld [vmem:[#allocation14 + $0x128] sm:$0xff]  ;;  %2431 = vmatpush3.msra.mxu1 %v1685_v6  ;;  %v1699_v0 = vld [vmem:[#allocation14 + $0xa0] sm:$0xff]  ;;  %v1333_v6 = vrot.slane %v3398_v33, %v2993_v44 }
 0x168   :  { %2432 = vmatprep.subr.mxu1 %v1700_v56  ;;  %v1359_v56 = vrot.slane %v3398_v33, %v2999_v48 }
 0x180   :  { %v2392_v26 = vpop.f32.mrf.mxu1 }
 0x182   :  { %v2357_v15 = vpop.f32.mrf.mxu0  ;;  %v2393_v58 = vpop.f32.mrf.mxu1 }
 0x183   :  { %v2394_v34 = vadd.f32 %v2393_v58, %v2392_v26  ;;  %v1684_v26 = vld [vmem:[#allocation14 + $0x28] sm:$0xff]  ;;  %v1683_v58 = vld [vmem:[#allocation14 + $0x20] sm:$0xff] }
 0x184   :  { %v2358_v38 = vpop.f32.mrf.mxu0  ;;  %2433 = vmatpush3.msra.mxu1 %v1684_v26  ;;  %v1463_v26 = vrot.slane %v3408_v61, %v2999_v48 }
 0x185   :  { %v2359_v63 = vadd.f32 %v2358_v38, %v2357_v15  ;;  %v1717_v15 = vld [vmem:[#allocation14 + $0x130] sm:$0xff]  ;;  %v1732_v38 = vld [vmem:[#allocation14 + $0x1a8] sm:$0xff]  ;;  %2434 = vmatprep.subr.mxu1 %v1699_v0  ;;  %v1476_v0 = vrot.slane %v3408_v61, %v3002_v49 }
 0x186   :  { %2466 = vmatpush3.msra.mxu0 %v1717_v15  ;;  %2435 = vmatpush3.msra.mxu1 %v1683_v58  ;;  %v1346_v15 = vrot.slane %v3398_v33, %v2996_v45  ;;  %v1580_v58 = vrot.slane %v3418_v35, %v3002_v49 }
 0x187   :  { %v1007_v12 = vadd.f32 %v2359_v63, %v937_v4  ;;  %v1731_v63 = vld [vmem:[#allocation14 + $0x1a0] sm:$0xff]  ;;  %2467 = vmatprep.subr.mxu0 %v1732_v38  ;;  %v1457_v38 = vrot.slane %v3396_v59, %v2999_v48 }
 0x188   :  { %v1715_v4 = vld [vmem:[#allocation14 + $0x120] sm:$0xff]  ;;  %2468 = vmatpush3.msra.mxu0 %v1716_v9  ;;  %v1470_v9 = vrot.slane %v3396_v59, %v3002_v49 }
 0x189   :  { %v1077_v10 = vadd.f32 %v2394_v34, %v1007_v12  ;;  %v1698_v12 = vld [vmem:[#allocation14 + $0x98] sm:$0xff]  ;;  %2469 = vmatprep.subr.mxu0 %v1731_v63  ;;  %v1574_v63 = vrot.slane %v3406_v52, %v3002_v49 }
 0x18a   :  { %v1730_v34 = vld [vmem:[#allocation14 + $0x198] sm:$0xff]  ;;  %2470 = vmatpush3.msra.mxu0 %v1715_v4  ;;  %2436 = vmatprep.subr.mxu1 %v1698_v12  ;;  %v1366_v4 = vrot.slane %v3391_v7, %v3002_v49  ;;  %v1372_v12 = vrot.slane %v3398_v33, %v3002_v49 }
 0x18b   :  { %2471 = vmatprep.subr.mxu0 %v1730_v34  ;;  %v1379_v34 = vrot.slane %v3391_v7, %v3005_v50 }
 0x1a2   :  { %v1146_v43 = vpop.f32.mrf.mxu0 }
 0x1a3   :  { %v3381_v25 = vadd.f32 %v1146_v43, %v1077_v10  ;;  %v1682_v10 = vld [vmem:[#allocation14 + $0x18] sm:$0xff] }
 0x1a4   :  { %v2603_v16 = vpop.f32.mrf.mxu0  ;;  %v1714_v43 = vld [vmem:[#allocation14 + $0x118] sm:$0xff]  ;;  %2437 = vmatpush3.msra.mxu1 %v1682_v10 }
 0x1a5   :  { %1150 = vadd.xlane.f32.xlu0 %v3381_v25  ;;  %v1153_v60 = vmul.f32 %v3381_v25, %v3381_v25  ;;  %v1697_v16 = vld [vmem:[#allocation14 + $0x90] sm:$0xff]  ;;  %2472 = vmatpush3.msra.mxu0 %v1714_v43  ;;  %v1385_v43 = vrot.slane %v3398_v33, %v3005_v50 }
 0x1a6   :  { %2438 = vmatprep.subr.mxu1 %v1697_v16  ;;  %v1483_v16 = vrot.slane %v3396_v59, %v3005_v50 }
 0x1a7   :  { %2439 = vmatpush3.msra.mxu1 %v1681_v20 }
 0x1a8   :  { %2440 = vmatprep.subr.mxu1 %v1696_v62  ;;  %v1496_v62 = vrot.slane %v3396_v59, %v3048_v17 }
 0x1a9   :  { %1154 = vadd.xlane.f32.xlu0 %v1153_v60  ;;  %v1729_v60 = vld [vmem:[#allocation14 + $0x190] sm:$0xff]  ;;  %2441 = vmatpush3.msra.mxu1 %v1680_v40 }
 0x1aa   :  { %2473 = vmatprep.subr.mxu0 %v1729_v60  ;;  %2442 = vmatprep.subr.mxu1 %v1695_v23  ;;  %v1489_v60 = vrot.slane %v3408_v61, %v3005_v50 }
 0x1ab   :  { %2474 = vmatpush3.msra.mxu0 %v1713_v13  ;;  %2443 = vmatpush3.msra.mxu1 %v1679_v28  ;;  %v2239_v13 = vld [vmem:[%s3921_s5] ss:$0 sm:$0xff] }
 0x1ac   :  { %2475 = vmatprep.subr.mxu0 %v1728_v31  ;;  %2482 = vmatprep.subr.mxu1 %v1774_v37  ;;  %v1600_v31 = vrot.slane %v3406_v52, %v3048_v17  ;;  %v2240_v37 = vld [vmem:[%s3922_s6] ss:$0 sm:$0xff] }
 0x1ad   :  { %2476 = vmatpush3.msra.mxu0 %v1712_v41  ;;  %v3473_v41 = vld [vmem:[%s3925_s9 + $0x8] sm:$0xf] }
 0x1ae   :  { %2477 = vmatprep.subr.mxu0 %v1727_v27 }
 0x1af   :  { %2478 = vmatpush3.msra.mxu0 %v1711_v30 }
 0x1b0   :  { %2517 = vmatprep.subr.mxu0 %v1806_v19 }
 0x22e   :  { %v1151_v32 = vpop.xlane.xlu0 %1150 }
 0x22f   :  { %v1152_v18 = vmul.f32 0.015625, %v1151_v32 }
 0x231   :  { %v1157_v36 = vmul.f32 %v1152_v18, %v1152_v18  ;;  %v1159_v10 = vsub.f32 %v3381_v25, %v1152_v18  ;;  %v1502_v25 = vrot.slane %v3408_v61, %v3048_v17 }
 0x232   :  { %v1155_v11 = vpop.xlane.xlu0 %1154 }
 0x233   :  { %v1156_v3 = vmul.f32 0.015625, %v1155_v11 }
 0x235   :  { %v1158_v39 = vsub.f32 %v1156_v3, %v1157_v36 }
 0x237   :  { %v1160_v42 = vadd.f32 1e-05, %v1158_v39  ;;  %v3494_v39 = vld [vmem:[#allocation16 + $0x18] sm:$0x7] }
 0x239   :  { %2654 = vrsqrt.f32 %v1160_v42  ;;  %v3496_v42 = vld [vmem:[#allocation17 + $0x18] sm:$0x7] }
 0x246   :  { %v2655_v20 = vpop.eup %2654 }
 0x247   :  { %v1162_v23 = vmul.f32 %v2655_v20, %v1159_v10 }
 0x249   :  { %v1170_v36 = vmul.f32 %v2239_v13, %v1162_v23 }
 0x24b   :  { %v1178_v3 = vadd.f32 %v2240_v37, %v1170_v36 }
 0x24d   :  { %vm1180_vm13 = vcmp.ge.f32.partialorder %v1178_v3, 0.0  ;;  %v1182_v36 = vmul.f32 %v1181_v53, %v1178_v3 }
 0x24f   :  { %v3540_v32 = vsel %vm1180_vm13, %v1178_v3, %v1182_v36 }
 0x250   :  { %v3552_v13 = vsub.f32 %v3540_v32, %v1207_v57  ;;  %v1213_v3 = vsub.f32 %v3540_v32, %v1212_v14  ;;  %v3562_v36 = vsub.f32 %v3540_v32, %v1217_v8  ;;  %v3568_v11 = vsub.f32 %v3540_v32, %v1222_v29 }
 0x251   :  { %v3574_v57 = vsub.f32 %v3540_v32, %v1227_v55  ;;  %v3580_v14 = vsub.f32 %v3540_v32, %v1232_v24  ;;  %v3586_v8 = vsub.f32 %v3540_v32, %v1237_v22  ;;  %v3592_v29 = vsub.f32 %v3540_v32, %v1242_v1 }
 0x252   :  { %vm1264_vm14 = vcmp.ge.f32.partialorder %v3552_v13, 0.0  ;;  %vm1267_vm15 = vcmp.ge.f32.partialorder %v1213_v3, 0.0  ;;  %vm1271_vm0 = vcmp.ge.f32.partialorder %v3562_v36, 0.0  ;;  %vm1275_vm1 = vcmp.ge.f32.partialorder %v3568_v11, 0.0 }
 0x253   :  { %v3598_v55 = vsel %vm1264_vm14, 1.0, %v2862_v21  ;;  %v3601_v24 = vsel %vm1267_vm15, 1.0, %v2862_v21  ;;  %v2243_v22 = vsel %vm1271_vm0, 1.0, %v2862_v21  ;;  %v2244_v51 = vsel %vm1275_vm1, 1.0, %v2862_v21 }
 0x254   :  { %v3608_v18 = vsub.f32 %v3601_v24, %v2243_v22  ;;  %v1278_v53 = vsub.f32 %v2243_v22, %v2244_v51  ;;  %vm1279_vm2 = vcmp.ge.f32.partialorder %v3574_v57, 0.0  ;;  %vm1283_vm3 = vcmp.ge.f32.partialorder %v3580_v14, 0.0 }
 0x255   :  { %v2245_v10 = vsel %vm1279_vm2, 1.0, %v2862_v21  ;;  %v1328_v37 = vmul.f32 %v1327_v47, %v1213_v3  ;;  %v1334_v20 = vmul.f32 %v1333_v6, %v3568_v11  ;;  %v2246_v1 = vsel %vm1283_vm3, 1.0, %v2862_v21 }
 0x256   :  { %v1282_v23 = vsub.f32 %v2244_v51, %v2245_v10  ;;  %v1341_v22 = vmul.f32 %v1340_v2, %v3562_v36  ;;  %v1347_v19 = vmul.f32 %v1346_v15, %v3574_v57  ;;  %v1286_v30 = vsub.f32 %v2245_v10, %v2246_v1 }
 0x257   :  { %v1329_v47 = vmul.f32 %v1328_v37, %v3608_v18  ;;  %v1335_v28 = vmul.f32 %v1334_v20, %v1278_v53  ;;  %v1354_v6 = vmul.f32 %v1353_v5, %v3568_v11  ;;  %v1360_v2 = vmul.f32 %v1359_v56, %v3580_v14 }
 0x258   :  { %v1342_v51 = vmul.f32 %v1341_v22, %v1278_v53  ;;  %v1348_v27 = vmul.f32 %v1347_v19, %v1282_v23  ;;  %v1458_v15 = vmul.f32 %v1457_v38, %v1213_v3  ;;  %v1464_v20 = vmul.f32 %v1463_v26, %v3574_v57 }
 0x259   :  { %v1336_v10 = vadd.f32 %v1335_v28, %v1329_v47  ;;  %v1355_v40 = vmul.f32 %v1354_v6, %v1282_v23  ;;  %v1471_v5 = vmul.f32 %v1470_v9, %v3562_v36  ;;  %v1361_v37 = vmul.f32 %v1360_v2, %v1286_v30 }
 0x25a   :  { %v1349_v19 = vadd.f32 %v1348_v27, %v1342_v51  ;;  %v1477_v56 = vmul.f32 %v1476_v0, %v3580_v14  ;;  %v1575_v38 = vmul.f32 %v1574_v63, %v1213_v3  ;;  %v1581_v26 = vmul.f32 %v1580_v58, %v3580_v14 }
 0x25b   :  { %v1459_v28 = vmul.f32 %v1458_v15, %v1336_v10  ;;  %vm1287_vm4 = vcmp.ge.f32.partialorder %v3586_v8, 0.0  ;;  %vm1291_vm5 = vcmp.ge.f32.partialorder %v3592_v29, 0.0  ;;  %v1362_v9 = vadd.f32 %v1361_v37, %v1355_v40 }
 0x25c   :  { %v1465_v27 = vmul.f32 %v1464_v20, %v1349_v19  ;;  %v1472_v23 = vmul.f32 %v1471_v5, %v1349_v19  ;;  %v2247_v53 = vsel %vm1287_vm4, 1.0, %v2862_v21  ;;  %v2248_v22 = vsel %vm1291_vm5, 1.0, %v2862_v21 }
 0x25d   :  { %v1290_v0 = vsub.f32 %v2246_v1, %v2247_v53  ;;  %v1367_v63 = vmul.f32 %v1366_v4, %v3574_v57  ;;  %v1373_v58 = vmul.f32 %v1372_v12, %v3586_v8  ;;  %v1478_v47 = vmul.f32 %v1477_v56, %v1362_v9 }
 0x25e   :  { %v1466_v3 = vadd.f32 %v1465_v27, %v1459_v28  ;;  %v1294_v40 = vsub.f32 %v2247_v53, %v2248_v22  ;;  %v1380_v1 = vmul.f32 %v1379_v34, %v3580_v14  ;;  %v1386_v4 = vmul.f32 %v1385_v43, %v3592_v29 }
 0x25f   :  { %v1368_v6 = vmul.f32 %v1367_v63, %v1286_v30  ;;  %v1374_v51 = vmul.f32 %v1373_v58, %v1290_v0  ;;  %v1484_v49 = vmul.f32 %v1483_v16, %v3568_v11  ;;  %v1479_v12 = vadd.f32 %v1478_v47, %v1472_v23 }
 0x260   :  { %v1576_v2 = vmul.f32 %v1575_v38, %v1466_v3  ;;  %v1381_v15 = vmul.f32 %v1380_v1, %v1290_v0  ;;  %v1490_v34 = vmul.f32 %v1489_v60, %v3586_v8  ;;  %v1387_v20 = vmul.f32 %v1386_v4, %v1294_v40 }
 0x261   :  { %v1375_v30 = vadd.f32 %v1374_v51, %v1368_v6  ;;  %v1485_v5 = vmul.f32 %v1484_v49, %v1362_v9  ;;  %v1497_v43 = vmul.f32 %v1496_v62, %v3574_v57  ;;  %v1582_v19 = vmul.f32 %v1581_v26, %v1479_v12 }
 0x262   :  { %v1503_v16 = vmul.f32 %v1502_v25, %v3592_v29  ;;  %v1601_v37 = vmul.f32 %v1600_v31, %v3568_v11  ;;  %v3932_v60 = vrot.slane %v3418_v35, %v3048_v17  ;;  %v1388_v38 = vadd.f32 %v1387_v20, %v1381_v15 }
 0x263   :  { %v1491_v28 = vmul.f32 %v1490_v34, %v1375_v30  ;;  %v1498_v9 = vmul.f32 %v1497_v43, %v1375_v30  ;;  %v3933_v62 = vrot.slane %v3391_v7, %v3008_v54  ;;  %v1583_v27 = vadd.f32 %v1582_v19, %v1576_v2 }
 0x264   :  { %v1607_v56 = vmul.f32 %v3932_v60, %v3592_v29  ;;  %v3934_v25 = vrot.slane %v3398_v33, %v3008_v54  ;;  %v3935_v31 = vrot.slane %v3396_v59, %v2996_v45  ;;  %v3936_v0 = vrot.slane %v3408_v61, %v2996_v45 }
 0x265   :  { %v1315_v26 = vmul.f32 %v3933_v62, %v3552_v13  ;;  %v1492_v58 = vadd.f32 %v1491_v28, %v1485_v5  ;;  %v1504_v47 = vmul.f32 %v1503_v16, %v1388_v38  ;;  %v3937_v1 = vsub.f32 %v3598_v55, %v3601_v24  ;;  %1887 = vmatprep.mubr.f32.mxu1 %v1583_v27 }
 0x266   :  { %v1321_v23 = vmul.f32 %v3934_v25, %v3562_v36  ;;  %v1445_v53 = vmul.f32 %v3935_v31, %v3552_v13  ;;  %v1451_v63 = vmul.f32 %v3936_v0, %v3568_v11  ;;  %v3938_v51 = vrot.slane %v3406_v52, %v2999_v48  ;;  %v1790_v31 = vld [vmem:[#allocation14 + $0x378] sm:$0xff] }
 0x267   :  { %v1316_v6 = vmul.f32 %v1315_v26, %v3937_v1  ;;  %v3939_v15 = vrot.slane %v3418_v35, %v2999_v48  ;;  %v3940_v34 = vrot.slane %v3406_v52, %v3005_v50  ;;  %v3736_v24 = vadd.f32 %v1504_v47, %v1498_v9 }
 0x268   :  { %v1562_v4 = vmul.f32 %v3938_v51, %v3552_v13  ;;  %v1322_v49 = vmul.f32 %v1321_v23, %v3608_v18  ;;  %v1452_v2 = vmul.f32 %v1451_v63, %v1336_v10  ;;  %v1602_v30 = vmul.f32 %v1601_v37, %v1492_v58  ;;  %v1805_v51 = vld [vmem:[#allocation14 + $0x3f0] sm:$0xff] }
 0x269   :  { %v1568_v11 = vmul.f32 %v3939_v15, %v3574_v57  ;;  %v1588_v55 = vmul.f32 %v3940_v34, %v3562_v36  ;;  %v3941_v13 = vrot.slane %v3418_v35, %v3005_v50  ;;  %v3942_v18 = vrot.slane %v3473_v41, %v3008_v54  ;;  %v1789_v34 = vld [vmem:[#allocation14 + $0x370] sm:$0xff] }
 0x26a   :  { %v1323_v5 = vadd.f32 %v1322_v49, %v1316_v6  ;;  %v3943_v36 = vrot.slane %v3473_v41, %v2993_v44  ;;  %v1608_v37 = vmul.f32 %v1607_v56, %v3736_v24  ;;  %v3944_v50 = vrot.slane %v3391_v7, %v3048_v17 }
 0x26b   :  { %v1594_v20 = vmul.f32 %v3941_v13, %v3586_v8  ;;  %v3746_v10 = vsub.f32 %v3540_v32, %v3942_v18  ;;  %v1569_v43 = vmul.f32 %v1568_v11, %v1466_v3  ;;  %v1589_v19 = vmul.f32 %v1588_v55, %v1479_v12  ;;  %v1804_v18 = vld [vmem:[#allocation14 + $0x3e8] sm:$0xff] }
 0x26c   :  { %v3752_v16 = vsub.f32 %v3540_v32, %v3943_v36  ;;  %v1393_v28 = vmul.f32 %v3944_v50, %v3586_v8  ;;  %v1446_v9 = vmul.f32 %v1445_v53, %v1323_v5  ;;  %v3945_v12 = vrot.slane %v3398_v33, %v3048_v17 }
 0x26d   :  { %v1595_v60 = vmul.f32 %v1594_v20, %v1492_v58  ;;  %vm1295_vm6 = vcmp.ge.f32.partialorder %v3746_v10, 0.0  ;;  %v1609_v26 = vadd.f32 %v1608_v37, %v1602_v30  ;;  %v3946_v53 = vrot.slane %v3391_v7, %v3086_v46 }
 0x26e   :  { %v2249_v3 = vsel %vm1295_vm6, 1.0, %v2862_v21  ;;  %vm1299_vm7 = vcmp.ge.f32.partialorder %v3752_v16, 0.0  ;;  %v1399_v62 = vmul.f32 %v3945_v12, %v3746_v10  ;;  %v1453_v23 = vadd.f32 %v1452_v2, %v1446_v9  ;;  %v1773_v9 = vld [vmem:[#allocation14 + $0x2f0] sm:$0xff] }
 0x26f   :  { %v1596_v56 = vadd.f32 %v1595_v60, %v1589_v19  ;;  %v1298_v27 = vsub.f32 %v2248_v22, %v2249_v3  ;;  %v2250_v25 = vsel %vm1299_vm7, 1.0, %v2862_v21  ;;  %v1394_v63 = vmul.f32 %v1393_v28, %v1294_v40  ;;  %1957 = vmatprep.mubr.f32.mxu0 %v1609_v26  ;;  %v1758_v19 = vld [vmem:[#allocation14 + $0x278] sm:$0xff] }
 0x270   :  { %v1302_v0 = vsub.f32 %v2249_v3, %v2250_v25  ;;  %v1406_v58 = vmul.f32 %v3946_v53, %v3592_v29  ;;  %v3947_v17 = vrot.slane %v3398_v33, %v3086_v46  ;;  %v3948_v22 = vrot.slane %v3396_v59, %v3086_v46 }
 0x271   :  { %v1400_v47 = vmul.f32 %v1399_v62, %v1298_v27  ;;  %v1652_v40 = vrot.slane %v3494_v39, %v2996_v45  ;;  %v1563_v49 = vmul.f32 %v1562_v4, %v1453_v23  ;;  %1958 = vmatmul.mubr.f32.vlgmr.msra.gmra.mxu0 %v1596_v56  ;;  %v3949_v2 = vrot.slane %v3408_v61, %v3086_v46  ;;  %v1757_v23 = vld [vmem:[#allocation14 + $0x270] sm:$0xff] }
 0x272   :  { %v1412_v1 = vmul.f32 %v3947_v17, %v3752_v16  ;;  %v1510_v6 = vmul.f32 %v3948_v22, %v3580_v14  ;;  %v1407_v7 = vmul.f32 %v1406_v58, %v1298_v27  ;;  %v3950_v33 = vrot.slane %v3406_v52, %v3008_v54  ;;  %2518 = vmatpush3.msra.mxu0 %v1790_v31 }
 0x273   :  { %v1516_v15 = vmul.f32 %v3949_v2, %v3746_v10  ;;  %v1401_v55 = vadd.f32 %v1400_v47, %v1394_v63  ;;  %v3951_v4 = vrot.slane %v3418_v35, %v3008_v54  ;;  %v1570_v5 = vadd.f32 %v1569_v43, %v1563_v49  ;;  %2519 = vmatprep.subr.mxu0 %v1805_v51  ;;  %v1788_v43 = vld [vmem:[#allocation14 + $0x368] sm:$0xff] }
 0x274   :  { %v1523_v11 = vmul.f32 %v3950_v33, %v3586_v8  ;;  %v1413_v30 = vmul.f32 %v1412_v1, %v1302_v0  ;;  %v1511_v13 = vmul.f32 %v1510_v6, %v1388_v38  ;;  %v3952_v36 = vrot.slane %v3494_v39, %v3008_v54  ;;  %2520 = vmatpush3.msra.mxu0 %v1789_v34  ;;  %v1772_v47 = vld [vmem:[#allocation14 + $0x2e8] sm:$0xff]  ;;  %v1771_v33 = vld [vmem:[#allocation14 + $0x2e0] sm:$0xff] }
 0x275   :  { %v1529_v20 = vmul.f32 %v3951_v4, %v3752_v16  ;;  %v3953_v60 = vrot.slane %v3473_v41, %v2996_v45  ;;  %v3954_v38 = vrot.slane %v3473_v41, %v2999_v48  ;;  %v1517_v12 = vmul.f32 %v1516_v15, %v1401_v55  ;;  %1888 = vmatmul.mubr.f32.vlgmr.msra.gmra.mxu1 %v1570_v5  ;;  %v1756_v51 = vld [vmem:[#allocation14 + $0x268] sm:$0xff]  ;;  %v1787_v4 = vld [vmem:[#allocation14 + $0x360] sm:$0xff] }
 0x276   :  { %v1627_v37 = vmul.f32 %v3952_v36, %v3580_v14  ;;  %v1414_v3 = vadd.f32 %v1413_v30, %v1407_v7  ;;  %v1524_v62 = vmul.f32 %v1523_v11, %v1401_v55  ;;  %v3955_v14 = vrot.slane %v3396_v59, %v3008_v54  ;;  %2521 = vmatprep.subr.mxu0 %v1804_v18  ;;  %v1803_v11 = vld [vmem:[#allocation14 + $0x3e0] sm:$0xff]  ;;  %v1770_v36 = vld [vmem:[#allocation14 + $0x2d8] sm:$0xff] }
 0x277   :  { %v3801_v50 = vsub.f32 %v3540_v32, %v3953_v60  ;;  %v3807_v28 = vsub.f32 %v3540_v32, %v3954_v38  ;;  %v3956_v48 = vrot.slane %v3408_v61, %v3008_v54  ;;  %v3957_v56 = vrot.slane %v3396_v59, %v2993_v44  ;;  %2483 = vmatpush3.msra.mxu1 %v1758_v19 }
 0x278   :  { %v1419_v26 = vmul.f32 %v3955_v14, %v3746_v10  ;;  %v3823_v31 = vadd.f32 %v1517_v12, %v1511_v13  ;;  %v1530_v63 = vmul.f32 %v1529_v20, %v1414_v3  ;;  %2522 = vmatpush3.msra.mxu0 %v1788_v43  ;;  %2484 = vmatprep.subr.mxu1 %v1773_v9  ;;  %v1755_v13 = vld [vmem:[#allocation14 + $0x260] sm:$0xff]  ;;  %v1769_v14 = vld [vmem:[#allocation14 + $0x2d0] sm:$0xff] }
 0x279   :  { %vm1303_vm8 = vcmp.ge.f32.partialorder %v3801_v50, 0.0  ;;  %vm1307_vm9 = vcmp.ge.f32.partialorder %v3807_v28, 0.0  ;;  %v1425_v41 = vmul.f32 %v3956_v48, %v3801_v50  ;;  %v1432_v27 = vmul.f32 %v3957_v56, %v3752_v16  ;;  %2485 = vmatpush3.msra.mxu1 %v1757_v23  ;;  %2523 = vmatprep.subr.mxu0 %v1803_v11  ;;  %v1801_v56 = vld [vmem:[#allocation14 + $0x3d0] sm:$0xff] }
 0x27a   :  { %v2251_v53 = vsel %vm1303_vm8, 1.0, %v2862_v21  ;;  %v2252_v58 = vsel %vm1307_vm9, 1.0, %v2862_v21  ;;  %v1420_v22 = vmul.f32 %v1419_v26, %v1302_v0  ;;  %v3958_v59 = vrot.slane %v3408_v61, %v2993_v44  ;;  %2486 = vmatprep.subr.mxu1 %v1772_v47  ;;  %2524 = vmatpush3.msra.mxu0 %v1787_v4  ;;  %v1797_v11 = vld [vmem:[#allocation14 + $0x3b0] sm:$0xff]  ;;  %v1780_v4 = vld [vmem:[#allocation14 + $0x328] sm:$0xff] }
 0x27b   :  { %v1306_v17 = vsub.f32 %v2250_v25, %v2251_v53  ;;  %v1310_v1 = vsub.f32 %v2251_v53, %v2252_v58  ;;  %v3831_v49 = vadd.f32 %v1530_v63, %v1524_v62  ;;  %v1628_v7 = vmul.f32 %v1627_v37, %v3823_v31  ;;  %2487 = vmatpush3.msra.mxu1 %v1756_v51  ;;  %v1802_v37 = vld [vmem:[#allocation14 + $0x3d8] sm:$0xff]  ;;  %v1785_v63 = vld [vmem:[#allocation14 + $0x350] sm:$0xff]  ;;  %v1768_v53 = vld [vmem:[#allocation14 + $0x2c8] sm:$0xff] }
 0x27c   :  { %v1438_v6 = vmul.f32 %v3958_v59, %v3807_v28  ;;  %v3959_v2 = vrot.slane %v3496_v42, %v3008_v54  ;;  %v3960_v25 = vrot.slane %v3406_v52, %v2993_v44  ;;  %v1658_v30 = vrot.slane %v3496_v42, %v2996_v45  ;;  %2488 = vmatprep.subr.mxu1 %v1771_v33  ;;  %v1786_v62 = vld [vmem:[#allocation14 + $0x358] sm:$0xff]  ;;  %v1784_v59 = vld [vmem:[#allocation14 + $0x348] sm:$0xff]  ;;  %v1765_v33 = vld [vmem:[#allocation14 + $0x2b0] sm:$0xff] }
 0x27d   :  { %v1426_v61 = vmul.f32 %v1425_v41, %v1306_v17  ;;  %v1433_v34 = vmul.f32 %v1432_v27, %v1306_v17  ;;  %v3961_v20 = vrot.slane %v3418_v35, %v2993_v44  ;;  %v3962_v5 = vrot.slane %v3406_v52, %v2996_v45  ;;  %2489 = vmatpush3.msra.mxu1 %v1755_v13  ;;  %v1753_v27 = vld [vmem:[#allocation14 + $0x250] sm:$0xff]  ;;  %v1748_v13 = vld [vmem:[#allocation14 + $0x228] sm:$0xff] }
 0x27e   :  { %v1633_v15 = vmul.f32 %v3959_v2, %v3752_v16  ;;  %v1536_v0 = vmul.f32 %v3960_v25, %v3592_v29  ;;  %v1439_v55 = vmul.f32 %v1438_v6, %v1310_v1  ;;  %v3963_v43 = vrot.slane %v3418_v35, %v2996_v45  ;;  %2490 = vmatprep.subr.mxu1 %v1770_v36  ;;  %v1800_v1 = vld [vmem:[#allocation14 + $0x3c8] sm:$0xff]  ;;  %v1767_v6 = vld [vmem:[#allocation14 + $0x2c0] sm:$0xff]  ;;  %v1750_v25 = vld [vmem:[#allocation14 + $0x238] sm:$0xff] }
 0x27f   :  { %v1542_v18 = vmul.f32 %v3961_v20, %v3801_v50  ;;  %v1549_v19 = vmul.f32 %v3962_v5, %v3746_v10  ;;  %v1427_v60 = vadd.f32 %v1426_v61, %v1420_v22  ;;  %2525 = vmatprep.subr.mxu0 %v1802_v37  ;;  %v1653_v23 = vmul.f32 %v1652_v40, %v3592_v29  ;;  %v1752_v22 = vld [vmem:[#allocation14 + $0x248] sm:$0xff]  ;;  %v1799_v29 = vld [vmem:[#allocation14 + $0x3c0] sm:$0xff]  ;;  %v1749_v61 = vld [vmem:[#allocation14 + $0x230] sm:$0xff] }
 0x280   :  { %v1634_v54 = vmul.f32 %v1633_v15, %v3831_v49  ;;  %v1537_v16 = vmul.f32 %v1536_v0, %v1414_v3  ;;  %v1440_v38 = vadd.f32 %v1439_v55, %v1433_v34  ;;  %v1555_v9 = vmul.f32 %v3963_v43, %v3807_v28  ;;  %v1754_v3 = vld [vmem:[#allocation14 + $0x258] sm:$0xff]  ;;  %2526 = vmatpush3.msra.mxu0 %v1786_v62  ;;  %v1751_v40 = vld [vmem:[#allocation14 + $0x240] sm:$0xff]  ;;  %v1781_v34 = vld [vmem:[#allocation14 + $0x330] sm:$0xff] }
 0x281   :  { %v1543_v26 = vmul.f32 %v1542_v18, %v1427_v60  ;;  %v1550_v48 = vmul.f32 %v1549_v19, %v1427_v60  ;;  %2491 = vmatpush3.msra.mxu1 %v1754_v3  ;;  %v1659_v17 = vmul.f32 %v1658_v30, %v3807_v28  ;;  %2527 = vmatprep.subr.mxu0 %v1801_v56  ;;  %v1766_v28 = vld [vmem:[#allocation14 + $0x2b8] sm:$0xff]  ;;  %v1764_v55 = vld [vmem:[#allocation14 + $0x2a8] sm:$0xff]  ;;  %v1747_v18 = vld [vmem:[#allocation14 + $0x220] sm:$0xff] }
 0x282   :  { %v1635_v12 = vadd.f32 %v1634_v54, %v1628_v7  ;;  %v1556_v41 = vmul.f32 %v1555_v9, %v1440_v38  ;;  %2492 = vmatprep.subr.mxu1 %v1769_v14  ;;  %2528 = vmatpush3.msra.mxu0 %v1785_v63  ;;  %v1783_v7 = vld [vmem:[#allocation14 + $0x340] sm:$0xff]  ;;  %v1798_v15 = vld [vmem:[#allocation14 + $0x3b8] sm:$0xff]  ;;  %v1796_v30 = vld [vmem:[#allocation14 + $0x3a8] sm:$0xff]  ;;  %v1613_v20 = vrot.slane %v3406_v52, %v3086_v46 }
 0x283   :  { %v3861_v58 = vadd.f32 %v1543_v26, %v1537_v16  ;;  %2493 = vmatpush3.msra.mxu1 %v1753_v27  ;;  %2529 = vmatprep.subr.mxu0 %v1800_v1  ;;  %v1782_v0 = vld [vmem:[#allocation14 + $0x338] sm:$0xff]  ;;  %v1763_v54 = vld [vmem:[#allocation14 + $0x2a0] sm:$0xff]  ;;  %v1619_v19 = vrot.slane %v3418_v35, %v3086_v46  ;;  %v1639_v36 = vrot.slane %v3494_v39, %v2993_v44  ;;  %v1761_v9 = vld [vmem:[#allocation14 + $0x290] sm:$0xff] }
 0x284   :  { %2027 = vmatprep.mubr.f32.mxu1 %v1635_v12  ;;  %v1557_v47 = vadd.f32 %v1556_v41, %v1550_v48  ;;  %2494 = vmatprep.subr.mxu1 %v1768_v53  ;;  %v1795_v16 = vld [vmem:[#allocation14 + $0x3a0] sm:$0xff]  ;;  %v1645_v37 = vrot.slane %v3496_v42, %v2993_v44  ;;  %v1762_v60 = vld [vmem:[#allocation14 + $0x298] sm:$0xff]  ;;  %v1793_v3 = vld [vmem:[#allocation14 + $0x390] sm:$0xff]  ;;  %v1614_v46 = vmul.f32 %v1613_v20, %v3574_v57 }
 0x285   :  { %v1654_v51 = vmul.f32 %v1653_v23, %v3861_v58  ;;  %2495 = vmatpush3.msra.mxu1 %v1752_v22  ;;  %2530 = vmatpush3.msra.mxu0 %v1784_v59  ;;  %v1779_v5 = vld [vmem:[#allocation14 + $0x320] sm:$0xff]  ;;  %v1794_v38 = vld [vmem:[#allocation14 + $0x398] sm:$0xff]  ;;  %v1195_v35 = vmul.f32 %v3540_v32, %v3540_v32  ;;  %v1745_v44 = vld [vmem:[#allocation14 + $0x210] sm:$0xff]  ;;  %v1620_v42 = vmul.f32 %v1619_v19, %v3746_v10 }
 0x286   :  { %v1660_v45 = vmul.f32 %v1659_v17, %v1557_v47  ;;  %2496 = vmatprep.subr.mxu1 %v1767_v6  ;;  %2531 = vmatprep.subr.mxu0 %v1799_v29  ;;  %v1746_v52 = vld [vmem:[#allocation14 + $0x218] sm:$0xff]  ;;  %v1777_v39 = vld [vmem:[#allocation14 + $0x310] sm:$0xff]  ;;  %v1640_v12 = vmul.f32 %v1639_v36, %v3586_v8  ;;  %v1646_v62 = vmul.f32 %v1645_v37, %v3801_v50  ;;  %v1760_v14 = vld [vmem:[#allocation14 + $0x288] sm:$0xff] }
 0x287   :  { %2497 = vmatpush3.msra.mxu1 %v1751_v40  ;;  %2532 = vmatpush3.msra.mxu0 %v1783_v7  ;;  %v1778_v43 = vld [vmem:[#allocation14 + $0x318] sm:$0xff]  ;;  %v1792_v26 = vld [vmem:[#allocation14 + $0x388] sm:$0xff]  ;;  %v1615_v48 = vmul.f32 %v1614_v46, %v3736_v24  ;;  %v1621_v56 = vmul.f32 %v1620_v42, %v3823_v31  ;;  %v1759_v8 = vld [vmem:[#allocation14 + $0x280] sm:$0xff]  ;;  %v1196_v23 = vmul.f32 %v1195_v35, %v3540_v32 }
 0x288   :  { %v1661_v2 = vadd.f32 %v1660_v45, %v1654_v51  ;;  %2498 = vmatprep.subr.mxu1 %v1766_v28  ;;  %2533 = vmatprep.subr.mxu0 %v1798_v15  ;;  %v1744_v57 = vld [vmem:[#allocation14 + $0x208] sm:$0xff]  ;;  %v1641_v27 = vmul.f32 %v1640_v12, %v3831_v49  ;;  %v1647_v10 = vmul.f32 %v1646_v62, %v3861_v58  ;;  %v1791_v50 = vld [vmem:[#allocation14 + $0x380] sm:$0xff]  ;;  %v1822_v49 = vld [vmem:[#allocation14 + $0x478] sm:$0xff] }
 0x289   :  { %2499 = vmatpush3.msra.mxu1 %v1750_v25  ;;  %2534 = vmatpush3.msra.mxu0 %v1782_v0  ;;  %v1776_v41 = vld [vmem:[#allocation14 + $0x308] sm:$0xff]  ;;  %v1743_v63 = vld [vmem:[#allocation14 + $0x200] sm:$0xff]  ;;  %v1622_v53 = vadd.f32 %v1621_v56, %v1615_v48  ;;  %v1197_v58 = vmul.f32 0.044715, %v1196_v23  ;;  %v1821_v47 = vld [vmem:[#allocation14 + $0x470] sm:$0xff] }
 0x28a   :  { %2097 = vmatprep.mubr.f32.mxu0 %v1661_v2  ;;  %2500 = vmatprep.subr.mxu1 %v1765_v33  ;;  %v1775_v24 = vld [vmem:[#allocation14 + $0x300] sm:$0xff]  ;;  %v1648_v31 = vadd.f32 %v1647_v10, %v1641_v27  ;;  %v1820_v17 = vld [vmem:[#allocation14 + $0x468] sm:$0xff]  ;;  %v1818_v59 = vld [vmem:[#allocation14 + $0x458] sm:$0xff]  ;;  %v2204_v27 = vstv %s3930_s14 }
 0x28b   :  { %2535 = vmatprep.subr.mxu0 %v1797_v11  ;;  %2501 = vmatpush3.msra.mxu1 %v1749_v61  ;;  %v1198_v1 = vadd.f32 %v1197_v58, %v3540_v32  ;;  %v1819_v22 = vld [vmem:[#allocation14 + $0x460] sm:$0xff]  ;;  %v1817_v51 = vld [vmem:[#allocation14 + $0x450] sm:$0xff]  ;;  %v1816_v45 = vld [vmem:[#allocation14 + $0x448] sm:$0xff] }
 0x28c   :  { %2536 = vmatpush3.msra.mxu0 %v1781_v34  ;;  %2502 = vmatprep.subr.mxu1 %v1764_v55  ;;  %v1815_v29 = vld [vmem:[#allocation14 + $0x440] sm:$0xff]  ;;  %v1814_v40 = vld [vmem:[#allocation14 + $0x438] sm:$0xff]  ;;  %v1813_v7 = vld [vmem:[#allocation14 + $0x430] sm:$0xff]  ;;  %v1194_v34 = vmul.f32 0.5, %v3540_v32 }
 0x28d   :  { %2537 = vmatprep.subr.mxu0 %v1796_v30  ;;  %2503 = vmatpush3.msra.mxu1 %v1748_v13  ;;  %v1199_v6 = vmul.f32 0.7978846, %v1198_v1  ;;  %v1812_v2 = vld [vmem:[#allocation14 + $0x428] sm:$0xff]  ;;  %v1811_v28 = vld [vmem:[#allocation14 + $0x420] sm:$0xff]  ;;  %v1810_v15 = vld [vmem:[#allocation14 + $0x418] sm:$0xff] }
 0x28e   :  { %2538 = vmatpush3.msra.mxu0 %v1780_v4  ;;  %2504 = vmatprep.subr.mxu1 %v1763_v54  ;;  %v1809_v0 = vld [vmem:[#allocation14 + $0x410] sm:$0xff]  ;;  %v1808_v33 = vld [vmem:[#allocation14 + $0x408] sm:$0xff]  ;;  %v1807_v61 = vld [vmem:[#allocation14 + $0x400] sm:$0xff] }
 0x28f   :  { %2539 = vmatprep.subr.mxu0 %v1795_v16  ;;  %2505 = vmatpush3.msra.mxu1 %v1747_v18  ;;  %2656 = vtanh.f32 %v1199_v6  ;;  %v2253_v48 = vld [vmem:[%s3928_s12] ss:$0 sm:$0xff] }
 0x290   :  { %2540 = vmatpush3.msra.mxu0 %v1779_v5  ;;  %2506 = vmatprep.subr.mxu1 %v1762_v60 }
 0x291   :  { %2541 = vmatprep.subr.mxu0 %v1794_v38  ;;  %2507 = vmatpush3.msra.mxu1 %v1746_v52 }
 0x292   :  { %2542 = vmatpush3.msra.mxu0 %v1778_v43  ;;  %2508 = vmatprep.subr.mxu1 %v1761_v9 }
 0x293   :  { %2543 = vmatprep.subr.mxu0 %v1793_v3  ;;  %2509 = vmatpush3.msra.mxu1 %v1745_v44 }
 0x294   :  { %2544 = vmatpush3.msra.mxu0 %v1777_v39  ;;  %2510 = vmatprep.subr.mxu1 %v1760_v14 }
 0x295   :  { %2545 = vmatprep.subr.mxu0 %v1792_v26  ;;  %2511 = vmatpush3.msra.mxu1 %v1744_v57 }
 0x296   :  { %2546 = vmatpush3.msra.mxu0 %v1776_v41  ;;  %2512 = vmatprep.subr.mxu1 %v1759_v8  ;;  %v2254_v41 = vld [vmem:[%s3929_s13] ss:$0 sm:$0xff] }
 0x297   :  { %2547 = vmatprep.subr.mxu0 %v1791_v50  ;;  %2513 = vmatpush3.msra.mxu1 %v1743_v63 }
 0x298   :  { %2548 = vmatpush3.msra.mxu0 %v1775_v24  ;;  %2028 = vmatmul.mubr.f32.vlgmr.msra.gmra.mxu1 %v1622_v53 }
 0x299   :  { %2098 = vmatmul.mubr.f32.vlgmr.msra.gmra.mxu0 %v1648_v31  ;;  %2604 = vmatprep.subr.mxu1 %v2862_v21 }
 0x29a   :  { %2636 = vmatprep.mubr.msk.f32.mxu1 %vm2863_vm12, %v2862_v21  ;;  %2605 = vmatpush3.msra.mxu1 %v1822_v49 }
 0x29b   :  { %2606 = vmatprep.subr.mxu1 %v2862_v21 }
 0x29c   :  { %2607 = vmatpush3.msra.mxu1 %v1821_v47  ;;  %v2657_v25 = vpop.eup %2656 }
 0x29d   :  { %2608 = vmatprep.subr.mxu1 %v2862_v21  ;;  %v1201_v11 = vadd.f32 1.0, %v2657_v25 }
 0x29e   :  { %2609 = vmatpush3.msra.mxu1 %v1820_v17 }
 0x29f   :  { %2610 = vmatprep.subr.mxu1 %v2862_v21  ;;  %v1202_v55 = vmul.f32 %v1201_v11, %v1194_v34 }
 0x2a0   :  { %2611 = vmatpush3.msra.mxu1 %v1819_v22 }
 0x2a1   :  { %2612 = vmatprep.subr.mxu1 %v2862_v21 }
 0x2a2   :  { %2613 = vmatpush3.msra.mxu1 %v1818_v59 }
 0x2a3   :  { %2614 = vmatprep.subr.mxu1 %v2862_v21 }
 0x2a4   :  { %2615 = vmatpush3.msra.mxu1 %v1817_v51 }
 0x2a5   :  { %2616 = vmatprep.subr.mxu1 %v2862_v21 }
 0x2a6   :  { %2617 = vmatpush3.msra.mxu1 %v1816_v45 }
 0x2a7   :  { %2618 = vmatprep.subr.mxu1 %v2862_v21 }
 0x2a8   :  { %2619 = vmatpush3.msra.mxu1 %v1815_v29 }
 0x2a9   :  { %2620 = vmatprep.subr.mxu1 %v2862_v21 }
 0x2aa   :  { %2621 = vmatpush3.msra.mxu1 %v1814_v40 }
 0x2ab   :  { %2622 = vmatprep.subr.mxu1 %v2862_v21 }
 0x2ac   :  { %2623 = vmatpush3.msra.mxu1 %v1813_v7 }
 0x2ad   :  { %2624 = vmatprep.subr.mxu1 %v2862_v21 }
 0x2ae   :  { %2625 = vmatpush3.msra.mxu1 %v1812_v2 }
 0x2af   :  { %2626 = vmatprep.subr.mxu1 %v2862_v21 }
 0x2b0   :  { %2627 = vmatpush3.msra.mxu1 %v1811_v28 }
 0x2b1   :  { %2628 = vmatprep.subr.mxu1 %v2862_v21 }
 0x2b2   :  { %2629 = vmatpush3.msra.mxu1 %v1810_v15 }
 0x2b3   :  { %2630 = vmatprep.subr.mxu1 %v2862_v21 }
 0x2b4   :  { %2631 = vmatpush3.msra.mxu1 %v1809_v0 }
 0x2b5   :  { %2632 = vmatprep.subr.mxu1 %v2862_v21 }
 0x2b6   :  { %2633 = vmatpush3.msra.mxu1 %v1808_v33 }
 0x2b7   :  { %2634 = vmatprep.subr.mxu1 %v2862_v21 }
 0x2b8   :  { %2635 = vmatpush3.msra.mxu1 %v1807_v61 }
 0x2b9   :  { %2637 = vmatmul.mubr.f32.vlgmr.msra.gmra.mxu1 %v1202_v55 }
 0x331   :  { %v2479_v13 = vpop.f32.mrf.mxu0 }
 0x333   :  { %v2480_v16 = vpop.f32.mrf.mxu0 }
 0x334   :  { %v2481_v5 = vadd.f32 %v2480_v16, %v2479_v13 }
 0x335   :  { %v2444_v30 = vpop.f32.mrf.mxu1 }
 0x337   :  { %v2445_v4 = vpop.f32.mrf.mxu1 }
 0x338   :  { %v2446_v18 = vadd.f32 %v2445_v4, %v2444_v30 }
 0x33a   :  { %v1960_v37 = vadd.f32 %v2481_v5, %v2446_v18 }
 0x358   :  { %v2514_v54 = vpop.f32.mrf.mxu1 }
 0x359   :  { %v2549_v19 = vpop.f32.mrf.mxu0 }
 0x35a   :  { %v2515_v20 = vpop.f32.mrf.mxu1 }
 0x35b   :  { %v2516_v36 = vadd.f32 %v2515_v20, %v2514_v54  ;;  %v2550_v60 = vpop.f32.mrf.mxu0 }
 0x35c   :  { %v2551_v32 = vadd.f32 %v2550_v60, %v2549_v19 }
 0x35d   :  { %v2030_v38 = vadd.f32 %v2516_v36, %v1960_v37 }
 0x35f   :  { %v2100_v52 = vadd.f32 %v2551_v32, %v2030_v38 }
 0x379   :  { %v2169_v43 = vpop.f32.mrf.mxu1 }
 0x37a   :  { %v2170_v21 = vadd.f32 %v2169_v43, %v2100_v52 }
 0x37b   :  { %v2638_v9 = vpop.f32.mrf.mxu1 }
 0x37c   :  { %2173 = vadd.xlane.f32.xlu1 %v2170_v21  ;;  %v2176_v3 = vmul.f32 %v2170_v21, %v2170_v21 }
 0x380   :  { %2177 = vadd.xlane.f32.xlu1 %v2176_v3 }
 0x405   :  { %v2174_v46 = vpop.xlane.xlu1 %2173 }
 0x406   :  { %v2175_v35 = vmul.f32 0.0625, %v2174_v46 }
 0x408   :  { %v2180_v39 = vmul.f32 %v2175_v35, %v2175_v35  ;;  %v2182_v14 = vsub.f32 %v2170_v21, %v2175_v35 }
 0x409   :  { %v2178_v44 = vpop.xlane.xlu1 %2177 }
 0x40a   :  { %v2179_v42 = vmul.f32 0.0625, %v2178_v44 }
 0x40c   :  { %v2181_v12 = vsub.f32 %v2179_v42, %v2180_v39 }
 0x40e   :  { %v2183_v62 = vadd.f32 1e-05, %v2181_v12 }
 0x410   :  { %2658 = vrsqrt.f32 %v2183_v62 }
 0x41d   :  { %v2659_v26 = vpop.eup %2658 }
 0x41e   :  { %v2185_v57 = vmul.f32 %v2659_v26, %v2182_v14 }
 0x420   :  { %v2193_v56 = vmul.f32 %v2253_v48, %v2185_v57 }
 0x422   :  { %v2201_v10 = vadd.f32 %v2254_v41, %v2193_v56 }
 0x424   :  { %vm2203_vm10 = vcmp.ge.f32.partialorder %v2201_v10, 0.0  ;;  %v2205_v8 = vmul.f32 %v2204_v27, %v2201_v10 }
 0x426   :  { %v2206_v50 = vsel %vm2203_vm10, %v2201_v10, %v2205_v8 }
 0x427   :  { %2207 = vst [vmem:[#allocation19] sm:$0xff] %v2206_v50 }
 0x428   :  { %2831 = shalt.err (!%p2828_p2)
}
 0x429   :  { %2217 = dma.vmem_to_hbm [thread:$0]  %s2215_s2, 128, %s3931_s15, [#allocation7]  }
 0x42a   :  { %2850 = dma.done.wait [#allocation7], 128  }
 0x42b   :  { %2851 = vsyncadd [#allocation7], 4294967168 }
 0x42c   :  { %2221 = vsyncpa [#allocation6], 1 }
 0x42d   :  { %2222 = vsyncpa [#allocation9], 1 }
 0x42e   :  { %2223 = vsyncpa [#allocation12], 1 }
 0x42f   :  { %2224 = vsyncpa [#allocation15], 1 }
 0x430   :  { %2225 = vsyncpa [#allocation18], 1 }
 0x431   :  { %2226 = vsyncpa [#allocation7], 1 }

</bundles_post_ra>
